<compile_context>
chip_gen: v7x
topology: tpu7x:2x2x1
jax: 0.10.0
libtpu: 0.0.40
codegen_flags: <defaults>
</compile_context>

<pallas_src>
import jax
import jax.numpy as jnp
import numpy as np
from jax.experimental import pallas as pl
from jax.experimental.pallas import tpu as pltpu


def _stage_kernel(x_ref, wcat_ref, b1_ref, w2_ref, o_ref, acc_ref, col_ref):
    # x_ref:    (1, H, W, C)        input image (NHWC), fetched once per n
    # wcat_ref: (1, Ktot, hidden)   fused weights of block d (Ktot = C + 9*dc)
    # b1_ref:   (1, 1, hidden)      folded BN shift of block d (f32)
    # w2_ref:   (1, hidden, C)      second 1x1 conv (layer_scale folded)
    # o_ref:    (1, H, W, C)        output image, written once per n
    # acc_ref:  (H, W, C) f32       residual-stream accumulator (scratch)
    # col_ref:  (H, W, Ktot) f32    im2col staging buffer (scratch)
    _, H, W, C = x_ref.shape
    Ktot = col_ref.shape[-1]
    dc = (Ktot - C) // 9
    HW = H * W
    cdt = wcat_ref.dtype                       # MXU operand dtype (f32 / bf16)
    d = pl.program_id(1)

    # ---- block 0: load the residual stream into the f32 accumulator -------
    @pl.when(d == 0)
    def _init():
        acc_ref[...] = x_ref[0].astype(jnp.float32)

    x3 = acc_ref[...]                          # (H, W, C) f32

    # ---- build the im2col operand: [ full-C passthrough | 9 shifted taps ]
    # Passthrough columns (first dc rows of the fused weight are zeroed, so
    # no non-prefix lane slicing is needed here).
    col_ref[:, :, :C] = x3
    # Zero-padded first-dc-channel view, built as a value (the halo is the
    # only part that is "padding"; every column range below is fully
    # overwritten each block, so the scratch never needs a zero-init pass).
    xc = x3[:, :, :dc]                         # (H, W, dc)
    zrow = jnp.zeros((1, W, dc), jnp.float32)
    zcol = jnp.zeros((H + 2, 1, dc), jnp.float32)
    xp = jnp.concatenate(
        [zcol, jnp.concatenate([zrow, xc, zrow], axis=0), zcol], axis=1)
    for k in range(9):                         # static 9-tap unroll
        kh, kw = k // 3, k % 3
        col_ref[:, :, C + k * dc:C + (k + 1) * dc] = xp[kh:kh + H, kw:kw + W, :]

    # ---- single GEMM: (partial conv  +  1x1 conv  +  BN scale) ------------
    cols = col_ref[...].reshape(HW, Ktot).astype(cdt)
    h = jnp.dot(cols, wcat_ref[0], preferred_element_type=jnp.float32)
    # BN shift + ReLU in f32.
    h = jnp.maximum(h + b1_ref[0], 0.0)        # (HW, hidden)

    # ---- second 1x1 conv (+ folded layer_scale) + residual ----------------
    y = jnp.dot(h.astype(cdt), w2_ref[0], preferred_element_type=jnp.float32)
    acc_ref[...] = x3 + y.reshape(H, W, C)

    # ---- last block: emit the stage output ---------------------------------
    @pl.when(d == pl.num_programs(1) - 1)
    def _emit():
        o_ref[0] = acc_ref[...].astype(o_ref.dtype)


def basic_stage_forward(x_nchw, blocks, n_div, eps=1e-5,
                        compute_dtype=jnp.bfloat16):
    """BasicStage forward (inference).

    x_nchw: (N, C, H, W) float32.
    blocks: list (length = depth) of dicts with PyTorch-shaped params:
        w3    (dc, dc, 3, 3)  Partial_conv3 weight (OIHW, no bias)
        w1    (hidden, C)     mlp[0] 1x1 conv weight (O, I)
        gamma, beta, mean, var  (hidden,)  BatchNorm2d (eval) params/stats
        w2    (C, hidden)     mlp[3] 1x1 conv weight (O, I)
        layer_scale  (C,) or None
    compute_dtype: dtype of MXU operands / weights (bf16 recommended on TPU).
    Returns (N, C, H, W) in x_nchw.dtype.
    """
    N, C, H, W = x_nchw.shape
    dc = C // n_div
    depth = len(blocks)
    hidden = blocks[0]["w1"].shape[0]
    Ktot = C + 9 * dc

    # ---- fold + fuse all weights once in the wrapper (f32, then cast) -----
    wcat_l, b1_l, w2_l = [], [], []
    for blk in blocks:
        scale = blk["gamma"] / jnp.sqrt(blk["var"] + eps)
        shift = blk["beta"] - blk["mean"] * scale
        w1 = blk["w1"].reshape(hidden, C).T * scale[None, :]      # (C, hidden)
        # 3x3 conv fused into the first 1x1 conv: W3_k^T @ W1[:dc].
        w3w1 = jnp.concatenate(
            [blk["w3"][:, :, kh, kw].T @ w1[:dc]
             for kh in range(3) for kw in range(3)], axis=0)      # (9*dc, hidden)
        w1f = w1.at[:dc].set(0.0)                                 # untouched part
        wcat = jnp.concatenate([w1f, w3w1], axis=0)               # (Ktot, hidden)
        w2 = blk["w2"].reshape(C, hidden).T                       # (hidden, C)
        if blk.get("layer_scale") is not None:
            w2 = w2 * blk["layer_scale"][None, :]
        wcat_l.append(wcat)
        b1_l.append(shift.reshape(1, hidden))
        w2_l.append(w2)

    wcat = jnp.stack(wcat_l).astype(compute_dtype)   # (depth, Ktot, hidden)
    b1 = jnp.stack(b1_l).astype(jnp.float32)         # (depth, 1, hidden)
    w2 = jnp.stack(w2_l).astype(compute_dtype)       # (depth, hidden, C)

    # Single layout conversion for the whole stage (channels -> lanes).
    x = jnp.transpose(x_nchw, (0, 2, 3, 1))          # (N, H, W, C)

    out = pl.pallas_call(
        _stage_kernel,
        out_shape=jax.ShapeDtypeStruct((N, H, W, C), x.dtype),
        grid=(N, depth),
        in_specs=[
            pl.BlockSpec((1, H, W, C), lambda n, d: (n, 0, 0, 0)),
            pl.BlockSpec((1, Ktot, hidden), lambda n, d: (d, 0, 0)),
            pl.BlockSpec((1, 1, hidden), lambda n, d: (d, 0, 0)),
            pl.BlockSpec((1, hidden, C), lambda n, d: (d, 0, 0)),
        ],
        out_specs=pl.BlockSpec((1, H, W, C), lambda n, d: (n, 0, 0, 0)),
        scratch_shapes=[
            pltpu.VMEM((H, W, C), jnp.float32),       # residual accumulator
            pltpu.VMEM((H, W, Ktot), jnp.float32),    # im2col staging buffer
        ],
        compiler_params=pltpu.CompilerParams(
            dimension_semantics=("parallel", "arbitrary"),
            vmem_limit_bytes=32 * 1024 * 1024),
    )(x, wcat, b1, w2)

    return jnp.transpose(out, (0, 3, 1, 2))          # back to NCHW


def _reference(x, blocks, n_div, eps=1e-5):
    """Pure-JAX reference mirroring the PyTorch module (eval mode)."""
    C = x.shape[1]
    dc = C // n_div
    hp = jax.lax.Precision.HIGHEST
    y = x
    for blk in blocks:
        conv = jax.lax.conv_general_dilated(
            y[:, :dc], blk["w3"], window_strides=(1, 1),
            padding=((1, 1), (1, 1)),
            dimension_numbers=("NCHW", "OIHW", "NCHW"), precision=hp)
        sm = jnp.concatenate([conv, y[:, dc:]], axis=1)
        m = jnp.einsum("nchw,oc->nohw", sm, blk["w1"], precision=hp)
        scale = blk["gamma"] / jnp.sqrt(blk["var"] + eps)
        shift = blk["beta"] - blk["mean"] * scale
        m = m * scale[None, :, None, None] + shift[None, :, None, None]
        m = jnp.maximum(m, 0.0)
        m = jnp.einsum("nchw,oc->nohw", m, blk["w2"], precision=hp)
        if blk.get("layer_scale") is not None:
            m = m * blk["layer_scale"][None, :, None, None]
        y = y + m
    return y


if __name__ == "__main__":
    # Small shapes consistent with the module: dim=32, depth=2, n_div=4,
    # mlp_ratio=2 -> dc=8, hidden=64; input (2, 32, 16, 16).
    N, dim, H, W = 2, 32, 16, 16
    depth, n_div, mlp_ratio = 2, 4, 2.0
    dc = dim // n_div
    hidden = int(dim * mlp_ratio)

    key = jax.random.PRNGKey(0)
    kx, key = jax.random.split(key)
    x = jax.random.normal(kx, (N, dim, H, W), dtype=jnp.float32)

    blocks = []
    for _ in range(depth):
        keys = jax.random.split(key, 8)
        key = keys[0]
        blocks.append(dict(
            w3=0.1 * jax.random.normal(keys[1], (dc, dc, 3, 3), jnp.float32),
            w1=0.1 * jax.random.normal(keys[2], (hidden, dim), jnp.float32),
            gamma=1.0 + 0.1 * jax.random.normal(keys[3], (hidden,), jnp.float32),
            beta=0.1 * jax.random.normal(keys[4], (hidden,), jnp.float32),
            mean=0.1 * jax.random.normal(keys[5], (hidden,), jnp.float32),
            var=jnp.abs(jax.random.normal(keys[6], (hidden,), jnp.float32)) + 0.5,
            w2=0.1 * jax.random.normal(keys[7], (dim, hidden), jnp.float32),
            layer_scale=None,   # layer_scale_init_value = 0 (FasterNet default)
        ))

    ref = _reference(x, blocks, n_div)

    # f32 compute path: tight correctness check.
    out_f32 = basic_stage_forward(x, blocks, n_div, compute_dtype=jnp.float32)
    out_f32 = jax.block_until_ready(out_f32)
    np.testing.assert_allclose(np.asarray(out_f32), np.asarray(ref),
                               rtol=1e-3, atol=1e-3)

    # bf16 MXU-operand path (recommended on v5e/v6e/v7x): loose check.
    out_bf16 = basic_stage_forward(x, blocks, n_div, compute_dtype=jnp.bfloat16)
    out_bf16 = jax.block_until_ready(out_bf16)
    np.testing.assert_allclose(np.asarray(out_bf16), np.asarray(ref),
                               rtol=1e-1, atol=1e-1)

    print("KERNEL_OK")
</pallas_src>

<mosaic_0001>
module attributes {stable_mosaic.version = 11 : i64} {
  func.func @_stage_kernel(%arg0: i32, %arg1: i32, %arg2: memref<1x16x16x32xf32, #tpu.memory_space<vmem>>, %arg3: memref<1x104x64xf32, #tpu.memory_space<vmem>>, %arg4: memref<1x1x64xf32, #tpu.memory_space<vmem>>, %arg5: memref<1x64x32xf32, #tpu.memory_space<vmem>>, %arg6: memref<1x16x16x32xf32, #tpu.memory_space<vmem>>, %arg7: memref<16x16x32xf32, #tpu.memory_space<vmem>>, %arg8: memref<16x16x104xf32, #tpu.memory_space<vmem>>) attributes {dimension_semantics = [#tpu.dimension_semantics<parallel>, #tpu.dimension_semantics<arbitrary>], iteration_bounds = array<i64: 2, 2>, scalar_prefetch = 0 : i64, scratch_operands = 2 : i64, tpu.core_type = #tpu.core_type<tc>, window_params = [{transform_indices = @transform_0, window_bounds = array<i64: 1, 16, 16, 32>}, {transform_indices = @transform_1, window_bounds = array<i64: 1, 104, 64>}, {transform_indices = @transform_2, window_bounds = array<i64: 1, 1, 64>}, {transform_indices = @transform_3, window_bounds = array<i64: 1, 64, 32>}, {transform_indices = @transform_4, window_bounds = array<i64: 1, 16, 16, 32>}]} {
    %c0_i32 = arith.constant 0 : i32
    %0 = arith.cmpi eq, %arg1, %c0_i32 : i32
    %1 = arith.extui %0 : i1 to i32
    %c0_i32_0 = arith.constant 0 : i32
    %2 = arith.cmpi ne, %1, %c0_i32_0 : i32
    scf.if %2 {
      %c0_44 = arith.constant 0 : index
      %c0_45 = arith.constant 0 : index
      %c0_46 = arith.constant 0 : index
      %c0_47 = arith.constant 0 : index
      %48 = vector.load %arg2[%c0_44, %c0_45, %c0_46, %c0_47] : memref<1x16x16x32xf32, #tpu.memory_space<vmem>>, vector<1x16x16x32xf32>
      %49 = vector.shape_cast %48 : vector<1x16x16x32xf32> to vector<16x16x32xf32>
      %c0_48 = arith.constant 0 : index
      %c0_49 = arith.constant 0 : index
      %c0_50 = arith.constant 0 : index
      %50 = vector.load %arg7[%c0_48, %c0_49, %c0_50] : memref<16x16x32xf32, #tpu.memory_space<vmem>>, vector<16x16x32xf32>
      tpu.vector_store %arg7[%c0_48, %c0_49, %c0_50], %49 {strides = array<i32>} : memref<16x16x32xf32, #tpu.memory_space<vmem>>, vector<16x16x32xf32>,
    } else {
    }
    %c0 = arith.constant 0 : index
    %c0_1 = arith.constant 0 : index
    %c0_2 = arith.constant 0 : index
    %3 = vector.load %arg7[%c0, %c0_1, %c0_2] : memref<16x16x32xf32, #tpu.memory_space<vmem>>, vector<16x16x32xf32>
    %c0_3 = arith.constant 0 : index
    %c0_4 = arith.constant 0 : index
    %c0_5 = arith.constant 0 : index
    %4 = vector.load %arg8[%c0_3, %c0_4, %c0_5] : memref<16x16x104xf32, #tpu.memory_space<vmem>>, vector<16x16x32xf32>
    tpu.vector_store %arg8[%c0_3, %c0_4, %c0_5], %3 {strides = array<i32>} : memref<16x16x104xf32, #tpu.memory_space<vmem>>, vector<16x16x32xf32>,
    %5 = vector.extract_strided_slice %3 {offsets = [0, 0, 0], sizes = [16, 16, 8], strides = [1, 1, 1]} : vector<16x16x32xf32> to vector<16x16x8xf32>
    %cst = arith.constant 0.000000e+00 : f32
    %6 = vector.broadcast %cst : f32 to vector<1x16x8xf32>
    %cst_6 = arith.constant 0.000000e+00 : f32
    %7 = vector.broadcast %cst_6 : f32 to vector<18x1x8xf32>
    %8 = tpu.concatenate %6, %5, %6 in 0 : vector<1x16x8xf32>, vector<16x16x8xf32>, vector<1x16x8xf32> -> vector<18x16x8xf32>
    %9 = tpu.concatenate %7, %8, %7 in 1 : vector<18x1x8xf32>, vector<18x16x8xf32>, vector<18x1x8xf32> -> vector<18x18x8xf32>
    %10 = vector.extract_strided_slice %9 {offsets = [0, 0, 0], sizes = [16, 16, 8], strides = [1, 1, 1]} : vector<18x18x8xf32> to vector<16x16x8xf32>
    %c0_7 = arith.constant 0 : index
    %c0_8 = arith.constant 0 : index
    %c32 = arith.constant 32 : index
    %11 = vector.load %arg8[%c0_7, %c0_8, %c32] : memref<16x16x104xf32, #tpu.memory_space<vmem>>, vector<16x16x8xf32>
    tpu.vector_store %arg8[%c0_7, %c0_8, %c32], %10 {strides = array<i32>} : memref<16x16x104xf32, #tpu.memory_space<vmem>>, vector<16x16x8xf32>,
    %12 = vector.extract_strided_slice %9 {offsets = [0, 1, 0], sizes = [16, 16, 8], strides = [1, 1, 1]} : vector<18x18x8xf32> to vector<16x16x8xf32>
    %c0_9 = arith.constant 0 : index
    %c0_10 = arith.constant 0 : index
    %c40 = arith.constant 40 : index
    %13 = vector.load %arg8[%c0_9, %c0_10, %c40] : memref<16x16x104xf32, #tpu.memory_space<vmem>>, vector<16x16x8xf32>
    tpu.vector_store %arg8[%c0_9, %c0_10, %c40], %12 {strides = array<i32>} : memref<16x16x104xf32, #tpu.memory_space<vmem>>, vector<16x16x8xf32>,
    %14 = vector.extract_strided_slice %9 {offsets = [0, 2, 0], sizes = [16, 16, 8], strides = [1, 1, 1]} : vector<18x18x8xf32> to vector<16x16x8xf32>
    %c0_11 = arith.constant 0 : index
    %c0_12 = arith.constant 0 : index
    %c48 = arith.constant 48 : index
    %15 = vector.load %arg8[%c0_11, %c0_12, %c48] : memref<16x16x104xf32, #tpu.memory_space<vmem>>, vector<16x16x8xf32>
    tpu.vector_store %arg8[%c0_11, %c0_12, %c48], %14 {strides = array<i32>} : memref<16x16x104xf32, #tpu.memory_space<vmem>>, vector<16x16x8xf32>,
    %16 = vector.extract_strided_slice %9 {offsets = [1, 0, 0], sizes = [16, 16, 8], strides = [1, 1, 1]} : vector<18x18x8xf32> to vector<16x16x8xf32>
    %c0_13 = arith.constant 0 : index
    %c0_14 = arith.constant 0 : index
    %c56 = arith.constant 56 : index
    %17 = vector.load %arg8[%c0_13, %c0_14, %c56] : memref<16x16x104xf32, #tpu.memory_space<vmem>>, vector<16x16x8xf32>
    tpu.vector_store %arg8[%c0_13, %c0_14, %c56], %16 {strides = array<i32>} : memref<16x16x104xf32, #tpu.memory_space<vmem>>, vector<16x16x8xf32>,
    %18 = vector.extract_strided_slice %9 {offsets = [1, 1, 0], sizes = [16, 16, 8], strides = [1, 1, 1]} : vector<18x18x8xf32> to vector<16x16x8xf32>
    %c0_15 = arith.constant 0 : index
    %c0_16 = arith.constant 0 : index
    %c64 = arith.constant 64 : index
    %19 = vector.load %arg8[%c0_15, %c0_16, %c64] : memref<16x16x104xf32, #tpu.memory_space<vmem>>, vector<16x16x8xf32>
    tpu.vector_store %arg8[%c0_15, %c0_16, %c64], %18 {strides = array<i32>} : memref<16x16x104xf32, #tpu.memory_space<vmem>>, vector<16x16x8xf32>,
    %20 = vector.extract_strided_slice %9 {offsets = [1, 2, 0], sizes = [16, 16, 8], strides = [1, 1, 1]} : vector<18x18x8xf32> to vector<16x16x8xf32>
    %c0_17 = arith.constant 0 : index
    %c0_18 = arith.constant 0 : index
    %c72 = arith.constant 72 : index
    %21 = vector.load %arg8[%c0_17, %c0_18, %c72] : memref<16x16x104xf32, #tpu.memory_space<vmem>>, vector<16x16x8xf32>
    tpu.vector_store %arg8[%c0_17, %c0_18, %c72], %20 {strides = array<i32>} : memref<16x16x104xf32, #tpu.memory_space<vmem>>, vector<16x16x8xf32>,
    %22 = vector.extract_strided_slice %9 {offsets = [2, 0, 0], sizes = [16, 16, 8], strides = [1, 1, 1]} : vector<18x18x8xf32> to vector<16x16x8xf32>
    %c0_19 = arith.constant 0 : index
    %c0_20 = arith.constant 0 : index
    %c80 = arith.constant 80 : index
    %23 = vector.load %arg8[%c0_19, %c0_20, %c80] : memref<16x16x104xf32, #tpu.memory_space<vmem>>, vector<16x16x8xf32>
    tpu.vector_store %arg8[%c0_19, %c0_20, %c80], %22 {strides = array<i32>} : memref<16x16x104xf32, #tpu.memory_space<vmem>>, vector<16x16x8xf32>,
    %24 = vector.extract_strided_slice %9 {offsets = [2, 1, 0], sizes = [16, 16, 8], strides = [1, 1, 1]} : vector<18x18x8xf32> to vector<16x16x8xf32>
    %c0_21 = arith.constant 0 : index
    %c0_22 = arith.constant 0 : index
    %c88 = arith.constant 88 : index
    %25 = vector.load %arg8[%c0_21, %c0_22, %c88] : memref<16x16x104xf32, #tpu.memory_space<vmem>>, vector<16x16x8xf32>
    tpu.vector_store %arg8[%c0_21, %c0_22, %c88], %24 {strides = array<i32>} : memref<16x16x104xf32, #tpu.memory_space<vmem>>, vector<16x16x8xf32>,
    %26 = vector.extract_strided_slice %9 {offsets = [2, 2, 0], sizes = [16, 16, 8], strides = [1, 1, 1]} : vector<18x18x8xf32> to vector<16x16x8xf32>
    %c0_23 = arith.constant 0 : index
    %c0_24 = arith.constant 0 : index
    %c96 = arith.constant 96 : index
    %27 = vector.load %arg8[%c0_23, %c0_24, %c96] : memref<16x16x104xf32, #tpu.memory_space<vmem>>, vector<16x16x8xf32>
    tpu.vector_store %arg8[%c0_23, %c0_24, %c96], %26 {strides = array<i32>} : memref<16x16x104xf32, #tpu.memory_space<vmem>>, vector<16x16x8xf32>,
    %c0_25 = arith.constant 0 : index
    %c0_26 = arith.constant 0 : index
    %c0_27 = arith.constant 0 : index
    %28 = vector.load %arg8[%c0_25, %c0_26, %c0_27] : memref<16x16x104xf32, #tpu.memory_space<vmem>>, vector<16x16x104xf32>
    %29 = vector.shape_cast %28 : vector<16x16x104xf32> to vector<256x104xf32>
    %c0_28 = arith.constant 0 : index
    %c0_29 = arith.constant 0 : index
    %c0_30 = arith.constant 0 : index
    %30 = vector.load %arg3[%c0_28, %c0_29, %c0_30] : memref<1x104x64xf32, #tpu.memory_space<vmem>>, vector<1x104x64xf32>
    %31 = vector.shape_cast %30 : vector<1x104x64xf32> to vector<104x64xf32>
    %cst_31 = arith.constant dense<0.000000e+00> : vector<256x64xf32>
    %32 = tpu.matmul %29, %31, %cst_31 {dimension_numbers = #tpu.dot_dimension_numbers<[1], [0], [0], [1], [0, 0, 1, 1], [], []>} : vector<256x104xf32>, vector<104x64xf32>, vector<256x64xf32> -> vector<256x64xf32>
    %c0_32 = arith.constant 0 : index
    %c0_33 = arith.constant 0 : index
    %c0_34 = arith.constant 0 : index
    %33 = vector.load %arg4[%c0_32, %c0_33, %c0_34] : memref<1x1x64xf32, #tpu.memory_space<vmem>>, vector<1x1x64xf32>
    %34 = vector.shape_cast %33 : vector<1x1x64xf32> to vector<1x64xf32>
    %35 = vector.broadcast %34 : vector<1x64xf32> to vector<256x64xf32>
    %36 = arith.addf %32, %35 : vector<256x64xf32>
    %cst_35 = arith.constant 0.000000e+00 : f32
    %37 = vector.broadcast %cst_35 : f32 to vector<256x64xf32>
    %38 = arith.maximumf %36, %37 : vector<256x64xf32>
    %c0_36 = arith.constant 0 : index
    %c0_37 = arith.constant 0 : index
    %c0_38 = arith.constant 0 : index
    %39 = vector.load %arg5[%c0_36, %c0_37, %c0_38] : memref<1x64x32xf32, #tpu.memory_space<vmem>>, vector<1x64x32xf32>
    %40 = vector.shape_cast %39 : vector<1x64x32xf32> to vector<64x32xf32>
    %cst_39 = arith.constant dense<0.000000e+00> : vector<256x32xf32>
    %41 = tpu.matmul %38, %40, %cst_39 {dimension_numbers = #tpu.dot_dimension_numbers<[1], [0], [0], [1], [0, 0, 1, 1], [], []>} : vector<256x64xf32>, vector<64x32xf32>, vector<256x32xf32> -> vector<256x32xf32>
    %42 = vector.shape_cast %41 : vector<256x32xf32> to vector<16x16x32xf32>
    %43 = arith.addf %3, %42 : vector<16x16x32xf32>
    %c0_40 = arith.constant 0 : index
    %c0_41 = arith.constant 0 : index
    %c0_42 = arith.constant 0 : index
    %44 = vector.load %arg7[%c0_40, %c0_41, %c0_42] : memref<16x16x32xf32, #tpu.memory_space<vmem>>, vector<16x16x32xf32>
    tpu.vector_store %arg7[%c0_40, %c0_41, %c0_42], %43 {strides = array<i32>} : memref<16x16x32xf32, #tpu.memory_space<vmem>>, vector<16x16x32xf32>,
    %c1_i32 = arith.constant 1 : i32
    %45 = arith.cmpi eq, %arg1, %c1_i32 : i32
    %46 = arith.extui %45 : i1 to i32
    %c0_i32_43 = arith.constant 0 : i32
    %47 = arith.cmpi ne, %46, %c0_i32_43 : i32
    scf.if %47 {
      %c0_44 = arith.constant 0 : index
      %c0_45 = arith.constant 0 : index
      %c0_46 = arith.constant 0 : index
      %48 = vector.load %arg7[%c0_44, %c0_45, %c0_46] : memref<16x16x32xf32, #tpu.memory_space<vmem>>, vector<16x16x32xf32>
      %c0_47 = arith.constant 0 : index
      %c0_48 = arith.constant 0 : index
      %c0_49 = arith.constant 0 : index
      %c0_50 = arith.constant 0 : index
      %49 = vector.load %arg6[%c0_47, %c0_48, %c0_49, %c0_50] : memref<1x16x16x32xf32, #tpu.memory_space<vmem>>, vector<1x16x16x32xf32>
      %50 = vector.shape_cast %49 : vector<1x16x16x32xf32> to vector<16x16x32xf32>
      %51 = vector.shape_cast %48 : vector<16x16x32xf32> to vector<1x16x16x32xf32>
      tpu.vector_store %arg6[%c0_47, %c0_48, %c0_49, %c0_50], %51 {strides = array<i32>} : memref<1x16x16x32xf32, #tpu.memory_space<vmem>>, vector<1x16x16x32xf32>,
    } else {
    }
    return
  }
  func.func @transform_0(%arg0: i32, %arg1: i32) -> (i32, i32, i32, i32) {
    %c0_i32 = arith.constant 0 : i32
    %c0_i32_0 = arith.constant 0 : i32
    %c0_i32_1 = arith.constant 0 : i32
    %c0_i32_2 = arith.constant 0 : i32
    return %arg0, %c0_i32, %c0_i32_0, %c0_i32_1 : i32, i32, i32, i32
  }
  func.func @transform_1(%arg0: i32, %arg1: i32) -> (i32, i32, i32) {
    %c0_i32 = arith.constant 0 : i32
    %c0_i32_0 = arith.constant 0 : i32
    %c0_i32_1 = arith.constant 0 : i32
    return %arg1, %c0_i32, %c0_i32_0 : i32, i32, i32
  }
  func.func @transform_2(%arg0: i32, %arg1: i32) -> (i32, i32, i32) {
    %c0_i32 = arith.constant 0 : i32
    %c0_i32_0 = arith.constant 0 : i32
    %c0_i32_1 = arith.constant 0 : i32
    return %arg1, %c0_i32, %c0_i32_0 : i32, i32, i32
  }
  func.func @transform_3(%arg0: i32, %arg1: i32) -> (i32, i32, i32) {
    %c0_i32 = arith.constant 0 : i32
    %c0_i32_0 = arith.constant 0 : i32
    %c0_i32_1 = arith.constant 0 : i32
    return %arg1, %c0_i32, %c0_i32_0 : i32, i32, i32
  }
  func.func @transform_4(%arg0: i32, %arg1: i32) -> (i32, i32, i32, i32) {
    %c0_i32 = arith.constant 0 : i32
    %c0_i32_0 = arith.constant 0 : i32
    %c0_i32_1 = arith.constant 0 : i32
    %c0_i32_2 = arith.constant 0 : i32
    return %arg0, %c0_i32, %c0_i32_0, %c0_i32_1 : i32, i32, i32, i32
  }
}

</mosaic_0001>

<bundles_post_ra>
// kernel: tpu_custom_call.1
= control target key start
LH: loop header
LB: loop body
LE: loop exit
PB: predicated region body
PF: predicated region fallthrough
CT: control target
= control target key end

     0   :  { %9 = vsyncpa [#allocation5], 0  ;;  %s5703_s0 = inlined_call_operand.vmem [shape: f32[2,16,16,32], index: 0, kind: input, shape index: {}]   ;;  %s5704_s1 = inlined_call_operand.vmem [shape: f32[2,104,64], index: 1, kind: input, shape index: {}]   ;;  %s5705_s2 = inlined_call_operand.vmem [shape: f32[2,1,64], index: 2, kind: input, shape index: {}]   ;;  %s5706_s3 = inlined_call_operand.vmem [shape: f32[2,64,32], index: 3, kind: input, shape index: {}]   ;;  %s5707_s4 = inlined_call_operand.hbm [shape: f32[2,16,16,32], index: 4, kind: output, shape index: {}]  }
   0x1   :  { %11 = vsyncpa [#allocation5 + $0x1], 0  ;;  %s3724_s15 = smov 0   ;;  %s3726_s16 = smov 0  }
   0x2   :  { %s3728_s17 = smov 0   ;;  %s3730_s18 = smov 0  }
   0x3   :  { %s3732_s19 = smov 0   ;;  %s3734_s20 = smov 0  }
   0x4   :  { %s3736_s21 = smov 0   ;;  %s3738_s22 = smov 0  }
   0x5 LB: > { %5758 = sst [smem:[#allocation7_spill]] %s3676_s20  ;;  %s3126_s23 = sadd.s32 4294967295, %s3684_s22   ;;  %s3684_s22 = sphi %s3738_s22, %s17_s22   ;;  %s3680_s21 = sphi %s3736_s21, %s5948_s21   ;;  %s3676_s20 = sphi %s3734_s20, %s5947_s20   ;;  %s3672_s19 = sphi %s3732_s19, %s5946_s19   ;;  %s3668_s18 = sphi %s3730_s18, %s5945_s18   ;;  %s3664_s17 = sphi %s3728_s17, %s5951_s17   ;;  %s3660_s16 = sphi %s3726_s16, %s5950_s16   ;;  %s3656_s15 = sphi %s3724_s15, %s5949_s15  }
   0x6   : > { %5759 = sst [smem:[#allocation8_spill]] %s3680_s21  ;;  %s3127_s24 = sadd.s32 4294967294, %s3684_s22  }
   0x7   : > { %s26_s25 = sadd.s32 1, %s3676_s20  ;;  %s29_s26 = sadd.s32 1, %s3680_s21 }
   0x8   : > { %p27_p0 = scmp.ge.s32.totalorder %s26_s25, 2  ;;  %p150_p1 = scmp.ne.s32.totalorder %s3664_s17, %s3660_s16 }
   0x9   : > { %p151_p2 = scmp.eq.s32.totalorder %s3126_s23, 3  ;;  %p156_p4 = scmp.ne.s32.totalorder %s3660_s16, %s3656_s15 }
   0xa   : > { %s5953_s25 = smov (%p27_p0, %s26_s25), 0  ;;  %s5955_s26 = smov (!%p27_p0, %s29_s26), %s3680_s21 }
   0xb   : > { %5760 = sst [smem:[#allocation9_spill]] %s5953_s25  ;;  %p3773_p3 = por %p151_p2, %p150_p1 }
   0xc   : > { %p31_p5 = scmp.ge.s32.totalorder %s5955_s26, 2  ;;  %p157_p6 = scmp.eq.s32.totalorder %s3127_s24, 3 }
   0xd   : > { %p3130_p7 = scmp.ge.s32.totalorder %s3684_s22, 1  ;;  %p205_p8 = scmp.lt.s32.totalorder %s3684_s22, 5 }
   0xe   : > { %s5957_s26 = smov (%p31_p5, %s5955_s26), 0  ;;  %p3783_p9 = por %p157_p6, %p156_p4 }
   0xf   : > { %5762 = sst [smem:[#allocation10_spill]] %s5957_s26  ;;  %p206_p10 = pnand %p3130_p7, %p205_p8 }
  0x10   : > { %s137_s29 = ssub.s32 %s3680_s21, %s5957_s26  ;;  %s140_s30 = sadd.s32 1, %s3664_s17 }
  0x11   : > { %p138_p11 = scmp.eq.s32.totalorder %s137_s29, 0  ;;  %209 = sbr.rel (%p206_p10) target bundleno = 1403 (0x57b), region = 36 }
  0x13   : > { %s3791_s5 = scalar_select %p138_p11, %s3664_s17, %s140_s30  }
  0x18   : > { %s5709_s6 = sand.u32 1, %s3660_s16   ;;  %p244_p12 = scmp.lt.s32.totalorder %s3672_s19, 1 }
  0x19   : > { %s3131_s7 = sshll.u32 %s5709_s6, 8  ;;  %p249_p13 = scmp.lt.s32.totalorder %s3668_s18, 1 }
  0x1a   : > { %s245_s8 = scalar_select %p244_p12, %s3672_s19, 1 }
  0x1b   : > { %s250_s9 = scalar_select %p249_p13, %s3668_s18, 1 }
  0x1c   : > { %s3209_s10 = sshll.u32 %s245_s8, 8  ;;  %s3820_s11 = scalar_lea.vmem [#allocation4], %s3131_s7 }
  0x1d   : > { %s3803_s13 = scalar_lea.vmem %s5703_s0, %s3209_s10  ;;  %s3475_s14 = smul.u32 104, %s250_s9 }
  0x1e   : > { %s3808_s29 = scalar_lea.vmem %s5705_s2, %s250_s9  ;;  %s3210_s30 = sshll.u32 %s250_s9, 6 }
  0x1f   : > { %s3813_s6 = scalar_lea.vmem %s5704_s1, %s3475_s14  ;;  %s3818_s8 = scalar_lea.vmem %s5706_s3, %s3210_s30 }
  0x20   : > { %p3137_p0 = scmp.ne.s32.totalorder %s3668_s18, 0 }
  0x21   : > { %v266_v0 = vld [vmem:[%s3803_s13] sm:$0xff] (!%p3137_p0)  ;;  %vm298_vm0 = vcmask (!%p3137_p0), 261120   ;;  %v267_v1 = vld [vmem:[%s3803_s13 + $0x8] sm:$0xff] (!%p3137_p0)  ;;  %v268_v2 = vld [vmem:[%s3803_s13 + $0x10] sm:$0xff] (!%p3137_p0) }
  0x22   : > { %265 = sbr.rel (%p3137_p0) target bundleno = 50 (0x32), region = 40  ;;  %299 = vst.msk [vmem:[#allocation2] sm:$0xff] (!%p3137_p0), %vm298_vm0, %v266_v0  ;;  %300 = vst.msk [vmem:[#allocation2 + $0x8] sm:$0xff] (!%p3137_p0), %vm298_vm0, %v267_v1  ;;  %v269_v3 = vld [vmem:[%s3803_s13 + $0x18] sm:$0xff] (!%p3137_p0)  ;;  %v270_v4 = vld [vmem:[%s3803_s13 + $0x20] sm:$0xff] (!%p3137_p0) }
  0x23   : > { %301 = vst.msk [vmem:[#allocation2 + $0x10] sm:$0xff] (!%p3137_p0), %vm298_vm0, %v268_v2  ;;  %v271_v5 = vld [vmem:[%s3803_s13 + $0x28] sm:$0xff] (!%p3137_p0)  ;;  %302 = vst.msk [vmem:[#allocation2 + $0x18] sm:$0xff] (!%p3137_p0), %vm298_vm0, %v269_v3  ;;  %v272_v6 = vld [vmem:[%s3803_s13 + $0x30] sm:$0xff] (!%p3137_p0) }
  0x24   : > { %303 = vst.msk [vmem:[#allocation2 + $0x20] sm:$0xff] (!%p3137_p0), %vm298_vm0, %v270_v4  ;;  %304 = vst.msk [vmem:[#allocation2 + $0x28] sm:$0xff] (!%p3137_p0), %vm298_vm0, %v271_v5  ;;  %v273_v7 = vld [vmem:[%s3803_s13 + $0x38] sm:$0xff] (!%p3137_p0)  ;;  %v274_v8 = vld [vmem:[%s3803_s13 + $0x40] sm:$0xff] (!%p3137_p0) }
  0x25   : > { %305 = vst.msk [vmem:[#allocation2 + $0x30] sm:$0xff] (!%p3137_p0), %vm298_vm0, %v272_v6  ;;  %306 = vst.msk [vmem:[#allocation2 + $0x38] sm:$0xff] (!%p3137_p0), %vm298_vm0, %v273_v7  ;;  %v275_v9 = vld [vmem:[%s3803_s13 + $0x48] sm:$0xff] (!%p3137_p0)  ;;  %v276_v10 = vld [vmem:[%s3803_s13 + $0x50] sm:$0xff] (!%p3137_p0) }
  0x26   : > { %307 = vst.msk [vmem:[#allocation2 + $0x40] sm:$0xff] (!%p3137_p0), %vm298_vm0, %v274_v8  ;;  %v277_v11 = vld [vmem:[%s3803_s13 + $0x58] sm:$0xff] (!%p3137_p0)  ;;  %308 = vst.msk [vmem:[#allocation2 + $0x48] sm:$0xff] (!%p3137_p0), %vm298_vm0, %v275_v9  ;;  %v278_v12 = vld [vmem:[%s3803_s13 + $0x60] sm:$0xff] (!%p3137_p0) }
  0x27   : > { %309 = vst.msk [vmem:[#allocation2 + $0x50] sm:$0xff] (!%p3137_p0), %vm298_vm0, %v276_v10  ;;  %310 = vst.msk [vmem:[#allocation2 + $0x58] sm:$0xff] (!%p3137_p0), %vm298_vm0, %v277_v11  ;;  %v279_v13 = vld [vmem:[%s3803_s13 + $0x68] sm:$0xff] (!%p3137_p0)  ;;  %v280_v14 = vld [vmem:[%s3803_s13 + $0x70] sm:$0xff] (!%p3137_p0) }
  0x28   : > { %311 = vst.msk [vmem:[#allocation2 + $0x60] sm:$0xff] (!%p3137_p0), %vm298_vm0, %v278_v12  ;;  %312 = vst.msk [vmem:[#allocation2 + $0x68] sm:$0xff] (!%p3137_p0), %vm298_vm0, %v279_v13  ;;  %v281_v15 = vld [vmem:[%s3803_s13 + $0x78] sm:$0xff] (!%p3137_p0)  ;;  %v282_v16 = vld [vmem:[%s3803_s13 + $0x80] sm:$0xff] (!%p3137_p0) }
  0x29   : > { %313 = vst.msk [vmem:[#allocation2 + $0x70] sm:$0xff] %vm298_vm0, %v280_v14  ;;  %v283_v17 = vld [vmem:[%s3803_s13 + $0x88] sm:$0xff]  ;;  %314 = vst.msk [vmem:[#allocation2 + $0x78] sm:$0xff] %vm298_vm0, %v281_v15  ;;  %v284_v18 = vld [vmem:[%s3803_s13 + $0x90] sm:$0xff] }
  0x2a   : > { %315 = vst.msk [vmem:[#allocation2 + $0x80] sm:$0xff] %vm298_vm0, %v282_v16  ;;  %316 = vst.msk [vmem:[#allocation2 + $0x88] sm:$0xff] %vm298_vm0, %v283_v17  ;;  %v285_v19 = vld [vmem:[%s3803_s13 + $0x98] sm:$0xff]  ;;  %v286_v20 = vld [vmem:[%s3803_s13 + $0xa0] sm:$0xff] }
  0x2b   : > { %317 = vst.msk [vmem:[#allocation2 + $0x90] sm:$0xff] %vm298_vm0, %v284_v18  ;;  %318 = vst.msk [vmem:[#allocation2 + $0x98] sm:$0xff] %vm298_vm0, %v285_v19  ;;  %v287_v21 = vld [vmem:[%s3803_s13 + $0xa8] sm:$0xff]  ;;  %v288_v22 = vld [vmem:[%s3803_s13 + $0xb0] sm:$0xff] }
  0x2c   : > { %319 = vst.msk [vmem:[#allocation2 + $0xa0] sm:$0xff] %vm298_vm0, %v286_v20  ;;  %v289_v23 = vld [vmem:[%s3803_s13 + $0xb8] sm:$0xff]  ;;  %320 = vst.msk [vmem:[#allocation2 + $0xa8] sm:$0xff] %vm298_vm0, %v287_v21  ;;  %v290_v24 = vld [vmem:[%s3803_s13 + $0xc0] sm:$0xff] }
  0x2d   : > { %321 = vst.msk [vmem:[#allocation2 + $0xb0] sm:$0xff] %vm298_vm0, %v288_v22  ;;  %322 = vst.msk [vmem:[#allocation2 + $0xb8] sm:$0xff] %vm298_vm0, %v289_v23  ;;  %v291_v25 = vld [vmem:[%s3803_s13 + $0xc8] sm:$0xff]  ;;  %v292_v26 = vld [vmem:[%s3803_s13 + $0xd0] sm:$0xff] }
  0x2e   : > { %323 = vst.msk [vmem:[#allocation2 + $0xc0] sm:$0xff] %vm298_vm0, %v290_v24  ;;  %324 = vst.msk [vmem:[#allocation2 + $0xc8] sm:$0xff] %vm298_vm0, %v291_v25  ;;  %v293_v27 = vld [vmem:[%s3803_s13 + $0xd8] sm:$0xff]  ;;  %v294_v28 = vld [vmem:[%s3803_s13 + $0xe0] sm:$0xff] }
  0x2f   : > { %325 = vst.msk [vmem:[#allocation2 + $0xd0] sm:$0xff] %vm298_vm0, %v292_v26  ;;  %v295_v29 = vld [vmem:[%s3803_s13 + $0xe8] sm:$0xff]  ;;  %326 = vst.msk [vmem:[#allocation2 + $0xd8] sm:$0xff] %vm298_vm0, %v293_v27  ;;  %v296_v30 = vld [vmem:[%s3803_s13 + $0xf0] sm:$0xff] }
  0x30   : > { %327 = vst.msk [vmem:[#allocation2 + $0xe0] sm:$0xff] %vm298_vm0, %v294_v28  ;;  %328 = vst.msk [vmem:[#allocation2 + $0xe8] sm:$0xff] %vm298_vm0, %v295_v29  ;;  %v297_v31 = vld [vmem:[%s3803_s13 + $0xf8] sm:$0xff] }
  0x31   : > { %329 = vst.msk [vmem:[#allocation2 + $0xf0] sm:$0xff] %vm298_vm0, %v296_v30  ;;  %330 = vst.msk [vmem:[#allocation2 + $0xf8] sm:$0xff] %vm298_vm0, %v297_v31 }
  0x32 PF: > { %v3887_v32 = vld [vmem:[#allocation2] sm:$0xff]  ;;  %v3889_v33 = vld [vmem:[#allocation2 + $0x8] sm:$0xff]  ;;  %vm5749_vm1 = vcmask 1040384   ;;  %v3686_v37 = vmov 0.0   ;;  %s3687_s20 = smov 32   ;;  %v3984_v7 = vld [vmem:[#allocation2 + $0x90] sm:$0xff] }
  0x33   : > { %v3891_v34 = vld [vmem:[#allocation2 + $0x10] sm:$0xff]  ;;  %v432_v35 = vrot.slane %v3887_v32, 7  ;;  %v5722_v36 = vrot.slane %v3889_v33, 7  ;;  %v3895_v38 = vrot.slane %v3686_v37, 7  ;;  %v3912_v44 = vld [vmem:[#allocation2 + $0x18] sm:$0xff]  ;;  %v3980_v5 = vld [vmem:[#allocation2 + $0x80] sm:$0xff] }
  0x34   : > { %v435_v39 = vrot.slane %v3891_v34, 7  ;;  %v3898_v40 = vld [vmem:[#allocation2 + $0x20] sm:$0xff]  ;;  %v5720_v49 = vrot.slane %v3912_v44, 7  ;;  %v3928_v50 = vld [vmem:[#allocation2 + $0x28] sm:$0xff]  ;;  %5771 = vst [vmem:[#allocation18_spill] sm:$0xff] %v3980_v5  ;;  %5773 = vst [vmem:[#allocation20_spill] sm:$0xff] %v3984_v7 }
  0x35   : > { %v3903_v41 = vsel %vm5749_vm1, %v432_v35, %v5722_v36  ;;  %v513_v42 = vsel %vm5749_vm1, 0.0, %v3895_v38  ;;  %v438_v46 = vrot.slane %v3898_v40, 7  ;;  %v3920_v47 = vld [vmem:[#allocation2 + $0x30] sm:$0xff]  ;;  %v3923_v48 = vsel %vm5749_vm1, 0.0, %v432_v35  ;;  %v3946_v56 = vld [vmem:[#allocation2 + $0x38] sm:$0xff]  ;;  %v3986_v8 = vld [vmem:[#allocation2 + $0x88] sm:$0xff] }
  0x36   : > { %569 = vrot.lane.b32.xlu1 %v3903_v41, %s3687_s20  ;;  %v3910_v43 = vpack.i.bf16 %v3895_v38, %v513_v42  ;;  %v3915_v45 = vsel %vm5749_vm1, 0.0, %v435_v39  ;;  %v441_v52 = vrot.slane %v3920_v47, 7  ;;  %v3936_v53 = vld [vmem:[#allocation2 + $0x40] sm:$0xff]  ;;  %v3941_v54 = vsel %vm5749_vm1, %v435_v39, %v5720_v49  ;;  %v3964_v62 = vld [vmem:[#allocation2 + $0x48] sm:$0xff]  ;;  %v3990_v10 = vld [vmem:[#allocation2 + $0x98] sm:$0xff]  ;;  %s3688_s21 = smov 40  }
  0x37   : > { %v3931_v51 = vsel %vm5749_vm1, 0.0, %v438_v46  ;;  %5764 = vst [vmem:[#allocation11_spill] sm:$0xff] %v3936_v53  ;;  %v5719_v55 = vrot.slane %v3928_v50, 7  ;;  %v444_v58 = vrot.slane %v3936_v53, 7  ;;  %v3954_v59 = vld [vmem:[#allocation2 + $0x50] sm:$0xff]  ;;  %v5717_v61 = vrot.slane %v3946_v56, 7 }
  0x38   : > { %3560 = vrot.lane.b32.xlu0 %v3910_v43, %s3687_s20  ;;  %v3949_v57 = vsel %vm5749_vm1, 0.0, %v441_v52  ;;  %5765 = vst [vmem:[#allocation12_spill] sm:$0xff] %v3954_v59  ;;  %5766 = vst [vmem:[#allocation13_spill] sm:$0xff] %v3964_v62  ;;  %v3966_v63 = vld [vmem:[#allocation2 + $0x60] sm:$0xff]  ;;  %v447_v1 = vrot.slane %v3954_v59, 7  ;;  %v3974_v2 = vld [vmem:[#allocation2 + $0x58] sm:$0xff] }
  0x39   : > { %v3959_v60 = vsel %vm5749_vm1, %v438_v46, %v5719_v55  ;;  %5767 = vst [vmem:[#allocation14_spill] sm:$0xff] %v3966_v63  ;;  %v3971_v0 = vsel %vm5749_vm1, 0.0, %v444_v58  ;;  %5768 = vst [vmem:[#allocation15_spill] sm:$0xff] %v3974_v2  ;;  %v3976_v3 = vld [vmem:[#allocation2 + $0x70] sm:$0xff]  ;;  %v3978_v4 = vld [vmem:[#allocation2 + $0x68] sm:$0xff]  ;;  %v4009_v17 = vsel %vm5749_vm1, %v441_v52, %v5717_v61  ;;  %v5716_v18 = vrot.slane %v3964_v62, 7 }
  0x3a   : > { %571 = vrot.lane.b32.xlu1 %v3915_v45, %s3687_s20  ;;  %5769 = vst [vmem:[#allocation16_spill] sm:$0xff] %v3976_v3  ;;  %5770 = vst [vmem:[#allocation17_spill] sm:$0xff] %v3978_v4  ;;  %v3982_v6 = vld [vmem:[#allocation2 + $0x78] sm:$0xff]  ;;  %v3988_v9 = vld [vmem:[#allocation2 + $0xa0] sm:$0xff]  ;;  %vm5748_vm2 = vcmask 261120   ;;  %v4083_v22 = vsel %vm5749_vm1, 0.0, %v447_v1 }
  0x3b   : > { %5772 = vst [vmem:[#allocation19_spill] sm:$0xff] %v3982_v6  ;;  %5774 = vst [vmem:[#allocation21_spill] sm:$0xff] %v3988_v9  ;;  %v3992_v11 = vld [vmem:[#allocation2 + $0xb0] sm:$0xff]  ;;  %v3994_v12 = vld [vmem:[#allocation2 + $0xa8] sm:$0xff]  ;;  %v450_v23 = vrot.slane %v3966_v63, 7  ;;  %v4093_v24 = vsel %vm5749_vm1, %v444_v58, %v5716_v18  ;;  %v5714_v25 = vrot.slane %v3974_v2, 7 }
  0x3c   : > { %567 = vrot.lane.b32.xlu0 %v3923_v48, %s3687_s20  ;;  %5775 = vst [vmem:[#allocation22_spill] sm:$0xff] %v3990_v10  ;;  %5776 = vst [vmem:[#allocation23_spill] sm:$0xff] %v3992_v11  ;;  %v3996_v13 = vld [vmem:[#allocation2 + $0xc0] sm:$0xff]  ;;  %v4000_v14 = vld [vmem:[#allocation2 + $0xb8] sm:$0xff]  ;;  %v453_v27 = vrot.slane %v3976_v3, 7  ;;  %v5713_v29 = vrot.slane %v3978_v4, 7 }
  0x3d   : > { %5777 = vst [vmem:[#allocation24_spill] sm:$0xff] %v3994_v12  ;;  %5778 = vst [vmem:[#allocation25_spill] sm:$0xff] %v3996_v13  ;;  %v4002_v15 = vld [vmem:[#allocation2 + $0xd0] sm:$0xff]  ;;  %v4004_v16 = vld [vmem:[#allocation2 + $0xc8] sm:$0xff]  ;;  %v4099_v26 = vsel %vm5749_vm1, 0.0, %v450_v23  ;;  %v4109_v28 = vsel %vm5749_vm1, %v447_v1, %v5714_v25  ;;  %v456_v31 = vrot.slane %v3980_v5, 7 }
  0x3e   : > { %575 = vrot.lane.b32.xlu1 %v3931_v51, %s3687_s20  ;;  %5779 = vst [vmem:[#allocation26_spill] sm:$0xff] %v4000_v14  ;;  %5780 = vst [vmem:[#allocation27_spill] sm:$0xff] %v4002_v15  ;;  %v4012_v19 = vld [vmem:[#allocation2 + $0xe0] sm:$0xff]  ;;  %v4014_v20 = vld [vmem:[#allocation2 + $0xd8] sm:$0xff]  ;;  %v4115_v30 = vsel %vm5749_vm1, 0.0, %v453_v27  ;;  %v4123_v35 = vsel %vm5749_vm1, %v450_v23, %v5713_v29  ;;  %v5712_v37 = vrot.slane %v3982_v6, 7 }
  0x3f   : > { %5781 = vst [vmem:[#allocation28_spill] sm:$0xff] %v4004_v16  ;;  %5782 = vst [vmem:[#allocation29_spill] sm:$0xff] %v4012_v19  ;;  %v4016_v21 = vld [vmem:[#allocation2 + $0xe8] sm:$0xff]  ;;  %v4129_v39 = vsel %vm5749_vm1, 0.0, %v456_v31  ;;  %v459_v42 = vrot.slane %v3984_v7, 7  ;;  %v5715_v52 = vrot.slane %v3986_v8, 7 }
  0x40   : > { %573 = vrot.lane.b32.xlu0 %v3941_v54, %s3687_s20  ;;  %5783 = vst [vmem:[#allocation30_spill] sm:$0xff] %v4014_v20  ;;  %5784 = vst [vmem:[#allocation31_spill] sm:$0xff] %v4016_v21  ;;  %v4137_v46 = vsel %vm5749_vm1, %v453_v27, %v5712_v37  ;;  %v462_v1 = vrot.slane %v3988_v9, 7  ;;  %v5718_v27 = vrot.slane %v3990_v10, 7  ;;  %v465_v29 = vrot.slane %v3992_v11, 7  ;;  %v4176_v61 = vld [vmem:[#allocation2 + $0xf0] sm:$0xff] }
  0x41   : > { %367 = vst.msk [vmem:[#allocation3 + $0x18] sm:$0xff] %vm5748_vm2, %v3912_v44  ;;  %364 = vst.msk [vmem:[#allocation3] sm:$0xff] %vm5748_vm2, %v3887_v32  ;;  %v4143_v58 = vsel %vm5749_vm1, 0.0, %v459_v42  ;;  %v4151_v23 = vsel %vm5749_vm1, %v456_v31, %v5715_v52  ;;  %v5721_v31 = vrot.slane %v3994_v12, 7  ;;  %v468_v18 = vrot.slane %v3996_v13, 7  ;;  %v4200_v36 = vld [vmem:[#allocation2 + $0xf8] sm:$0xff] }
  0x42   : > { %579 = vrot.lane.b32.xlu1 %v3949_v57, %s3687_s20  ;;  %365 = vst.msk [vmem:[#allocation3 + $0x8] sm:$0xff] %vm5748_vm2, %v3889_v33  ;;  %366 = vst.msk [vmem:[#allocation3 + $0x10] sm:$0xff] %vm5748_vm2, %v3891_v34  ;;  %v4157_v37 = vsel %vm5749_vm1, 0.0, %v462_v1  ;;  %v4165_v25 = vsel %vm5749_vm1, %v459_v42, %v5718_v27  ;;  %v4171_v52 = vsel %vm5749_vm1, 0.0, %v465_v29  ;;  %v5725_v27 = vrot.slane %v4000_v14, 7  ;;  %s3689_s25 = smov 48  }
  0x43   : > { %368 = vst.msk [vmem:[#allocation3 + $0x20] sm:$0xff] %vm5748_vm2, %v3898_v40  ;;  %369 = vst.msk [vmem:[#allocation3 + $0x28] sm:$0xff] %vm5748_vm2, %v3928_v50  ;;  %v4181_v42 = vsel %vm5749_vm1, %v462_v1, %v5721_v31  ;;  %v4189_v55 = vsel %vm5749_vm1, 0.0, %v468_v18  ;;  %v471_v49 = vrot.slane %v4002_v15, 7  ;;  %v5730_v31 = vrot.slane %v4004_v16, 7  ;;  %s3690_s26 = smov 56  }
  0x44   : > { %577 = vrot.lane.b32.xlu0 %v3959_v60, %s3687_s20  ;;  %370 = vst.msk [vmem:[#allocation3 + $0x30] sm:$0xff] %vm5748_vm2, %v3920_v47  ;;  %371 = vst.msk [vmem:[#allocation3 + $0x38] sm:$0xff] %vm5748_vm2, %v3946_v56  ;;  %v4197_v1 = vsel %vm5749_vm1, %v465_v29, %v5725_v27  ;;  %v5729_v27 = vrot.slane %v4014_v20, 7  ;;  %vm659_vm3 = vcmask 326912   ;;  %vm852_vm4 = vcmask 392513   ;;  %s3691_s7 = smov 64  }
  0x45   : > { %372 = vst.msk [vmem:[#allocation3 + $0x40] sm:$0xff] %vm5748_vm2, %v3936_v53  ;;  %373 = vst.msk [vmem:[#allocation3 + $0x48] sm:$0xff] %vm5748_vm2, %v3964_v62  ;;  %v4215_v29 = vsel %vm5749_vm1, %v468_v18, %v5730_v31  ;;  %vm854_vm5 = vcmask 392512   ;;  %vm856_vm6 = vcmask 385344   ;;  %s3692_s9 = smov 72   ;;  %s3693_s10 = smov 80  }
  0x46   : > { %583 = vrot.lane.b32.xlu1 %v3971_v0, %s3687_s20  ;;  %374 = vst.msk [vmem:[#allocation3 + $0x50] sm:$0xff] %vm5748_vm2, %v3954_v59  ;;  %375 = vst.msk [vmem:[#allocation3 + $0x58] sm:$0xff] %vm5748_vm2, %v3974_v2  ;;  %s3694_s12 = smov 88   ;;  %s3695_s13 = smov 96   ;;  %vm5751_vm7 = vcmask 451968   ;;  %vm5752_vm8 = vcmask 458112  }
  0x47   : > { %376 = vst.msk [vmem:[#allocation3 + $0x60] sm:$0xff] %vm5748_vm2, %v3966_v63  ;;  %377 = vst.msk [vmem:[#allocation3 + $0x68] sm:$0xff] %vm5748_vm2, %v3978_v4  ;;  %vm5750_vm9 = vcmask 458114   ;;  %vm1195_vm10 = vcmask 523712   ;;  %vm1373_vm11 = vcmask 589313   ;;  %vm1377_vm12 = vcmask 582144  }
  0x48   : > { %378 = vst.msk [vmem:[#allocation3 + $0x70] sm:$0xff] %vm5748_vm2, %v3976_v3  ;;  %379 = vst.msk [vmem:[#allocation3 + $0x78] sm:$0xff] %vm5748_vm2, %v3982_v6  ;;  %581 = vrot.lane.b32.xlu0 %v4009_v17, %s3687_s20  ;;  %v5791_v3 = vrot.slane %v3978_v4, 7  ;;  %v5793_v4 = vrot.slane %v3986_v8, 7  ;;  %vm1375_vm13 = vcmask 589312   ;;  %vm5754_vm14 = vcmask 654912  }
  0x49   : > { %380 = vst.msk [vmem:[#allocation3 + $0x80] sm:$0xff] %vm5748_vm2, %v3980_v5  ;;  %381 = vst.msk [vmem:[#allocation3 + $0x88] sm:$0xff] %vm5748_vm2, %v3986_v8  ;;  %vm5756_vm15 = vcmask 654914   ;;  %vm1715_vm0 = vcmask 720512   ;;  %p3203_p1 = scmp.ne.s32.totalorder %s3668_s18, 1 }
  0x4a   : > { %382 = vst.msk [vmem:[#allocation3 + $0x90] sm:$0xff] %vm5748_vm2, %v3984_v7  ;;  %383 = vst.msk [vmem:[#allocation3 + $0x98] sm:$0xff] %vm5748_vm2, %v3990_v10  ;;  %587 = vrot.lane.b32.xlu1 %v4083_v22, %s3687_s20  ;;  %v5789_v7 = vrot.slane %v3964_v62, 7  ;;  %v4319_v63 = vsel %vm5749_vm1, %v5791_v3, 0.0  ;;  %v4341_v59 = vsel %vm5749_vm1, %v5793_v4, 0.0 }
  0x4b   : > { %384 = vst.msk [vmem:[#allocation3 + $0xa0] sm:$0xff] %vm5748_vm2, %v3988_v9  ;;  %385 = vst.msk [vmem:[#allocation3 + $0xa8] sm:$0xff] %vm5748_vm2, %v3994_v12  ;;  %v5731_v9 = vrot.slane %v4016_v21, 7 }
  0x4c   : > { %386 = vst.msk [vmem:[#allocation3 + $0xb0] sm:$0xff] %vm5748_vm2, %v3992_v11  ;;  %387 = vst.msk [vmem:[#allocation3 + $0xb8] sm:$0xff] %vm5748_vm2, %v4000_v14  ;;  %585 = vrot.lane.b32.xlu0 %v4093_v24, %s3687_s20  ;;  %v4297_v5 = vsel %vm5749_vm1, %v5789_v7, 0.0 }
  0x4d   : > { %388 = vst.msk [vmem:[#allocation3 + $0xc0] sm:$0xff] %vm5748_vm2, %v3996_v13  ;;  %389 = vst.msk [vmem:[#allocation3 + $0xc8] sm:$0xff] %vm5748_vm2, %v4004_v16  ;;  %v474_v13 = vrot.slane %v4012_v19, 7 }
  0x4e   : > { %390 = vst.msk [vmem:[#allocation3 + $0xd0] sm:$0xff] %vm5748_vm2, %v4002_v15  ;;  %391 = vst.msk [vmem:[#allocation3 + $0xd8] sm:$0xff] %vm5748_vm2, %v4014_v20  ;;  %591 = vrot.lane.b32.xlu1 %v4099_v26, %s3687_s20  ;;  %v4207_v15 = vsel %vm5749_vm1, 0.0, %v471_v49 }
  0x4f   : > { %392 = vst.msk [vmem:[#allocation3 + $0xe0] sm:$0xff] %vm5748_vm2, %v4012_v19  ;;  %393 = vst.msk [vmem:[#allocation3 + $0xe8] sm:$0xff] %vm5748_vm2, %v4016_v21  ;;  %v4221_v11 = vsel %vm5749_vm1, 0.0, %v474_v13  ;;  %v4228_v19 = vsel %vm5749_vm1, %v471_v49, %v5729_v27  ;;  %v4238_v18 = vsel %vm5749_vm1, %v474_v13, %v5731_v9  ;;  %v4246_v49 = vsel %vm5749_vm1, %v3895_v38, 0.0 }
  0x50   : > { %589 = vrot.lane.b32.xlu0 %v4109_v28, %s3687_s20  ;;  %394 = vst.msk [vmem:[#allocation3 + $0xf0] sm:$0xff] %vm5748_vm2, %v4176_v61  ;;  %395 = vst.msk [vmem:[#allocation3 + $0xf8] sm:$0xff] %vm5748_vm2, %v4200_v36  ;;  %v5785_v27 = vrot.slane %v3889_v33, 7  ;;  %v5786_v38 = vrot.slane %v3912_v44, 7  ;;  %vm1896_vm2 = vcmask 778944  }
  0x52   : > { %595 = vrot.lane.b32.xlu1 %v4115_v30, %s3687_s20  ;;  %v4253_v31 = vsel %vm5749_vm1, %v5785_v27, 0.0  ;;  %v4268_v13 = vsel %vm5749_vm1, %v5786_v38, 0.0  ;;  %v5787_v27 = vrot.slane %v3928_v50, 7  ;;  %v5788_v38 = vrot.slane %v3946_v56, 7 }
  0x54   : > { %593 = vrot.lane.b32.xlu0 %v4123_v35, %s3687_s20  ;;  %v4275_v9 = vsel %vm5749_vm1, %v5787_v27, 0.0  ;;  %v4290_v27 = vsel %vm5749_vm1, %v5788_v38, 0.0  ;;  %v5790_v38 = vrot.slane %v3974_v2, 7 }
  0x56   : > { %599 = vrot.lane.b32.xlu1 %v4129_v39, %s3687_s20  ;;  %v4312_v7 = vsel %vm5749_vm1, %v5790_v38, 0.0  ;;  %v5792_v38 = vrot.slane %v3982_v6, 7 }
  0x58   : > { %597 = vrot.lane.b32.xlu0 %v4137_v46, %s3687_s20  ;;  %v4334_v3 = vsel %vm5749_vm1, %v5792_v38, 0.0 }
  0x5a   : > { %603 = vrot.lane.b32.xlu1 %v4143_v58, %s3687_s20 }
  0x5c   : > { %601 = vrot.lane.b32.xlu0 %v4151_v23, %s3687_s20 }
  0x5e   : > { %607 = vrot.lane.b32.xlu1 %v4157_v37, %s3687_s20 }
  0x60   : > { %605 = vrot.lane.b32.xlu0 %v4165_v25, %s3687_s20 }
  0x62   : > { %611 = vrot.lane.b32.xlu1 %v4171_v52, %s3687_s20 }
  0x64   : > { %609 = vrot.lane.b32.xlu0 %v4181_v42, %s3687_s20 }
  0x66   : > { %615 = vrot.lane.b32.xlu1 %v4189_v55, %s3687_s20 }
  0x68   : > { %613 = vrot.lane.b32.xlu0 %v4197_v1, %s3687_s20 }
  0x6a   : > { %619 = vrot.lane.b32.xlu1 %v4207_v15, %s3687_s20 }
  0x6c   : > { %617 = vrot.lane.b32.xlu0 %v4215_v29, %s3687_s20 }
  0x6e   : > { %623 = vrot.lane.b32.xlu1 %v4221_v11, %s3687_s20 }
  0x70   : > { %621 = vrot.lane.b32.xlu0 %v4228_v19, %s3687_s20 }
  0x72   : > { %3565 = vrot.lane.b32.xlu1 %v3910_v43, %s3688_s21 }
  0x74   : > { %625 = vrot.lane.b32.xlu0 %v4238_v18, %s3687_s20 }
  0x76   : > { %714 = vrot.lane.b32.xlu1 %v3923_v48, %s3688_s21 }
  0x78   : > { %712 = vrot.lane.b32.xlu0 %v4246_v49, %s3688_s21 }
  0x7a   : > { %718 = vrot.lane.b32.xlu1 %v4253_v31, %s3688_s21 }
  0x7c   : > { %716 = vrot.lane.b32.xlu0 %v3903_v41, %s3688_s21 }
  0x7e   : > { %722 = vrot.lane.b32.xlu1 %v3941_v54, %s3688_s21 }
  0x80   : > { %720 = vrot.lane.b32.xlu0 %v3915_v45, %s3688_s21 }
  0x82   : > { %726 = vrot.lane.b32.xlu1 %v3931_v51, %s3688_s21 }
  0x84   : > { %724 = vrot.lane.b32.xlu0 %v4268_v13, %s3688_s21 }
  0x86   : > { %730 = vrot.lane.b32.xlu1 %v4275_v9, %s3688_s21 }
  0x88   : > { %728 = vrot.lane.b32.xlu0 %v3959_v60, %s3688_s21 }
  0x8a   : > { %734 = vrot.lane.b32.xlu1 %v4009_v17, %s3688_s21 }
  0x8c   : > { %732 = vrot.lane.b32.xlu0 %v3949_v57, %s3688_s21 }
  0x8e   : > { %738 = vrot.lane.b32.xlu1 %v3971_v0, %s3688_s21 }
  0x90   : > { %736 = vrot.lane.b32.xlu0 %v4290_v27, %s3688_s21 }
  0x92   : > { %742 = vrot.lane.b32.xlu1 %v4297_v5, %s3688_s21 }
  0x94   : > { %740 = vrot.lane.b32.xlu0 %v4093_v24, %s3688_s21 }
  0x96   : > { %746 = vrot.lane.b32.xlu1 %v4109_v28, %s3688_s21 }
  0x98   : > { %744 = vrot.lane.b32.xlu0 %v4083_v22, %s3688_s21 }
  0x9a   : > { %750 = vrot.lane.b32.xlu1 %v4099_v26, %s3688_s21 }
  0x9c   : > { %748 = vrot.lane.b32.xlu0 %v4312_v7, %s3688_s21 }
  0x9e   : > { %754 = vrot.lane.b32.xlu1 %v4319_v63, %s3688_s21 }
  0xa0   : > { %752 = vrot.lane.b32.xlu0 %v4123_v35, %s3688_s21 }
  0xa2   : > { %758 = vrot.lane.b32.xlu1 %v4137_v46, %s3688_s21 }
  0xa4   : > { %756 = vrot.lane.b32.xlu0 %v4115_v30, %s3688_s21 }
  0xa6   : > { %762 = vrot.lane.b32.xlu1 %v4129_v39, %s3688_s21 }
  0xa8   : > { %760 = vrot.lane.b32.xlu0 %v4334_v3, %s3688_s21  ;;  %v570_v2 = vpop.permute.xlu1 %569 }
  0xa9   : > { %663 = vst.msk [vmem:[#allocation3 + $0x18] sm:$0xff] %vm659_vm3, %v570_v2  ;;  %v5794_v2 = vrot.slane %v3990_v10, 7 }
  0xaa   : > { %v3561_v53 = vpop.permute.xlu0 %3560  ;;  %766 = vrot.lane.b32.xlu1 %v4341_v59, %s3688_s21 }
  0xab   : > { %v3563_v38 = vunpack.i.h.bf16 %v3561_v53  ;;  %v3562_v6 = vunpack.i.l.bf16 %v3561_v53 }
  0xac   : > { %764 = vrot.lane.b32.xlu0 %v4151_v23, %s3688_s21  ;;  %v572_v62 = vpop.permute.xlu1 %571 }
  0xad   : > { %660 = vst.msk [vmem:[#allocation3] sm:$0xff] %vm659_vm3, %v3562_v6  ;;  %661 = vst.msk [vmem:[#allocation3 + $0x8] sm:$0xff] %vm659_vm3, %v3563_v38  ;;  %v4362_v6 = vsel %vm5749_vm1, %v5794_v2, 0.0 }
  0xae   : > { %664 = vst.msk [vmem:[#allocation3 + $0x20] sm:$0xff] %vm659_vm3, %v572_v62  ;;  %v568_v4 = vpop.permute.xlu0 %567  ;;  %770 = vrot.lane.b32.xlu1 %v4165_v25, %s3688_s21  ;;  %v5795_v62 = vrot.slane %v3994_v12, 7 }
  0xaf   : > { %662 = vst.msk [vmem:[#allocation3 + $0x10] sm:$0xff] %vm659_vm3, %v568_v4 }
  0xb0   : > { %768 = vrot.lane.b32.xlu0 %v4143_v58, %s3688_s21  ;;  %v576_v53 = vpop.permute.xlu1 %575  ;;  %v4370_v4 = vsel %vm5749_vm1, %v5795_v62, 0.0 }
  0xb1   : > { %666 = vst.msk [vmem:[#allocation3 + $0x30] sm:$0xff] %vm659_vm3, %v576_v53 }
  0xb2   : > { %v574_v38 = vpop.permute.xlu0 %573  ;;  %774 = vrot.lane.b32.xlu1 %v4157_v37, %s3688_s21 }
  0xb3   : > { %665 = vst.msk [vmem:[#allocation3 + $0x28] sm:$0xff] %vm659_vm3, %v574_v38 }
  0xb4   : > { %772 = vrot.lane.b32.xlu0 %v4362_v6, %s3688_s21  ;;  %v580_v53 = vpop.permute.xlu1 %579 }
  0xb5   : > { %668 = vst.msk [vmem:[#allocation3 + $0x40] sm:$0xff] %vm659_vm3, %v580_v53 }
  0xb6   : > { %v578_v10 = vpop.permute.xlu0 %577  ;;  %778 = vrot.lane.b32.xlu1 %v4370_v4, %s3688_s21 }
  0xb7   : > { %667 = vst.msk [vmem:[#allocation3 + $0x38] sm:$0xff] %vm659_vm3, %v578_v10  ;;  %v5796_v10 = vrot.slane %v4000_v14, 7 }
  0xb8   : > { %776 = vrot.lane.b32.xlu0 %v4181_v42, %s3688_s21  ;;  %v584_v2 = vpop.permute.xlu1 %583 }
  0xb9   : > { %670 = vst.msk [vmem:[#allocation3 + $0x50] sm:$0xff] %vm659_vm3, %v584_v2  ;;  %v4390_v53 = vsel %vm5749_vm1, %v5796_v10, 0.0  ;;  %v5797_v2 = vrot.slane %v4004_v16, 7 }
  0xba   : > { %v582_v38 = vpop.permute.xlu0 %581  ;;  %782 = vrot.lane.b32.xlu1 %v4197_v1, %s3688_s21 }
  0xbb   : > { %669 = vst.msk [vmem:[#allocation3 + $0x48] sm:$0xff] %vm659_vm3, %v582_v38  ;;  %v4398_v38 = vsel %vm5749_vm1, %v5797_v2, 0.0 }
  0xbc   : > { %780 = vrot.lane.b32.xlu0 %v4171_v52, %s3688_s21  ;;  %v588_v62 = vpop.permute.xlu1 %587 }
  0xbd   : > { %672 = vst.msk [vmem:[#allocation3 + $0x60] sm:$0xff] %vm659_vm3, %v588_v62 }
  0xbe   : > { %v586_v12 = vpop.permute.xlu0 %585  ;;  %786 = vrot.lane.b32.xlu1 %v4189_v55, %s3688_s21 }
  0xbf   : > { %671 = vst.msk [vmem:[#allocation3 + $0x58] sm:$0xff] %vm659_vm3, %v586_v12 }
  0xc0   : > { %784 = vrot.lane.b32.xlu0 %v4390_v53, %s3688_s21  ;;  %v592_v62 = vpop.permute.xlu1 %591 }
  0xc1   : > { %674 = vst.msk [vmem:[#allocation3 + $0x70] sm:$0xff] %vm659_vm3, %v592_v62 }
  0xc2   : > { %v590_v14 = vpop.permute.xlu0 %589  ;;  %790 = vrot.lane.b32.xlu1 %v4398_v38, %s3688_s21 }
  0xc3   : > { %673 = vst.msk [vmem:[#allocation3 + $0x68] sm:$0xff] %vm659_vm3, %v590_v14  ;;  %v5798_v14 = vrot.slane %v4014_v20, 7 }
  0xc4   : > { %788 = vrot.lane.b32.xlu0 %v4215_v29, %s3688_s21  ;;  %v596_v12 = vpop.permute.xlu1 %595 }
  0xc5   : > { %676 = vst.msk [vmem:[#allocation3 + $0x80] sm:$0xff] %vm659_vm3, %v596_v12  ;;  %v4418_v62 = vsel %vm5749_vm1, %v5798_v14, 0.0  ;;  %v5799_v12 = vrot.slane %v4016_v21, 7 }
  0xc6   : > { %v594_v10 = vpop.permute.xlu0 %593  ;;  %794 = vrot.lane.b32.xlu1 %v4228_v19, %s3688_s21 }
  0xc7   : > { %675 = vst.msk [vmem:[#allocation3 + $0x78] sm:$0xff] %vm659_vm3, %v594_v10  ;;  %v4426_v10 = vsel %vm5749_vm1, %v5799_v12, 0.0  ;;  %vm2089_vm1 = vcmask 851712  }
  0xc8   : > { %792 = vrot.lane.b32.xlu0 %v4207_v15, %s3688_s21  ;;  %v600_v2 = vpop.permute.xlu1 %599 }
  0xc9   : > { %678 = vst.msk [vmem:[#allocation3 + $0x90] sm:$0xff] %vm659_vm3, %v600_v2 }
  0xca   : > { %v598_v16 = vpop.permute.xlu0 %597  ;;  %798 = vrot.lane.b32.xlu1 %v4221_v11, %s3688_s21 }
  0xcb   : > { %677 = vst.msk [vmem:[#allocation3 + $0x88] sm:$0xff] %vm659_vm3, %v598_v16 }
  0xcc   : > { %796 = vrot.lane.b32.xlu0 %v4418_v62, %s3688_s21  ;;  %v604_v2 = vpop.permute.xlu1 %603 }
  0xcd   : > { %680 = vst.msk [vmem:[#allocation3 + $0xa0] sm:$0xff] %vm659_vm3, %v604_v2 }
  0xce   : > { %v602_v20 = vpop.permute.xlu0 %601  ;;  %802 = vrot.lane.b32.xlu1 %v4426_v10, %s3688_s21 }
  0xcf   : > { %679 = vst.msk [vmem:[#allocation3 + $0x98] sm:$0xff] %vm659_vm3, %v602_v20 }
  0xd0   : > { %800 = vrot.lane.b32.xlu0 %v4238_v18, %s3688_s21  ;;  %v608_v16 = vpop.permute.xlu1 %607 }
  0xd1   : > { %682 = vst.msk [vmem:[#allocation3 + $0xb0] sm:$0xff] %vm659_vm3, %v608_v16 }
  0xd2   : > { %v606_v14 = vpop.permute.xlu0 %605  ;;  %907 = vrot.lane.b32.xlu1 %v4246_v49, %s3689_s25 }
  0xd3   : > { %681 = vst.msk [vmem:[#allocation3 + $0xa8] sm:$0xff] %vm659_vm3, %v606_v14 }
  0xd4   : > { %3570 = vrot.lane.b32.xlu0 %v3910_v43, %s3689_s25  ;;  %v612_v12 = vpop.permute.xlu1 %611 }
  0xd5   : > { %684 = vst.msk [vmem:[#allocation3 + $0xc0] sm:$0xff] %vm659_vm3, %v612_v12 }
  0xd6   : > { %v610_v20 = vpop.permute.xlu0 %609  ;;  %911 = vrot.lane.b32.xlu1 %v3903_v41, %s3689_s25 }
  0xd7   : > { %683 = vst.msk [vmem:[#allocation3 + $0xb8] sm:$0xff] %vm659_vm3, %v610_v20 }
  0xd8   : > { %909 = vrot.lane.b32.xlu0 %v3923_v48, %s3689_s25  ;;  %v616_v2 = vpop.permute.xlu1 %615 }
  0xd9   : > { %686 = vst.msk [vmem:[#allocation3 + $0xd0] sm:$0xff] %vm659_vm3, %v616_v2 }
  0xda   : > { %v614_v16 = vpop.permute.xlu0 %613  ;;  %915 = vrot.lane.b32.xlu1 %v3915_v45, %s3689_s25 }
  0xdb   : > { %685 = vst.msk [vmem:[#allocation3 + $0xc8] sm:$0xff] %vm659_vm3, %v614_v16 }
  0xdc   : > { %913 = vrot.lane.b32.xlu0 %v4253_v31, %s3689_s25  ;;  %v620_v14 = vpop.permute.xlu1 %619 }
  0xdd   : > { %688 = vst.msk [vmem:[#allocation3 + $0xe0] sm:$0xff] %vm659_vm3, %v620_v14 }
  0xde   : > { %v618_v12 = vpop.permute.xlu0 %617  ;;  %919 = vrot.lane.b32.xlu1 %v4268_v13, %s3689_s25 }
  0xdf   : > { %687 = vst.msk [vmem:[#allocation3 + $0xd8] sm:$0xff] %vm659_vm3, %v618_v12 }
  0xe0   : > { %917 = vrot.lane.b32.xlu0 %v3941_v54, %s3689_s25  ;;  %v624_v20 = vpop.permute.xlu1 %623 }
  0xe1   : > { %690 = vst.msk [vmem:[#allocation3 + $0xf0] sm:$0xff] %vm659_vm3, %v624_v20 }
  0xe2   : > { %v622_v2 = vpop.permute.xlu0 %621  ;;  %923 = vrot.lane.b32.xlu1 %v3959_v60, %s3689_s25 }
  0xe3   : > { %689 = vst.msk [vmem:[#allocation3 + $0xe8] sm:$0xff] %vm659_vm3, %v622_v2 }
  0xe4   : > { %921 = vrot.lane.b32.xlu0 %v3931_v51, %s3689_s25  ;;  %v3566_v16 = vpop.permute.xlu1 %3565 }
  0xe5   : > { %v3568_v14 = vunpack.i.h.bf16 %v3566_v16  ;;  %v3567_v12 = vunpack.i.l.bf16 %v3566_v16 }
  0xe6   : > { %v626_v21 = vpop.permute.xlu0 %625  ;;  %927 = vrot.lane.b32.xlu1 %v3949_v57, %s3689_s25 }
  0xe7   : > { %853 = vst.msk [vmem:[#allocation3 - $0x1] sm:$0xfe] %vm852_vm4, %v3567_v12 }
  0xe8   : > { %691 = vst.msk [vmem:[#allocation3 + $0xf8] sm:$0xff] %vm659_vm3, %v626_v21  ;;  %925 = vrot.lane.b32.xlu0 %v4275_v9, %s3689_s25  ;;  %v715_v20 = vpop.permute.xlu1 %714  ;;  %vm5753_vm3 = vcmask 648768  }
  0xe9   : > { %855 = vst.msk [vmem:[#allocation3 + $0x7] sm:$0xff] %vm854_vm5, %v3568_v14 }
  0xea   : > { %858 = vst.msk [vmem:[#allocation3 + $0xf] sm:$0xfe] %vm852_vm4, %v715_v20  ;;  %v713_v2 = vpop.permute.xlu0 %712  ;;  %931 = vrot.lane.b32.xlu1 %v4290_v27, %s3689_s25 }
  0xeb   : > { %857 = vst.msk [vmem:[#allocation3 + $0xf] sm:$0x1] %vm856_vm6, %v713_v2 }
  0xec   : > { %929 = vrot.lane.b32.xlu0 %v4009_v17, %s3689_s25  ;;  %v719_v16 = vpop.permute.xlu1 %718 }
  0xed   : > { %860 = vst.msk [vmem:[#allocation3 + $0x1f] sm:$0x1] %vm856_vm6, %v719_v16 }
  0xee   : > { %v717_v21 = vpop.permute.xlu0 %716  ;;  %935 = vrot.lane.b32.xlu1 %v4093_v24, %s3689_s25 }
  0xef   : > { %859 = vst.msk [vmem:[#allocation3 + $0x17] sm:$0xff] %vm854_vm5, %v717_v21 }
  0xf0   : > { %933 = vrot.lane.b32.xlu0 %v3971_v0, %s3689_s25  ;;  %v723_v14 = vpop.permute.xlu1 %722 }
  0xf1   : > { %862 = vst.msk [vmem:[#allocation3 + $0x27] sm:$0xff] %vm854_vm5, %v723_v14 }
  0xf2   : > { %v721_v12 = vpop.permute.xlu0 %720  ;;  %939 = vrot.lane.b32.xlu1 %v4083_v22, %s3689_s25 }
  0xf3   : > { %861 = vst.msk [vmem:[#allocation3 + $0x1f] sm:$0xfe] %vm852_vm4, %v721_v12 }
  0xf4   : > { %937 = vrot.lane.b32.xlu0 %v4297_v5, %s3689_s25  ;;  %v727_v20 = vpop.permute.xlu1 %726 }
  0xf5   : > { %864 = vst.msk [vmem:[#allocation3 + $0x2f] sm:$0xfe] %vm852_vm4, %v727_v20 }
  0xf6   : > { %v725_v2 = vpop.permute.xlu0 %724  ;;  %943 = vrot.lane.b32.xlu1 %v4312_v7, %s3689_s25 }
  0xf7   : > { %863 = vst.msk [vmem:[#allocation3 + $0x2f] sm:$0x1] %vm856_vm6, %v725_v2 }
  0xf8   : > { %941 = vrot.lane.b32.xlu0 %v4109_v28, %s3689_s25  ;;  %v731_v16 = vpop.permute.xlu1 %730 }
  0xf9   : > { %866 = vst.msk [vmem:[#allocation3 + $0x3f] sm:$0x1] %vm856_vm6, %v731_v16 }
  0xfa   : > { %v729_v21 = vpop.permute.xlu0 %728  ;;  %1099 = vrot.lane.b32.xlu1 %v3923_v48, %s3690_s26 }
  0xfb   : > { %865 = vst.msk [vmem:[#allocation3 + $0x37] sm:$0xff] %vm854_vm5, %v729_v21 }
  0xfc   : > { %945 = vrot.lane.b32.xlu0 %v4099_v26, %s3689_s25  ;;  %v735_v14 = vpop.permute.xlu1 %734 }
  0xfd   : > { %868 = vst.msk [vmem:[#allocation3 + $0x47] sm:$0xff] %vm854_vm5, %v735_v14 }
  0xfe   : > { %v733_v12 = vpop.permute.xlu0 %732  ;;  %1229 = vrot.lane.b32.xlu1 %v3923_v48, %s3691_s7 }
  0xff   : > { %867 = vst.msk [vmem:[#allocation3 + $0x3f] sm:$0xfe] %vm852_vm4, %v733_v12 }
 0x100   : > { %1101 = vrot.lane.b32.xlu0 %v3903_v41, %s3690_s26  ;;  %v739_v20 = vpop.permute.xlu1 %738 }
 0x101   : > { %870 = vst.msk [vmem:[#allocation3 + $0x4f] sm:$0xfe] %vm852_vm4, %v739_v20  ;;  %v2170_v20 = vld [vmem:[%s3813_s6] sm:$0xff] }
 0x102   : > { %v737_v2 = vpop.permute.xlu0 %736  ;;  %1233 = vrot.lane.b32.xlu1 %v4253_v31, %s3691_s7 }
 0x103   : > { %869 = vst.msk [vmem:[#allocation3 + $0x4f] sm:$0x1] %vm856_vm6, %v737_v2  ;;  %v2171_v2 = vld [vmem:[%s3813_s6 + $0x8] sm:$0xff] }
 0x104   : > { %1231 = vrot.lane.b32.xlu0 %v3903_v41, %s3691_s7  ;;  %v743_v16 = vpop.permute.xlu1 %742 }
 0x105   : > { %872 = vst.msk [vmem:[#allocation3 + $0x5f] sm:$0x1] %vm856_vm6, %v743_v16 }
 0x106   : > { %v741_v21 = vpop.permute.xlu0 %740  ;;  %1426 = vrot.lane.b32.xlu1 %v3903_v41, %s3692_s9  ;;  %v3435_v41 = vpack.c.bf16 %v2171_v2, %v2170_v20  ;;  %v2174_v2 = vld [vmem:[%s3813_s6 + $0x20] sm:$0xff] }
 0x107   : > { %871 = vst.msk [vmem:[#allocation3 + $0x57] sm:$0xff] %vm854_vm5, %v741_v21  ;;  %v2172_v21 = vld [vmem:[%s3813_s6 + $0x10] sm:$0xff] }
 0x108   : > { %1424 = vrot.lane.b32.xlu0 %v3923_v48, %s3692_s9  ;;  %v747_v14 = vpop.permute.xlu1 %746  ;;  %3436 = vmatprep.subr.bf16.mxu0 %v3435_v41 }
 0x109   : > { %874 = vst.msk [vmem:[#allocation3 + $0x67] sm:$0xff] %vm854_vm5, %v747_v14  ;;  %3438 = vmatpush3.bf16.msra.mxu0 %v3435_v41  ;;  %v2173_v14 = vld [vmem:[%s3813_s6 + $0x18] sm:$0xff]  ;;  %v2175_v41 = vld [vmem:[%s3813_s6 + $0x28] sm:$0xff] }
 0x10a   : > { %v745_v12 = vpop.permute.xlu0 %744  ;;  %1619 = vrot.lane.b32.xlu1 %v3915_v45, %s3693_s10 }
 0x10b   : > { %873 = vst.msk [vmem:[#allocation3 + $0x5f] sm:$0xfe] %vm852_vm4, %v745_v12  ;;  %v3439_v12 = vpack.c.bf16 %v2173_v14, %v2172_v21  ;;  %v2176_v14 = vld [vmem:[%s3813_s6 + $0x30] sm:$0xff] }
 0x10c   : > { %1428 = vrot.lane.b32.xlu0 %v4253_v31, %s3692_s9  ;;  %v751_v16 = vpop.permute.xlu1 %750 }
 0x10d   : > { %876 = vst.msk [vmem:[#allocation3 + $0x6f] sm:$0xfe] %vm852_vm4, %v751_v16  ;;  %3440 = vmatprep.subr.bf16.mxu0 %v3439_v12  ;;  %v3443_v16 = vpack.c.bf16 %v2175_v41, %v2174_v2  ;;  %v2178_v41 = vld [vmem:[%s3813_s6 + $0x40] sm:$0xff] }
 0x10e   : > { %v749_v48 = vpop.permute.xlu0 %748  ;;  %1103 = vrot.lane.b32.xlu1 %v3915_v45, %s3690_s26  ;;  %3442 = vmatpush3.bf16.msra.mxu0 %v3439_v12  ;;  %v2177_v12 = vld [vmem:[%s3813_s6 + $0x38] sm:$0xff] }
 0x10f   : > { %875 = vst.msk [vmem:[#allocation3 + $0x6f] sm:$0x1] %vm856_vm6, %v749_v48  ;;  %3444 = vmatprep.subr.bf16.mxu0 %v3443_v16 }
 0x110   : > { %1621 = vrot.lane.b32.xlu0 %v3941_v54, %s3693_s10  ;;  %v755_v31 = vpop.permute.xlu1 %754 }
 0x111   : > { %878 = vst.msk [vmem:[#allocation3 + $0x7f] sm:$0x1] %vm856_vm6, %v755_v31  ;;  %v3447_v31 = vpack.c.bf16 %v2177_v12, %v2176_v14  ;;  %v2180_v12 = vld [vmem:[%s3813_s6 + $0x50] sm:$0xff] }
 0x112   : > { %v753_v20 = vpop.permute.xlu0 %752  ;;  %1748 = vrot.lane.b32.xlu1 %v3915_v45, %s3694_s12  ;;  %3446 = vmatpush3.bf16.msra.mxu0 %v3443_v16  ;;  %v2179_v16 = vld [vmem:[%s3813_s6 + $0x48] sm:$0xff] }
 0x113   : > { %877 = vst.msk [vmem:[#allocation3 + $0x77] sm:$0xff] %vm854_vm5, %v753_v20  ;;  %3448 = vmatprep.subr.bf16.mxu0 %v3447_v31 }
 0x114   : > { %1105 = vrot.lane.b32.xlu0 %v3941_v54, %s3690_s26  ;;  %v759_v48 = vpop.permute.xlu1 %758 }
 0x115   : > { %880 = vst.msk [vmem:[#allocation3 + $0x87] sm:$0xff] %vm854_vm5, %v759_v48  ;;  %v3451_v48 = vpack.c.bf16 %v2179_v16, %v2178_v41 }
 0x116   : > { %v757_v21 = vpop.permute.xlu0 %756  ;;  %1235 = vrot.lane.b32.xlu1 %v3915_v45, %s3691_s7  ;;  %3450 = vmatpush3.bf16.msra.mxu0 %v3447_v31  ;;  %v2181_v31 = vld [vmem:[%s3813_s6 + $0x58] sm:$0xff] }
 0x117   : > { %879 = vst.msk [vmem:[#allocation3 + $0x7f] sm:$0xfe] %vm852_vm4, %v757_v21  ;;  %3452 = vmatprep.subr.bf16.mxu0 %v3451_v48 }
 0x118   : > { %1750 = vrot.lane.b32.xlu0 %v3941_v54, %s3694_s12  ;;  %v763_v20 = vpop.permute.xlu1 %762 }
 0x119   : > { %882 = vst.msk [vmem:[#allocation3 + $0x8f] sm:$0xfe] %vm852_vm4, %v763_v20  ;;  %v3455_v20 = vpack.c.bf16 %v2181_v31, %v2180_v12 }
 0x11a   : > { %v761_v2 = vpop.permute.xlu0 %760  ;;  %1239 = vrot.lane.b32.xlu1 %v4268_v13, %s3691_s7  ;;  %3454 = vmatpush3.bf16.msra.mxu0 %v3451_v48  ;;  %v2182_v48 = vld [vmem:[%s3813_s6 + $0x60] sm:$0xff] }
 0x11b   : > { %881 = vst.msk [vmem:[#allocation3 + $0x8f] sm:$0x1] %vm856_vm6, %v761_v2  ;;  %3456 = vmatprep.subr.bf16.mxu0 %v3455_v20 }
 0x11c   : > { %1237 = vrot.lane.b32.xlu0 %v3941_v54, %s3691_s7  ;;  %v767_v21 = vpop.permute.xlu1 %766 }
 0x11d   : > { %884 = vst.msk [vmem:[#allocation3 + $0x9f] sm:$0x1] %vm856_vm6, %v767_v21 }
 0x11e   : > { %v765_v14 = vpop.permute.xlu0 %764  ;;  %1943 = vrot.lane.b32.xlu1 %v3915_v45, %s3695_s13  ;;  %3458 = vmatpush3.bf16.msra.mxu0 %v3455_v20 }
 0x11f   : > { %883 = vst.msk [vmem:[#allocation3 + $0x97] sm:$0xff] %vm854_vm5, %v765_v14  ;;  %3321 = vmatprep.subr.mxu0 %v2182_v48 }
 0x120   : > { %1752 = vrot.lane.b32.xlu0 %v4268_v13, %s3694_s12  ;;  %v771_v2 = vpop.permute.xlu1 %770 }
 0x121   : > { %886 = vst.msk [vmem:[#allocation3 + $0xa7] sm:$0xff] %vm854_vm5, %v771_v2 }
 0x122   : > { %v769_v41 = vpop.permute.xlu0 %768  ;;  %1430 = vrot.lane.b32.xlu1 %v3915_v45, %s3692_s9  ;;  %3322 = vmatpush3.msra.mxu0 %v2182_v48 }
 0x123   : > { %885 = vst.msk [vmem:[#allocation3 + $0x9f] sm:$0xfe] %vm852_vm4, %v769_v41 }
 0x124   : > { %1945 = vrot.lane.b32.xlu0 %v3941_v54, %s3695_s13  ;;  %v775_v16 = vpop.permute.xlu1 %774 }
 0x125   : > { %888 = vst.msk [vmem:[#allocation3 + $0xaf] sm:$0xfe] %vm852_vm4, %v775_v16 }
 0x126   : > { %v773_v21 = vpop.permute.xlu0 %772  ;;  %1434 = vrot.lane.b32.xlu1 %v4268_v13, %s3692_s9 }
 0x127   : > { %887 = vst.msk [vmem:[#allocation3 + $0xaf] sm:$0x1] %vm856_vm6, %v773_v21 }
 0x128   : > { %1432 = vrot.lane.b32.xlu0 %v3941_v54, %s3692_s9  ;;  %v779_v45 = vpop.permute.xlu1 %778 }
 0x129   : > { %890 = vst.msk [vmem:[#allocation3 + $0xbf] sm:$0x1] %vm856_vm6, %v779_v45 }
 0x12a   : > { %v777_v14 = vpop.permute.xlu0 %776  ;;  %1623 = vrot.lane.b32.xlu1 %v3931_v51, %s3693_s10 }
 0x12b   : > { %889 = vst.msk [vmem:[#allocation3 + $0xb7] sm:$0xff] %vm854_vm5, %v777_v14 }
 0x12c   : > { %1947 = vrot.lane.b32.xlu0 %v4268_v13, %s3695_s13  ;;  %v783_v12 = vpop.permute.xlu1 %782 }
 0x12d   : > { %892 = vst.msk [vmem:[#allocation3 + $0xc7] sm:$0xff] %vm854_vm5, %v783_v12 }
 0x12e   : > { %v781_v31 = vpop.permute.xlu0 %780  ;;  %1107 = vrot.lane.b32.xlu1 %v3931_v51, %s3690_s26 }
 0x12f   : > { %891 = vst.msk [vmem:[#allocation3 + $0xbf] sm:$0xfe] %vm852_vm4, %v781_v31 }
 0x130   : > { %1625 = vrot.lane.b32.xlu0 %v3959_v60, %s3693_s10  ;;  %v787_v54 = vpop.permute.xlu1 %786 }
 0x131   : > { %894 = vst.msk [vmem:[#allocation3 + $0xcf] sm:$0xfe] %vm852_vm4, %v787_v54 }
 0x132   : > { %v785_v20 = vpop.permute.xlu0 %784  ;;  %1754 = vrot.lane.b32.xlu1 %v3931_v51, %s3694_s12 }
 0x133   : > { %893 = vst.msk [vmem:[#allocation3 + $0xcf] sm:$0x1] %vm856_vm6, %v785_v20 }
 0x134   : > { %1109 = vrot.lane.b32.xlu0 %v3959_v60, %s3690_s26  ;;  %v791_v13 = vpop.permute.xlu1 %790 }
 0x135   : > { %896 = vst.msk [vmem:[#allocation3 + $0xdf] sm:$0x1] %vm856_vm6, %v791_v13 }
 0x136   : > { %v789_v2 = vpop.permute.xlu0 %788  ;;  %1241 = vrot.lane.b32.xlu1 %v3931_v51, %s3691_s7 }
 0x137   : > { %895 = vst.msk [vmem:[#allocation3 + $0xd7] sm:$0xff] %vm854_vm5, %v789_v2 }
 0x138   : > { %1756 = vrot.lane.b32.xlu0 %v3959_v60, %s3694_s12  ;;  %v795_v41 = vpop.permute.xlu1 %794 }
 0x139   : > { %898 = vst.msk [vmem:[#allocation3 + $0xe7] sm:$0xff] %vm854_vm5, %v795_v41 }
 0x13a   : > { %v793_v16 = vpop.permute.xlu0 %792  ;;  %1245 = vrot.lane.b32.xlu1 %v4275_v9, %s3691_s7 }
 0x13b   : > { %897 = vst.msk [vmem:[#allocation3 + $0xdf] sm:$0xfe] %vm852_vm4, %v793_v16 }
 0x13c   : > { %1243 = vrot.lane.b32.xlu0 %v3959_v60, %s3691_s7  ;;  %v799_v48 = vpop.permute.xlu1 %798 }
 0x13d   : > { %900 = vst.msk [vmem:[#allocation3 + $0xef] sm:$0xfe] %vm852_vm4, %v799_v48  ;;  %vm1892_vm4 = vcmask 786113  }
 0x13e   : > { %v797_v21 = vpop.permute.xlu0 %796  ;;  %1949 = vrot.lane.b32.xlu1 %v3931_v51, %s3695_s13 }
 0x13f   : > { %899 = vst.msk [vmem:[#allocation3 + $0xef] sm:$0x1] %vm856_vm6, %v797_v21 }
 0x140   : > { %1758 = vrot.lane.b32.xlu0 %v4275_v9, %s3694_s12  ;;  %v803_v45 = vpop.permute.xlu1 %802 }
 0x141   : > { %902 = vst.msk [vmem:[#allocation3 + $0xff] sm:$0x1] %vm856_vm6, %v803_v45  ;;  %vm5757_vm6 = vcmask 851714  }
 0x142   : > { %v801_v14 = vpop.permute.xlu0 %800  ;;  %1436 = vrot.lane.b32.xlu1 %v3931_v51, %s3692_s9 }
 0x143   : > { %901 = vst.msk [vmem:[#allocation3 + $0xf7] sm:$0xff] %vm854_vm5, %v801_v14  ;;  %vm1894_vm5 = vcmask 786112  }
 0x144   : > { %1951 = vrot.lane.b32.xlu0 %v3959_v60, %s3695_s13  ;;  %v908_v12 = vpop.permute.xlu1 %907 }
 0x145   : > { %1052 = vst.msk [vmem:[#allocation3 + $0xe] sm:$0x3] %vm5751_vm7, %v908_v12 }
 0x146   : > { %v3571_v31 = vpop.permute.xlu0 %3570  ;;  %1440 = vrot.lane.b32.xlu1 %v4275_v9, %s3692_s9 }
 0x147   : > { %v3573_v54 = vunpack.i.h.bf16 %v3571_v31  ;;  %v3572_v20 = vunpack.i.l.bf16 %v3571_v31 }
 0x148   : > { %1438 = vrot.lane.b32.xlu0 %v3959_v60, %s3692_s9  ;;  %v912_v51 = vpop.permute.xlu1 %911 }
 0x149   : > { %1054 = vst.msk [vmem:[#allocation3 + $0x16] sm:$0xff] %vm5752_vm8, %v912_v51  ;;  %1050 = vst.msk [vmem:[#allocation3 + $0x6] sm:$0xff] %vm5752_vm8, %v3573_v54 }
 0x14a   : > { %1048 = vst.msk [vmem:[#allocation3 - $0x2] sm:$0xfc] %vm5750_vm9, %v3572_v20  ;;  %v910_v13 = vpop.permute.xlu0 %909  ;;  %1627 = vrot.lane.b32.xlu1 %v3949_v57, %s3693_s10 }
 0x14b   : > { %1053 = vst.msk [vmem:[#allocation3 + $0xe] sm:$0xfc] %vm5750_vm9, %v910_v13 }
 0x14c   : > { %1953 = vrot.lane.b32.xlu0 %v4275_v9, %s3695_s13  ;;  %v916_v2 = vpop.permute.xlu1 %915 }
 0x14d   : > { %1056 = vst.msk [vmem:[#allocation3 + $0x1e] sm:$0xfc] %vm5750_vm9, %v916_v2 }
 0x14e   : > { %v914_v60 = vpop.permute.xlu0 %913  ;;  %1111 = vrot.lane.b32.xlu1 %v3949_v57, %s3690_s26 }
 0x14f   : > { %1055 = vst.msk [vmem:[#allocation3 + $0x1e] sm:$0x3] %vm5751_vm7, %v914_v60 }
 0x150   : > { %1629 = vrot.lane.b32.xlu0 %v4009_v17, %s3693_s10  ;;  %v920_v41 = vpop.permute.xlu1 %919 }
 0x151   : > { %1058 = vst.msk [vmem:[#allocation3 + $0x2e] sm:$0x3] %vm5751_vm7, %v920_v41 }
 0x152   : > { %v918_v16 = vpop.permute.xlu0 %917  ;;  %1760 = vrot.lane.b32.xlu1 %v3949_v57, %s3694_s12 }
 0x153   : > { %1057 = vst.msk [vmem:[#allocation3 + $0x26] sm:$0xff] %vm5752_vm8, %v918_v16 }
 0x154   : > { %1113 = vrot.lane.b32.xlu0 %v4009_v17, %s3690_s26  ;;  %v924_v9 = vpop.permute.xlu1 %923 }
 0x155   : > { %1060 = vst.msk [vmem:[#allocation3 + $0x36] sm:$0xff] %vm5752_vm8, %v924_v9 }
 0x156   : > { %v922_v48 = vpop.permute.xlu0 %921  ;;  %1247 = vrot.lane.b32.xlu1 %v3949_v57, %s3691_s7 }
 0x157   : > { %1059 = vst.msk [vmem:[#allocation3 + $0x2e] sm:$0xfc] %vm5750_vm9, %v922_v48 }
 0x158   : > { %1762 = vrot.lane.b32.xlu0 %v4009_v17, %s3694_s12  ;;  %v928_v21 = vpop.permute.xlu1 %927 }
 0x159   : > { %1062 = vst.msk [vmem:[#allocation3 + $0x3e] sm:$0xfc] %vm5750_vm9, %v928_v21 }
 0x15a   : > { %v926_v45 = vpop.permute.xlu0 %925  ;;  %1251 = vrot.lane.b32.xlu1 %v4290_v27, %s3691_s7 }
 0x15b   : > { %1061 = vst.msk [vmem:[#allocation3 + $0x3e] sm:$0x3] %vm5751_vm7, %v926_v45 }
 0x15c   : > { %1249 = vrot.lane.b32.xlu0 %v4009_v17, %s3691_s7  ;;  %v932_v14 = vpop.permute.xlu1 %931 }
 0x15d   : > { %1064 = vst.msk [vmem:[#allocation3 + $0x4e] sm:$0x3] %vm5751_vm7, %v932_v14 }
 0x15e   : > { %v930_v12 = vpop.permute.xlu0 %929  ;;  %1955 = vrot.lane.b32.xlu1 %v3949_v57, %s3695_s13 }
 0x15f   : > { %1063 = vst.msk [vmem:[#allocation3 + $0x46] sm:$0xff] %vm5752_vm8, %v930_v12 }
 0x160   : > { %1764 = vrot.lane.b32.xlu0 %v4290_v27, %s3694_s12  ;;  %v936_v31 = vpop.permute.xlu1 %935 }
 0x161   : > { %1066 = vst.msk [vmem:[#allocation3 + $0x56] sm:$0xff] %vm5752_vm8, %v936_v31 }
 0x162   : > { %v934_v54 = vpop.permute.xlu0 %933  ;;  %1442 = vrot.lane.b32.xlu1 %v3949_v57, %s3692_s9 }
 0x163   : > { %1065 = vst.msk [vmem:[#allocation3 + $0x4e] sm:$0xfc] %vm5750_vm9, %v934_v54 }
 0x164   : > { %1957 = vrot.lane.b32.xlu0 %v4009_v17, %s3695_s13  ;;  %v940_v20 = vpop.permute.xlu1 %939 }
 0x165   : > { %1068 = vst.msk [vmem:[#allocation3 + $0x5e] sm:$0xfc] %vm5750_vm9, %v940_v20 }
 0x166   : > { %v938_v51 = vpop.permute.xlu0 %937  ;;  %1446 = vrot.lane.b32.xlu1 %v4290_v27, %s3692_s9 }
 0x167   : > { %1067 = vst.msk [vmem:[#allocation3 + $0x5e] sm:$0x3] %vm5751_vm7, %v938_v51 }
 0x168   : > { %1444 = vrot.lane.b32.xlu0 %v4009_v17, %s3692_s9  ;;  %v944_v13 = vpop.permute.xlu1 %943 }
 0x169   : > { %1070 = vst.msk [vmem:[#allocation3 + $0x6e] sm:$0x3] %vm5751_vm7, %v944_v13  ;;  %vm2190_vm7 = vcmask 850944  }
 0x16a   : > { %v942_v57 = vpop.permute.xlu0 %941  ;;  %1631 = vrot.lane.b32.xlu1 %v3971_v0, %s3693_s10 }
 0x16b   : > { %1069 = vst.msk [vmem:[#allocation3 + $0x66] sm:$0xff] %vm5752_vm8, %v942_v57 }
 0x16c   : > { %1959 = vrot.lane.b32.xlu0 %v4290_v27, %s3695_s13  ;;  %v1100_v2 = vpop.permute.xlu1 %1099 }
 0x16d   : > { %1196 = vst.msk [vmem:[#allocation3] sm:$0xff] %vm1195_vm10, %v1100_v2 }
 0x16e   : > { %v946_v60 = vpop.permute.xlu0 %945  ;;  %1115 = vrot.lane.b32.xlu1 %v3971_v0, %s3690_s26 }
 0x16f   : > { %1071 = vst.msk [vmem:[#allocation3 + $0x6e] sm:$0xfc] %vm5750_vm9, %v946_v60  ;;  %vm5755_vm9 = vcmask 845568  }
 0x170   : > { %1633 = vrot.lane.b32.xlu0 %v4093_v24, %s3693_s10  ;;  %v1230_v17 = vpop.permute.xlu1 %1229 }
 0x171   : > { %1374 = vst.msk [vmem:[#allocation3 - $0x1] sm:$0xfe] %vm1373_vm11, %v1230_v17 }
 0x172   : > { %v1102_v41 = vpop.permute.xlu0 %1101  ;;  %1766 = vrot.lane.b32.xlu1 %v3971_v0, %s3694_s12 }
 0x173   : > { %1197 = vst.msk [vmem:[#allocation3 + $0x8] sm:$0xff] %vm1195_vm10, %v1102_v41 }
 0x174   : > { %1117 = vrot.lane.b32.xlu0 %v4093_v24, %s3690_s26  ;;  %v1234_v27 = vpop.permute.xlu1 %1233 }
 0x175   : > { %1378 = vst.msk [vmem:[#allocation3 + $0xf] sm:$0x1] %vm1377_vm12, %v1234_v27 }
 0x176   : > { %v1232_v16 = vpop.permute.xlu0 %1231  ;;  %1253 = vrot.lane.b32.xlu1 %v3971_v0, %s3691_s7 }
 0x177   : > { %1376 = vst.msk [vmem:[#allocation3 + $0x7] sm:$0xff] %vm1375_vm13, %v1232_v16 }
 0x178   : > { %1768 = vrot.lane.b32.xlu0 %v4093_v24, %s3694_s12  ;;  %v1427_v9 = vpop.permute.xlu1 %1426 }
 0x179   : > { %1571 = vst.msk [vmem:[#allocation3 + $0x6] sm:$0xff] %vm5754_vm14, %v1427_v9 }
 0x17a   : > { %v1425_v48 = vpop.permute.xlu0 %1424  ;;  %1257 = vrot.lane.b32.xlu1 %v4297_v5, %s3691_s7 }
 0x17b   : > { %1569 = vst.msk [vmem:[#allocation3 - $0x2] sm:$0xfc] %vm5756_vm15, %v1425_v48 }
 0x17c   : > { %1255 = vrot.lane.b32.xlu0 %v4093_v24, %s3691_s7  ;;  %v1620_v21 = vpop.permute.xlu1 %1619 }
 0x17d   : > { %1716 = vst.msk [vmem:[#allocation3] sm:$0xff] %vm1715_vm0, %v1620_v21 }
 0x17e   : > { %v1429_v45 = vpop.permute.xlu0 %1428  ;;  %1961 = vrot.lane.b32.xlu1 %v3971_v0, %s3695_s13 }
 0x17f   : > { %1573 = vst.msk [vmem:[#allocation3 + $0xe] sm:$0x3] %vm5753_vm3, %v1429_v45 }
 0x180   : > { %1770 = vrot.lane.b32.xlu0 %v4297_v5, %s3694_s12  ;;  %v1104_v14 = vpop.permute.xlu1 %1103 }
 0x181   : > { %1198 = vst.msk [vmem:[#allocation3 + $0x10] sm:$0xff] %vm1195_vm10, %v1104_v14 }
 0x182   : > { %v1622_v12 = vpop.permute.xlu0 %1621  ;;  %1448 = vrot.lane.b32.xlu1 %v3971_v0, %s3692_s9 }
 0x183   : > { %1717 = vst.msk [vmem:[#allocation3 + $0x8] sm:$0xff] %vm1715_vm0, %v1622_v12 }
 0x184   : > { %1963 = vrot.lane.b32.xlu0 %v4093_v24, %s3695_s13  ;;  %v1749_v31 = vpop.permute.xlu1 %1748 }
 0x185   : > { %1893 = vst.msk [vmem:[#allocation3 - $0x1] sm:$0xfe] %vm1892_vm4, %v1749_v31 }
 0x186   : > { %v1106_v54 = vpop.permute.xlu0 %1105  ;;  %1452 = vrot.lane.b32.xlu1 %v4297_v5, %s3692_s9 }
 0x187   : > { %1199 = vst.msk [vmem:[#allocation3 + $0x18] sm:$0xff] %vm1195_vm10, %v1106_v54 }
 0x188   : > { %1450 = vrot.lane.b32.xlu0 %v4093_v24, %s3692_s9  ;;  %v1236_v20 = vpop.permute.xlu1 %1235 }
 0x189   : > { %1379 = vst.msk [vmem:[#allocation3 + $0xf] sm:$0xfe] %vm1373_vm11, %v1236_v20 }
 0x18a   : > { %v1751_v0 = vpop.permute.xlu0 %1750  ;;  %1635 = vrot.lane.b32.xlu1 %v4083_v22, %s3693_s10 }
 0x18b   : > { %1895 = vst.msk [vmem:[#allocation3 + $0x7] sm:$0xff] %vm1894_vm5, %v1751_v0 }
 0x18c   : > { %1965 = vrot.lane.b32.xlu0 %v4297_v5, %s3695_s13  ;;  %v1240_v51 = vpop.permute.xlu1 %1239 }
 0x18d   : > { %1381 = vst.msk [vmem:[#allocation3 + $0x1f] sm:$0x1] %vm1377_vm12, %v1240_v51 }
 0x18e   : > { %v1238_v13 = vpop.permute.xlu0 %1237  ;;  %1119 = vrot.lane.b32.xlu1 %v4083_v22, %s3690_s26 }
 0x18f   : > { %1380 = vst.msk [vmem:[#allocation3 + $0x17] sm:$0xff] %vm1375_vm13, %v1238_v13 }
 0x190   : > { %1637 = vrot.lane.b32.xlu0 %v4109_v28, %s3693_s10  ;;  %v1944_v24 = vpop.permute.xlu1 %1943 }
 0x191   : > { %2088 = vst.msk [vmem:[#allocation3 - $0x2] sm:$0xfc] %vm5757_vm6, %v1944_v24 }
 0x192   : > { %v1753_v57 = vpop.permute.xlu0 %1752  ;;  %1772 = vrot.lane.b32.xlu1 %v4083_v22, %s3694_s12 }
 0x193   : > { %1897 = vst.msk [vmem:[#allocation3 + $0xf] sm:$0x1] %vm1896_vm2, %v1753_v57 }
 0x194   : > { %1121 = vrot.lane.b32.xlu0 %v4109_v28, %s3690_s26  ;;  %v1431_v5 = vpop.permute.xlu1 %1430 }
 0x195   : > { %1574 = vst.msk [vmem:[#allocation3 + $0xe] sm:$0xfc] %vm5756_vm15, %v1431_v5 }
 0x196   : > { %v1946_v2 = vpop.permute.xlu0 %1945  ;;  %1259 = vrot.lane.b32.xlu1 %v4083_v22, %s3691_s7 }
 0x197   : > { %2090 = vst.msk [vmem:[#allocation3 + $0x6] sm:$0xff] %vm2089_vm1, %v1946_v2 }
 0x198   : > { %1774 = vrot.lane.b32.xlu0 %v4109_v28, %s3694_s12  ;;  %v1435_v60 = vpop.permute.xlu1 %1434 }
 0x199   : > { %1576 = vst.msk [vmem:[#allocation3 + $0x1e] sm:$0x3] %vm5753_vm3, %v1435_v60 }
 0x19a   : > { %v1433_v17 = vpop.permute.xlu0 %1432  ;;  %1263 = vrot.lane.b32.xlu1 %v4312_v7, %s3691_s7 }
 0x19b   : > { %1575 = vst.msk [vmem:[#allocation3 + $0x16] sm:$0xff] %vm5754_vm14, %v1433_v17 }
 0x19c   : > { %1261 = vrot.lane.b32.xlu0 %v4109_v28, %s3691_s7  ;;  %v1624_v41 = vpop.permute.xlu1 %1623 }
 0x19d   : > { %1718 = vst.msk [vmem:[#allocation3 + $0x10] sm:$0xff] %vm1715_vm0, %v1624_v41 }
 0x19e   : > { %v1948_v27 = vpop.permute.xlu0 %1947  ;;  %1967 = vrot.lane.b32.xlu1 %v4083_v22, %s3695_s13  ;;  %v2138_v16 = vld [vmem:[#allocation3] sm:$0xff] }
 0x19f   : > { %2092 = vst.msk [vmem:[#allocation3 + $0xe] sm:$0x3] %vm5755_vm9, %v1948_v27  ;;  %3323 = vmatprep.mubr.msk.f32.mxu0 %vm2190_vm7, %v2138_v16 }
 0x1a0   : > { %1776 = vrot.lane.b32.xlu0 %v4312_v7, %s3694_s12  ;;  %v1108_v9 = vpop.permute.xlu1 %1107 }
 0x1a1   : > { %1200 = vst.msk [vmem:[#allocation3 + $0x20] sm:$0xff] %vm1195_vm10, %v1108_v9 }
 0x1a2   : > { %v1626_v48 = vpop.permute.xlu0 %1625  ;;  %1454 = vrot.lane.b32.xlu1 %v4083_v22, %s3692_s9 }
 0x1a3   : > { %1719 = vst.msk [vmem:[#allocation3 + $0x18] sm:$0xff] %vm1715_vm0, %v1626_v48 }
 0x1a4   : > { %1969 = vrot.lane.b32.xlu0 %v4109_v28, %s3695_s13  ;;  %v1755_v21 = vpop.permute.xlu1 %1754 }
 0x1a5   : > { %1898 = vst.msk [vmem:[#allocation3 + $0xf] sm:$0xfe] %vm1892_vm4, %v1755_v21 }
 0x1a6   : > { %v1110_v45 = vpop.permute.xlu0 %1109  ;;  %1458 = vrot.lane.b32.xlu1 %v4312_v7, %s3692_s9  ;;  %v2139_v14 = vld [vmem:[#allocation3 + $0x8] sm:$0xff] }
 0x1a7   : > { %1201 = vst.msk [vmem:[#allocation3 + $0x28] sm:$0xff] %vm1195_vm10, %v1110_v45  ;;  %3324 = vmatmul.mubr.msk.f32.vlgmr.msra.gmra.mrb[0].mxu0 %vm2190_vm7, %v2139_v14 }
 0x1a8   : > { %1456 = vrot.lane.b32.xlu0 %v4109_v28, %s3692_s9  ;;  %v1242_v22 = vpop.permute.xlu1 %1241 }
 0x1a9   : > { %1382 = vst.msk [vmem:[#allocation3 + $0x1f] sm:$0xfe] %vm1373_vm11, %v1242_v22 }
 0x1aa   : > { %v1757_v12 = vpop.permute.xlu0 %1756  ;;  %1639 = vrot.lane.b32.xlu1 %v4099_v26, %s3693_s10 }
 0x1ab   : > { %1899 = vst.msk [vmem:[#allocation3 + $0x17] sm:$0xff] %vm1894_vm5, %v1757_v12 }
 0x1ac   : > { %1971 = vrot.lane.b32.xlu0 %v4312_v7, %s3695_s13  ;;  %v1246_v31 = vpop.permute.xlu1 %1245 }
 0x1ad   : > { %1384 = vst.msk [vmem:[#allocation3 + $0x2f] sm:$0x1] %vm1377_vm12, %v1246_v31 }
 0x1ae   : > { %v1244_v54 = vpop.permute.xlu0 %1243  ;;  %1123 = vrot.lane.b32.xlu1 %v4099_v26, %s3690_s26 }
 0x1af   : > { %1383 = vst.msk [vmem:[#allocation3 + $0x27] sm:$0xff] %vm1375_vm13, %v1244_v54 }
 0x1b0   : > { %1641 = vrot.lane.b32.xlu0 %v4123_v35, %s3693_s10  ;;  %v1950_v28 = vpop.permute.xlu1 %1949 }
 0x1b1   : > { %2093 = vst.msk [vmem:[#allocation3 + $0xe] sm:$0xfc] %vm5757_vm6, %v1950_v28 }
 0x1b2   : > { %v1759_v20 = vpop.permute.xlu0 %1758  ;;  %1778 = vrot.lane.b32.xlu1 %v4099_v26, %s3694_s12 }
 0x1b3   : > { %1900 = vst.msk [vmem:[#allocation3 + $0x1f] sm:$0x1] %vm1896_vm2, %v1759_v20 }
 0x1b4   : > { %1125 = vrot.lane.b32.xlu0 %v4123_v35, %s3690_s26  ;;  %v1437_v7 = vpop.permute.xlu1 %1436 }
 0x1b5   : > { %1577 = vst.msk [vmem:[#allocation3 + $0x1e] sm:$0xfc] %vm5756_vm15, %v1437_v7 }
 0x1b6   : > { %v1952_v0 = vpop.permute.xlu0 %1951  ;;  %1265 = vrot.lane.b32.xlu1 %v4099_v26, %s3691_s7 }
 0x1b7   : > { %2094 = vst.msk [vmem:[#allocation3 + $0x16] sm:$0xff] %vm2089_vm1, %v1952_v0 }
 0x1b8   : > { %1780 = vrot.lane.b32.xlu0 %v4123_v35, %s3694_s12  ;;  %v1441_v51 = vpop.permute.xlu1 %1440 }
 0x1b9   : > { %1579 = vst.msk [vmem:[#allocation3 + $0x2e] sm:$0x3] %vm5753_vm3, %v1441_v51 }
 0x1ba   : > { %v1439_v13 = vpop.permute.xlu0 %1438  ;;  %1269 = vrot.lane.b32.xlu1 %v4319_v63, %s3691_s7 }
 0x1bb   : > { %1578 = vst.msk [vmem:[#allocation3 + $0x26] sm:$0xff] %vm5754_vm14, %v1439_v13 }
 0x1bc   : > { %1267 = vrot.lane.b32.xlu0 %v4123_v35, %s3691_s7  ;;  %v1628_v24 = vpop.permute.xlu1 %1627 }
 0x1bd   : > { %1720 = vst.msk [vmem:[#allocation3 + $0x20] sm:$0xff] %vm1715_vm0, %v1628_v24 }
 0x1be   : > { %v1954_v57 = vpop.permute.xlu0 %1953  ;;  %1973 = vrot.lane.b32.xlu1 %v4099_v26, %s3695_s13  ;;  %v2140_v5 = vld [vmem:[#allocation3 + $0x10] sm:$0xff] }
 0x1bf   : > { %2095 = vst.msk [vmem:[#allocation3 + $0x1e] sm:$0x3] %vm5755_vm9, %v1954_v57  ;;  %3326 = vmatprep.mubr.msk.f32.mxu0 %vm2190_vm7, %v2140_v5 }
 0x1c0   : > { %1782 = vrot.lane.b32.xlu0 %v4319_v63, %s3694_s12  ;;  %v1112_v2 = vpop.permute.xlu1 %1111 }
 0x1c1   : > { %1202 = vst.msk [vmem:[#allocation3 + $0x30] sm:$0xff] %vm1195_vm10, %v1112_v2  ;;  %v2544_v2 = vld [vmem:[%s3818_s8] sm:$0xff] }
 0x1c2   : > { %v1630_v60 = vpop.permute.xlu0 %1629  ;;  %1460 = vrot.lane.b32.xlu1 %v4099_v26, %s3692_s9 }
 0x1c3   : > { %1721 = vst.msk [vmem:[#allocation3 + $0x28] sm:$0xff] %vm1715_vm0, %v1630_v60  ;;  %v2545_v60 = vld [vmem:[%s3818_s8 + $0x8] sm:$0xff] }
 0x1c4   : > { %1975 = vrot.lane.b32.xlu0 %v4123_v35, %s3695_s13  ;;  %v1761_v17 = vpop.permute.xlu1 %1760 }
 0x1c5   : > { %1901 = vst.msk [vmem:[#allocation3 + $0x1f] sm:$0xfe] %vm1892_vm4, %v1761_v17  ;;  %v3459_v17 = vpack.c.bf16 %v2545_v60, %v2544_v2 }
 0x1c6   : > { %v1114_v41 = vpop.permute.xlu0 %1113  ;;  %1464 = vrot.lane.b32.xlu1 %v4319_v63, %s3692_s9  ;;  %v2141_v27 = vld [vmem:[#allocation3 + $0x18] sm:$0xff] }
 0x1c7   : > { %1203 = vst.msk [vmem:[#allocation3 + $0x38] sm:$0xff] %vm1195_vm10, %v1114_v41  ;;  %3327 = vmatmul.mubr.msk.f32.gmra.mrb[2].mxu0 %vm2190_vm7, %v2141_v27  ;;  %3460 = vmatprep.subr.bf16.mxu1 %v3459_v17 }
 0x1c8   : > { %1462 = vrot.lane.b32.xlu0 %v4123_v35, %s3692_s9  ;;  %v1248_v26 = vpop.permute.xlu1 %1247  ;;  %3462 = vmatpush3.bf16.msra.mxu1 %v3459_v17 }
 0x1c9   : > { %1385 = vst.msk [vmem:[#allocation3 + $0x2f] sm:$0xfe] %vm1373_vm11, %v1248_v26  ;;  %v2547_v26 = vld [vmem:[%s3818_s8 + $0x18] sm:$0xff] }
 0x1ca   : > { %v1763_v16 = vpop.permute.xlu0 %1762  ;;  %947 = vrot.lane.b32.xlu1 %v4123_v35, %s3689_s25 }
 0x1cb   : > { %1902 = vst.msk [vmem:[#allocation3 + $0x27] sm:$0xff] %vm1894_vm5, %v1763_v16 }
 0x1cc   : > { %1977 = vrot.lane.b32.xlu0 %v4319_v63, %s3695_s13  ;;  %v1252_v9 = vpop.permute.xlu1 %1251 }
 0x1cd   : > { %1387 = vst.msk [vmem:[#allocation3 + $0x3f] sm:$0x1] %vm1377_vm12, %v1252_v9 }
 0x1ce   : > { %v1250_v48 = vpop.permute.xlu0 %1249  ;;  %1643 = vrot.lane.b32.xlu1 %v4115_v30, %s3693_s10 }
 0x1cf   : > { %1386 = vst.msk [vmem:[#allocation3 + $0x37] sm:$0xff] %vm1375_vm13, %v1250_v48 }
 0x1d0   : > { %949 = vrot.lane.b32.xlu0 %v4319_v63, %s3689_s25  ;;  %v1956_v21 = vpop.permute.xlu1 %1955 }
 0x1d1   : > { %2096 = vst.msk [vmem:[#allocation3 + $0x1e] sm:$0xfc] %vm5757_vm6, %v1956_v21  ;;  %v2549_v21 = vld [vmem:[%s3818_s8 + $0x28] sm:$0xff] }
 0x1d2   : > { %v1765_v35 = vpop.permute.xlu0 %1764  ;;  %1127 = vrot.lane.b32.xlu1 %v4115_v30, %s3690_s26 }
 0x1d3   : > { %1903 = vst.msk [vmem:[#allocation3 + $0x2f] sm:$0x1] %vm1896_vm2, %v1765_v35 }
 0x1d4   : > { %1645 = vrot.lane.b32.xlu0 %v4137_v46, %s3693_s10  ;;  %v1443_v45 = vpop.permute.xlu1 %1442 }
 0x1d5   : > { %1580 = vst.msk [vmem:[#allocation3 + $0x2e] sm:$0xfc] %vm5756_vm15, %v1443_v45 }
 0x1d6   : > { %v1958_v14 = vpop.permute.xlu0 %1957  ;;  %1784 = vrot.lane.b32.xlu1 %v4115_v30, %s3694_s12 }
 0x1d7   : > { %2097 = vst.msk [vmem:[#allocation3 + $0x26] sm:$0xff] %vm2089_vm1, %v1958_v14  ;;  %v2550_v14 = vld [vmem:[%s3818_s8 + $0x30] sm:$0xff] }
 0x1d8   : > { %1129 = vrot.lane.b32.xlu0 %v4137_v46, %s3690_s26  ;;  %v1447_v63 = vpop.permute.xlu1 %1446 }
 0x1d9   : > { %1582 = vst.msk [vmem:[#allocation3 + $0x3e] sm:$0x3] %vm5753_vm3, %v1447_v63  ;;  %v2551_v63 = vld [vmem:[%s3818_s8 + $0x38] sm:$0xff] }
 0x1da   : > { %v1445_v22 = vpop.permute.xlu0 %1444  ;;  %1271 = vrot.lane.b32.xlu1 %v4115_v30, %s3691_s7 }
 0x1db   : > { %1581 = vst.msk [vmem:[#allocation3 + $0x36] sm:$0xff] %vm5754_vm14, %v1445_v22  ;;  %v3471_v22 = vpack.c.bf16 %v2551_v63, %v2550_v14 }
 0x1dc   : > { %1786 = vrot.lane.b32.xlu0 %v4137_v46, %s3694_s12  ;;  %v1632_v12 = vpop.permute.xlu1 %1631 }
 0x1dd   : > { %1722 = vst.msk [vmem:[#allocation3 + $0x30] sm:$0xff] %vm1715_vm0, %v1632_v12 }
 0x1de   : > { %v1960_v31 = vpop.permute.xlu0 %1959  ;;  %1275 = vrot.lane.b32.xlu1 %v4334_v3, %s3691_s7  ;;  %v2142_v54 = vld [vmem:[#allocation3 + $0x20] sm:$0xff] }
 0x1df   : > { %2098 = vst.msk [vmem:[#allocation3 + $0x2e] sm:$0x3] %vm5755_vm9, %v1960_v31  ;;  %3329 = vmatprep.mubr.msk.f32.mxu0 %vm2190_vm7, %v2142_v54 }
 0x1e0   : > { %1273 = vrot.lane.b32.xlu0 %v4137_v46, %s3691_s7  ;;  %v1116_v28 = vpop.permute.xlu1 %1115 }
 0x1e1   : > { %1204 = vst.msk [vmem:[#allocation3 + $0x40] sm:$0xff] %vm1195_vm10, %v1116_v28 }
 0x1e2   : > { %v1634_v20 = vpop.permute.xlu0 %1633  ;;  %1979 = vrot.lane.b32.xlu1 %v4115_v30, %s3695_s13 }
 0x1e3   : > { %1723 = vst.msk [vmem:[#allocation3 + $0x38] sm:$0xff] %vm1715_vm0, %v1634_v20 }
 0x1e4   : > { %1788 = vrot.lane.b32.xlu0 %v4334_v3, %s3694_s12  ;;  %v1767_v7 = vpop.permute.xlu1 %1766 }
 0x1e5   : > { %1904 = vst.msk [vmem:[#allocation3 + $0x2f] sm:$0xfe] %vm1892_vm4, %v1767_v7 }
 0x1e6   : > { %v1118_v0 = vpop.permute.xlu0 %1117  ;;  %1466 = vrot.lane.b32.xlu1 %v4115_v30, %s3692_s9  ;;  %v2143_v51 = vld [vmem:[#allocation3 + $0x28] sm:$0xff] }
 0x1e7   : > { %1205 = vst.msk [vmem:[#allocation3 + $0x48] sm:$0xff] %vm1195_vm10, %v1118_v0  ;;  %3330 = vmatmul.mubr.msk.f32.gmra.mrb[4].mxu0 %vm2190_vm7, %v2143_v51 }
 0x1e8   : > { %1981 = vrot.lane.b32.xlu0 %v4137_v46, %s3695_s13  ;;  %v1254_v13 = vpop.permute.xlu1 %1253 }
 0x1e9   : > { %1388 = vst.msk [vmem:[#allocation3 + $0x3f] sm:$0xfe] %vm1373_vm11, %v1254_v13 }
 0x1ea   : > { %v1769_v24 = vpop.permute.xlu0 %1768  ;;  %1470 = vrot.lane.b32.xlu1 %v4334_v3, %s3692_s9 }
 0x1eb   : > { %1905 = vst.msk [vmem:[#allocation3 + $0x37] sm:$0xff] %vm1894_vm5, %v1769_v24 }
 0x1ec   : > { %1468 = vrot.lane.b32.xlu0 %v4137_v46, %s3692_s9  ;;  %v1258_v57 = vpop.permute.xlu1 %1257 }
 0x1ed   : > { %1390 = vst.msk [vmem:[#allocation3 + $0x4f] sm:$0x1] %vm1377_vm12, %v1258_v57 }
 0x1ee   : > { %v1256_v5 = vpop.permute.xlu0 %1255  ;;  %951 = vrot.lane.b32.xlu1 %v4115_v30, %s3689_s25  ;;  %v2546_v30 = vld [vmem:[%s3818_s8 + $0x10] sm:$0xff] }
 0x1ef   : > { %1389 = vst.msk [vmem:[#allocation3 + $0x47] sm:$0xff] %vm1375_vm13, %v1256_v5  ;;  %v3463_v16 = vpack.c.bf16 %v2547_v26, %v2546_v30 }
 0x1f0   : > { %1983 = vrot.lane.b32.xlu0 %v4334_v3, %s3695_s13  ;;  %v1962_v41 = vpop.permute.xlu1 %1961 }
 0x1f1   : > { %2099 = vst.msk [vmem:[#allocation3 + $0x2e] sm:$0xfc] %vm5757_vm6, %v1962_v41  ;;  %3464 = vmatprep.subr.bf16.mxu1 %v3463_v16 }
 0x1f2   : > { %v1771_v27 = vpop.permute.xlu0 %1770  ;;  %955 = vrot.lane.b32.xlu1 %v4334_v3, %s3689_s25  ;;  %3466 = vmatpush3.bf16.msra.mxu1 %v3463_v16  ;;  %v2548_v3 = vld [vmem:[%s3818_s8 + $0x20] sm:$0xff] }
 0x1f3   : > { %1906 = vst.msk [vmem:[#allocation3 + $0x3f] sm:$0x1] %vm1896_vm2, %v1771_v27  ;;  %v3467_v35 = vpack.c.bf16 %v2549_v21, %v2548_v3 }
 0x1f4   : > { %953 = vrot.lane.b32.xlu0 %v4137_v46, %s3689_s25  ;;  %v1449_v9 = vpop.permute.xlu1 %1448 }
 0x1f5   : > { %1583 = vst.msk [vmem:[#allocation3 + $0x3e] sm:$0xfc] %vm5756_vm15, %v1449_v9  ;;  %3468 = vmatprep.subr.bf16.mxu1 %v3467_v35 }
 0x1f6   : > { %v1964_v48 = vpop.permute.xlu0 %1963  ;;  %1649 = vrot.lane.b32.xlu1 %v4151_v23, %s3693_s10  ;;  %3470 = vmatpush3.bf16.msra.mxu1 %v3467_v35 }
 0x1f7   : > { %2100 = vst.msk [vmem:[#allocation3 + $0x36] sm:$0xff] %vm2089_vm1, %v1964_v48  ;;  %3472 = vmatprep.subr.bf16.mxu1 %v3471_v22 }
 0x1f8   : > { %1647 = vrot.lane.b32.xlu0 %v4129_v39, %s3693_s10  ;;  %v1453_v46 = vpop.permute.xlu1 %1452 }
 0x1f9   : > { %1585 = vst.msk [vmem:[#allocation3 + $0x4e] sm:$0x3] %vm5753_vm3, %v1453_v46 }
 0x1fa   : > { %v1451_v45 = vpop.permute.xlu0 %1450  ;;  %1133 = vrot.lane.b32.xlu1 %v4151_v23, %s3690_s26  ;;  %3474 = vmatpush3.bf16.msra.mxu1 %v3471_v22 }
 0x1fb   : > { %1584 = vst.msk [vmem:[#allocation3 + $0x46] sm:$0xff] %vm5754_vm14, %v1451_v45 }
 0x1fc   : > { %1131 = vrot.lane.b32.xlu0 %v4129_v39, %s3690_s26  ;;  %v1636_v12 = vpop.permute.xlu1 %1635 }
 0x1fd   : > { %1724 = vst.msk [vmem:[#allocation3 + $0x40] sm:$0xff] %vm1715_vm0, %v1636_v12 }
 0x1fe   : > { %v1966_v31 = vpop.permute.xlu0 %1965  ;;  %1792 = vrot.lane.b32.xlu1 %v4151_v23, %s3694_s12  ;;  %v2144_v54 = vld [vmem:[#allocation3 + $0x30] sm:$0xff] }
 0x1ff   : > { %2101 = vst.msk [vmem:[#allocation3 + $0x3e] sm:$0x3] %vm5755_vm9, %v1966_v31  ;;  %3332 = vmatprep.mubr.msk.f32.mxu0 %vm2190_vm7, %v2144_v54 }
 0x200   : > { %1790 = vrot.lane.b32.xlu0 %v4129_v39, %s3694_s12  ;;  %v1120_v28 = vpop.permute.xlu1 %1119 }
 0x201   : > { %1206 = vst.msk [vmem:[#allocation3 + $0x50] sm:$0xff] %vm1195_vm10, %v1120_v28 }
 0x202   : > { %v1638_v20 = vpop.permute.xlu0 %1637  ;;  %1279 = vrot.lane.b32.xlu1 %v4151_v23, %s3691_s7 }
 0x203   : > { %1725 = vst.msk [vmem:[#allocation3 + $0x48] sm:$0xff] %vm1715_vm0, %v1638_v20 }
 0x204   : > { %1277 = vrot.lane.b32.xlu0 %v4129_v39, %s3691_s7  ;;  %v1773_v7 = vpop.permute.xlu1 %1772 }
 0x205   : > { %1907 = vst.msk [vmem:[#allocation3 + $0x3f] sm:$0xfe] %vm1892_vm4, %v1773_v7 }
 0x206   : > { %v1122_v0 = vpop.permute.xlu0 %1121  ;;  %1794 = vrot.lane.b32.xlu1 %v4341_v59, %s3694_s12  ;;  %v2145_v51 = vld [vmem:[#allocation3 + $0x38] sm:$0xff] }
 0x207   : > { %1207 = vst.msk [vmem:[#allocation3 + $0x58] sm:$0xff] %vm1195_vm10, %v1122_v0  ;;  %3333 = vmatmul.mubr.msk.f32.gmra.mrb[6].mxu0 %vm2190_vm7, %v2145_v51 }
 0x208   : > { %1281 = vrot.lane.b32.xlu0 %v4341_v59, %s3691_s7  ;;  %v1260_v13 = vpop.permute.xlu1 %1259 }
 0x209   : > { %1391 = vst.msk [vmem:[#allocation3 + $0x4f] sm:$0xfe] %vm1373_vm11, %v1260_v13 }
 0x20a   : > { %v1775_v24 = vpop.permute.xlu0 %1774  ;;  %1987 = vrot.lane.b32.xlu1 %v4151_v23, %s3695_s13 }
 0x20b   : > { %1908 = vst.msk [vmem:[#allocation3 + $0x47] sm:$0xff] %vm1894_vm5, %v1775_v24 }
 0x20c   : > { %1985 = vrot.lane.b32.xlu0 %v4129_v39, %s3695_s13  ;;  %v1264_v57 = vpop.permute.xlu1 %1263 }
 0x20d   : > { %1393 = vst.msk [vmem:[#allocation3 + $0x5f] sm:$0x1] %vm1377_vm12, %v1264_v57 }
 0x20e   : > { %v1262_v5 = vpop.permute.xlu0 %1261  ;;  %1474 = vrot.lane.b32.xlu1 %v4151_v23, %s3692_s9 }
 0x20f   : > { %1392 = vst.msk [vmem:[#allocation3 + $0x57] sm:$0xff] %vm1375_vm13, %v1262_v5 }
 0x210   : > { %1472 = vrot.lane.b32.xlu0 %v4129_v39, %s3692_s9  ;;  %v1968_v2 = vpop.permute.xlu1 %1967 }
 0x211   : > { %2102 = vst.msk [vmem:[#allocation3 + $0x3e] sm:$0xfc] %vm5757_vm6, %v1968_v2 }
 0x212   : > { %v1777_v60 = vpop.permute.xlu0 %1776  ;;  %1989 = vrot.lane.b32.xlu1 %v4341_v59, %s3695_s13 }
 0x213   : > { %1909 = vst.msk [vmem:[#allocation3 + $0x4f] sm:$0x1] %vm1896_vm2, %v1777_v60 }
 0x214   : > { %1476 = vrot.lane.b32.xlu0 %v4341_v59, %s3692_s9  ;;  %v1455_v17 = vpop.permute.xlu1 %1454 }
 0x215   : > { %1586 = vst.msk [vmem:[#allocation3 + $0x4e] sm:$0xfc] %vm5756_vm15, %v1455_v17 }
 0x216   : > { %v1970_v41 = vpop.permute.xlu0 %1969  ;;  %959 = vrot.lane.b32.xlu1 %v4151_v23, %s3689_s25 }
 0x217   : > { %2103 = vst.msk [vmem:[#allocation3 + $0x46] sm:$0xff] %vm2089_vm1, %v1970_v41 }
 0x218   : > { %957 = vrot.lane.b32.xlu0 %v4129_v39, %s3689_s25  ;;  %v1459_v27 = vpop.permute.xlu1 %1458 }
 0x219   : > { %1588 = vst.msk [vmem:[#allocation3 + $0x5e] sm:$0x3] %vm5753_vm3, %v1459_v27 }
 0x21a   : > { %v1457_v30 = vpop.permute.xlu0 %1456  ;;  %1651 = vrot.lane.b32.xlu1 %v4143_v58, %s3693_s10 }
 0x21b   : > { %1587 = vst.msk [vmem:[#allocation3 + $0x56] sm:$0xff] %vm5754_vm14, %v1457_v30 }
 0x21c   : > { %961 = vrot.lane.b32.xlu0 %v4341_v59, %s3689_s25  ;;  %v1640_v26 = vpop.permute.xlu1 %1639 }
 0x21d   : > { %1726 = vst.msk [vmem:[#allocation3 + $0x50] sm:$0xff] %vm1715_vm0, %v1640_v26 }
 0x21e   : > { %v1972_v23 = vpop.permute.xlu0 %1971  ;;  %1135 = vrot.lane.b32.xlu1 %v4143_v58, %s3690_s26  ;;  %v2146_v39 = vld [vmem:[#allocation3 + $0x40] sm:$0xff] }
 0x21f   : > { %2104 = vst.msk [vmem:[#allocation3 + $0x4e] sm:$0x3] %vm5755_vm9, %v1972_v23  ;;  %3335 = vmatprep.mubr.msk.f32.mxu0 %vm2190_vm7, %v2146_v39 }
 0x220   : > { %1653 = vrot.lane.b32.xlu0 %v4165_v25, %s3693_s10  ;;  %v1124_v16 = vpop.permute.xlu1 %1123 }
 0x221   : > { %1208 = vst.msk [vmem:[#allocation3 + $0x60] sm:$0xff] %vm1195_vm10, %v1124_v16 }
 0x222   : > { %v1642_v9 = vpop.permute.xlu0 %1641  ;;  %1796 = vrot.lane.b32.xlu1 %v4143_v58, %s3694_s12 }
 0x223   : > { %1727 = vst.msk [vmem:[#allocation3 + $0x58] sm:$0xff] %vm1715_vm0, %v1642_v9 }
 0x224   : > { %1137 = vrot.lane.b32.xlu0 %v4165_v25, %s3690_s26  ;;  %v1779_v59 = vpop.permute.xlu1 %1778 }
 0x225   : > { %1910 = vst.msk [vmem:[#allocation3 + $0x4f] sm:$0xfe] %vm1892_vm4, %v1779_v59 }
 0x226   : > { %v1126_v48 = vpop.permute.xlu0 %1125  ;;  %1283 = vrot.lane.b32.xlu1 %v4143_v58, %s3691_s7  ;;  %v2147_v3 = vld [vmem:[#allocation3 + $0x48] sm:$0xff] }
 0x227   : > { %1209 = vst.msk [vmem:[#allocation3 + $0x68] sm:$0xff] %vm1195_vm10, %v1126_v48  ;;  %3336 = vmatmul.mubr.msk.f32.gmra.mrb[8].mxu0 %vm2190_vm7, %v2147_v3 }
 0x228   : > { %1798 = vrot.lane.b32.xlu0 %v4165_v25, %s3694_s12  ;;  %v1266_v21 = vpop.permute.xlu1 %1265 }
 0x229   : > { %1394 = vst.msk [vmem:[#allocation3 + $0x5f] sm:$0xfe] %vm1373_vm11, %v1266_v21 }
 0x22a   : > { %v1781_v35 = vpop.permute.xlu0 %1780  ;;  %1287 = vrot.lane.b32.xlu1 %v4362_v6, %s3691_s7 }
 0x22b   : > { %1911 = vst.msk [vmem:[#allocation3 + $0x57] sm:$0xff] %vm1894_vm5, %v1781_v35 }
 0x22c   : > { %1285 = vrot.lane.b32.xlu0 %v4165_v25, %s3691_s7  ;;  %v1270_v46 = vpop.permute.xlu1 %1269 }
 0x22d   : > { %1396 = vst.msk [vmem:[#allocation3 + $0x6f] sm:$0x1] %vm1377_vm12, %v1270_v46 }
 0x22e   : > { %v1268_v45 = vpop.permute.xlu0 %1267  ;;  %1991 = vrot.lane.b32.xlu1 %v4143_v58, %s3695_s13 }
 0x22f   : > { %1395 = vst.msk [vmem:[#allocation3 + $0x67] sm:$0xff] %vm1375_vm13, %v1268_v45 }
 0x230   : > { %1800 = vrot.lane.b32.xlu0 %v4362_v6, %s3694_s12  ;;  %v1974_v14 = vpop.permute.xlu1 %1973 }
 0x231   : > { %2105 = vst.msk [vmem:[#allocation3 + $0x4e] sm:$0xfc] %vm5757_vm6, %v1974_v14 }
 0x232   : > { %v1783_v63 = vpop.permute.xlu0 %1782  ;;  %1478 = vrot.lane.b32.xlu1 %v4143_v58, %s3692_s9 }
 0x233   : > { %1912 = vst.msk [vmem:[#allocation3 + $0x5f] sm:$0x1] %vm1896_vm2, %v1783_v63 }
 0x234   : > { %1993 = vrot.lane.b32.xlu0 %v4165_v25, %s3695_s13  ;;  %v1461_v22 = vpop.permute.xlu1 %1460 }
 0x235   : > { %1589 = vst.msk [vmem:[#allocation3 + $0x5e] sm:$0xfc] %vm5756_vm15, %v1461_v22  ;;  %v5110_v22 = vld [vmem:[%s3808_s29] ss:$0 sm:$0xff] }
 0x236   : > { %v1976_v12 = vpop.permute.xlu0 %1975  ;;  %1482 = vrot.lane.b32.xlu1 %v4362_v6, %s3692_s9 }
 0x237   : > { %2106 = vst.msk [vmem:[#allocation3 + $0x56] sm:$0xff] %vm2089_vm1, %v1976_v12 }
 0x238   : > { %1480 = vrot.lane.b32.xlu0 %v4165_v25, %s3692_s9  ;;  %v1465_v31 = vpop.permute.xlu1 %1464 }
 0x239   : > { %1591 = vst.msk [vmem:[#allocation3 + $0x6e] sm:$0x3] %vm5753_vm3, %v1465_v31 }
 0x23a   : > { %v1463_v54 = vpop.permute.xlu0 %1462  ;;  %963 = vrot.lane.b32.xlu1 %v4143_v58, %s3689_s25 }
 0x23b   : > { %1590 = vst.msk [vmem:[#allocation3 + $0x66] sm:$0xff] %vm5754_vm14, %v1463_v54 }
 0x23c   : > { %1995 = vrot.lane.b32.xlu0 %v4362_v6, %s3695_s13  ;;  %v948_v28 = vpop.permute.xlu1 %947 }
 0x23d   : > { %1072 = vst.msk [vmem:[#allocation3 + $0x76] sm:$0xff] %vm5752_vm8, %v948_v28  ;;  %vm5800_vm8 = vcmask 451968  }
 0x23e   : > { %v1978_v20 = vpop.permute.xlu0 %1977  ;;  %967 = vrot.lane.b32.xlu1 %v4362_v6, %s3689_s25  ;;  %v2148_v7 = vld [vmem:[#allocation3 + $0x50] sm:$0xff] }
 0x23f   : > { %2107 = vst.msk [vmem:[#allocation3 + $0x5e] sm:$0x3] %vm5755_vm9, %v1978_v20  ;;  %3338 = vmatprep.mubr.msk.f32.mxu0 %vm2190_vm7, %v2148_v7 }
 0x240   : > { %965 = vrot.lane.b32.xlu0 %v4165_v25, %s3689_s25  ;;  %v1644_v58 = vpop.permute.xlu1 %1643 }
 0x241   : > { %1728 = vst.msk [vmem:[#allocation3 + $0x60] sm:$0xff] %vm1715_vm0, %v1644_v58 }
 0x242   : > { %v950_v0 = vpop.permute.xlu0 %949  ;;  %1657 = vrot.lane.b32.xlu1 %v4181_v42, %s3693_s10 }
 0x243   : > { %1073 = vst.msk [vmem:[#allocation3 + $0x7e] sm:$0x3] %vm5800_vm8, %v950_v0  ;;  %vm5801_vm8 = vcmask 458114  }
 0x244   : > { %1655 = vrot.lane.b32.xlu0 %v4157_v37, %s3693_s10  ;;  %v1128_v6 = vpop.permute.xlu1 %1127 }
 0x245   : > { %1210 = vst.msk [vmem:[#allocation3 + $0x70] sm:$0xff] %vm1195_vm10, %v1128_v6 }
 0x246   : > { %v1646_v51 = vpop.permute.xlu0 %1645  ;;  %1141 = vrot.lane.b32.xlu1 %v4181_v42, %s3690_s26  ;;  %v2149_v25 = vld [vmem:[#allocation3 + $0x58] sm:$0xff] }
 0x247   : > { %1729 = vst.msk [vmem:[#allocation3 + $0x68] sm:$0xff] %vm1715_vm0, %v1646_v51  ;;  %3339 = vmatmul.mubr.msk.f32.gmra.mrb[10].mxu0 %vm2190_vm7, %v2149_v25 }
 0x248   : > { %1139 = vrot.lane.b32.xlu0 %v4157_v37, %s3690_s26  ;;  %v1785_v13 = vpop.permute.xlu1 %1784 }
 0x249   : > { %1913 = vst.msk [vmem:[#allocation3 + $0x5f] sm:$0xfe] %vm1892_vm4, %v1785_v13 }
 0x24a   : > { %v1130_v24 = vpop.permute.xlu0 %1129  ;;  %1804 = vrot.lane.b32.xlu1 %v4181_v42, %s3694_s12 }
 0x24b   : > { %1211 = vst.msk [vmem:[#allocation3 + $0x78] sm:$0xff] %vm1195_vm10, %v1130_v24 }
 0x24c   : > { %1802 = vrot.lane.b32.xlu0 %v4157_v37, %s3694_s12  ;;  %v1272_v57 = vpop.permute.xlu1 %1271 }
 0x24d   : > { %1397 = vst.msk [vmem:[#allocation3 + $0x6f] sm:$0xfe] %vm1373_vm11, %v1272_v57 }
 0x24e   : > { %v1787_v5 = vpop.permute.xlu0 %1786  ;;  %1291 = vrot.lane.b32.xlu1 %v4181_v42, %s3691_s7 }
 0x24f   : > { %1914 = vst.msk [vmem:[#allocation3 + $0x67] sm:$0xff] %vm1894_vm5, %v1787_v5 }
 0x250   : > { %1289 = vrot.lane.b32.xlu0 %v4157_v37, %s3691_s7  ;;  %v1276_v2 = vpop.permute.xlu1 %1275 }
 0x251   : > { %1399 = vst.msk [vmem:[#allocation3 + $0x7f] sm:$0x1] %vm1377_vm12, %v1276_v2 }
 0x252   : > { %v1274_v60 = vpop.permute.xlu0 %1273  ;;  %1806 = vrot.lane.b32.xlu1 %v4370_v4, %s3694_s12 }
 0x253   : > { %1398 = vst.msk [vmem:[#allocation3 + $0x77] sm:$0xff] %vm1375_vm13, %v1274_v60 }
 0x254   : > { %1293 = vrot.lane.b32.xlu0 %v4370_v4, %s3691_s7  ;;  %v1980_v17 = vpop.permute.xlu1 %1979 }
 0x255   : > { %2108 = vst.msk [vmem:[#allocation3 + $0x5e] sm:$0xfc] %vm5757_vm6, %v1980_v17 }
 0x256   : > { %v1789_v41 = vpop.permute.xlu0 %1788  ;;  %1999 = vrot.lane.b32.xlu1 %v4181_v42, %s3695_s13 }
 0x257   : > { %1915 = vst.msk [vmem:[#allocation3 + $0x6f] sm:$0x1] %vm1896_vm2, %v1789_v41 }
 0x258   : > { %1997 = vrot.lane.b32.xlu0 %v4157_v37, %s3695_s13  ;;  %v1467_v27 = vpop.permute.xlu1 %1466 }
 0x259   : > { %1592 = vst.msk [vmem:[#allocation3 + $0x6e] sm:$0xfc] %vm5756_vm15, %v1467_v27 }
 0x25a   : > { %v1982_v30 = vpop.permute.xlu0 %1981  ;;  %1486 = vrot.lane.b32.xlu1 %v4181_v42, %s3692_s9 }
 0x25b   : > { %2109 = vst.msk [vmem:[#allocation3 + $0x66] sm:$0xff] %vm2089_vm1, %v1982_v30 }
 0x25c   : > { %1484 = vrot.lane.b32.xlu0 %v4157_v37, %s3692_s9  ;;  %v1471_v26 = vpop.permute.xlu1 %1470 }
 0x25d   : > { %1594 = vst.msk [vmem:[#allocation3 + $0x7e] sm:$0x3] %vm5753_vm3, %v1471_v26  ;;  %vm5802_vm3 = vcmask 451968  }
 0x25e   : > { %v1469_v23 = vpop.permute.xlu0 %1468  ;;  %2001 = vrot.lane.b32.xlu1 %v4370_v4, %s3695_s13 }
 0x25f   : > { %1593 = vst.msk [vmem:[#allocation3 + $0x76] sm:$0xff] %vm5754_vm14, %v1469_v23 }
 0x260   : > { %1488 = vrot.lane.b32.xlu0 %v4370_v4, %s3692_s9  ;;  %v952_v39 = vpop.permute.xlu1 %951 }
 0x261   : > { %1074 = vst.msk [vmem:[#allocation3 + $0x7e] sm:$0xfc] %vm5801_vm8, %v952_v39  ;;  %vm5803_vm8 = vcmask 458112  }
 0x262   : > { %v1984_v16 = vpop.permute.xlu0 %1983  ;;  %971 = vrot.lane.b32.xlu1 %v4181_v42, %s3689_s25  ;;  %v2150_v9 = vld [vmem:[#allocation3 + $0x60] sm:$0xff] }
 0x263   : > { %2110 = vst.msk [vmem:[#allocation3 + $0x6e] sm:$0x3] %vm5755_vm9, %v1984_v16  ;;  %3341 = vmatprep.mubr.msk.f32.mxu0 %vm2190_vm7, %v2150_v9 }
 0x264   : > { %969 = vrot.lane.b32.xlu0 %v4157_v37, %s3689_s25  ;;  %v956_v59 = vpop.permute.xlu1 %955 }
 0x265   : > { %1076 = vst.msk [vmem:[#allocation3 + $0x8e] sm:$0x3] %vm5802_vm3, %v956_v59  ;;  %vm2552_vm3 = vcmask 523264  }
 0x266   : > { %v954_v48 = vpop.permute.xlu0 %953  ;;  %1659 = vrot.lane.b32.xlu1 %v4171_v52, %s3693_s10 }
 0x267   : > { %1075 = vst.msk [vmem:[#allocation3 + $0x86] sm:$0xff] %vm5803_vm8, %v954_v48  ;;  %vm5804_vm8 = vcmask 648768  }
 0x268   : > { %973 = vrot.lane.b32.xlu0 %v4370_v4, %s3689_s25  ;;  %v1650_v42 = vpop.permute.xlu1 %1649 }
 0x269   : > { %1731 = vst.msk [vmem:[#allocation3 + $0x78] sm:$0xff] %vm1715_vm0, %v1650_v42 }
 0x26a   : > { %v1648_v3 = vpop.permute.xlu0 %1647  ;;  %1143 = vrot.lane.b32.xlu1 %v4171_v52, %s3690_s26  ;;  %v2151_v37 = vld [vmem:[#allocation3 + $0x68] sm:$0xff] }
 0x26b   : > { %1730 = vst.msk [vmem:[#allocation3 + $0x70] sm:$0xff] %vm1715_vm0, %v1648_v3  ;;  %3342 = vmatmul.mubr.msk.f32.gmra.mrb[12].mxu0 %vm2190_vm7, %v2151_v37 }
 0x26c   : > { %1661 = vrot.lane.b32.xlu0 %v4197_v1, %s3693_s10  ;;  %v1134_v21 = vpop.permute.xlu1 %1133 }
 0x26d   : > { %1213 = vst.msk [vmem:[#allocation3 + $0x88] sm:$0xff] %vm1195_vm10, %v1134_v21 }
 0x26e   : > { %v1132_v35 = vpop.permute.xlu0 %1131  ;;  %1808 = vrot.lane.b32.xlu1 %v4171_v52, %s3694_s12 }
 0x26f   : > { %1212 = vst.msk [vmem:[#allocation3 + $0x80] sm:$0xff] %vm1195_vm10, %v1132_v35 }
 0x270   : > { %1145 = vrot.lane.b32.xlu0 %v4197_v1, %s3690_s26  ;;  %v1793_v4 = vpop.permute.xlu1 %1792 }
 0x271   : > { %1917 = vst.msk [vmem:[#allocation3 + $0x77] sm:$0xff] %vm1894_vm5, %v1793_v4 }
 0x272   : > { %v1791_v46 = vpop.permute.xlu0 %1790  ;;  %1295 = vrot.lane.b32.xlu1 %v4171_v52, %s3691_s7 }
 0x273   : > { %1916 = vst.msk [vmem:[#allocation3 + $0x6f] sm:$0xfe] %vm1892_vm4, %v1791_v46 }
 0x274   : > { %1810 = vrot.lane.b32.xlu0 %v4197_v1, %s3694_s12  ;;  %v1280_v45 = vpop.permute.xlu1 %1279 }
 0x275   : > { %1401 = vst.msk [vmem:[#allocation3 + $0x87] sm:$0xff] %vm1375_vm13, %v1280_v45 }
 0x276   : > { %v1278_v14 = vpop.permute.xlu0 %1277  ;;  %1299 = vrot.lane.b32.xlu1 %v4390_v53, %s3691_s7 }
 0x277   : > { %1400 = vst.msk [vmem:[#allocation3 + $0x7f] sm:$0xfe] %vm1373_vm11, %v1278_v14 }
 0x278   : > { %1297 = vrot.lane.b32.xlu0 %v4197_v1, %s3691_s7  ;;  %v1795_v63 = vpop.permute.xlu1 %1794 }
 0x279   : > { %1918 = vst.msk [vmem:[#allocation3 + $0x7f] sm:$0x1] %vm1896_vm2, %v1795_v63 }
 0x27a   : > { %v1282_v12 = vpop.permute.xlu0 %1281  ;;  %2003 = vrot.lane.b32.xlu1 %v4171_v52, %s3695_s13  ;;  %v3325_v31 = vpop.f32.mrb[0].mxu0 }
 0x27b   : > { %1402 = vst.msk [vmem:[#allocation3 + $0x8f] sm:$0x1] %vm1377_vm12, %v1282_v12  ;;  %v2359_v54 = vadd.f32 %v3325_v31, %v5110_v22  ;;  %v2353_v28 = vpop.f32.mrb[1].mxu0 }
 0x27c   : > { %v2354_v20 = vadd.f32 %v5110_v22, %v2353_v28  ;;  %1812 = vrot.lane.b32.xlu0 %v4390_v53, %s3694_s12  ;;  %v1988_v7 = vpop.permute.xlu1 %1987 }
 0x27d   : > { %2112 = vst.msk [vmem:[#allocation3 + $0x76] sm:$0xff] %vm2089_vm1, %v1988_v7  ;;  %v2513_v6 = vmax.f32 %v2359_v54, 0.0 }
 0x27e   : > { %v2512_v58 = vmax.f32 %v2354_v20, 0.0  ;;  %v1986_v0 = vpop.permute.xlu0 %1985  ;;  %1490 = vrot.lane.b32.xlu1 %v4171_v52, %s3692_s9 }
 0x27f   : > { %2111 = vst.msk [vmem:[#allocation3 + $0x6e] sm:$0xfc] %vm5757_vm6, %v1986_v0 }
 0x280   : > { %2005 = vrot.lane.b32.xlu0 %v4197_v1, %s3695_s13  ;;  %v1475_v51 = vpop.permute.xlu1 %1474  ;;  %3387 = vmatprep.mubr.msk.f32.mxu1 %vm2552_vm3, %v2512_v58 }
 0x281   : > { %1596 = vst.msk [vmem:[#allocation3 + $0x86] sm:$0xff] %vm5754_vm14, %v1475_v51  ;;  %3388 = vmatmul.mubr.msk.f32.vlgmr.msra.gmra.mrb[0].mxu1 %vm2552_vm3, %v2513_v6  ;;  %vm5805_vm14 = vcmask 458112  }
 0x282   : > { %v1473_v25 = vpop.permute.xlu0 %1472  ;;  %1494 = vrot.lane.b32.xlu1 %v4390_v53, %s3692_s9 }
 0x283   : > { %1595 = vst.msk [vmem:[#allocation3 + $0x7e] sm:$0xfc] %vm5756_vm15, %v1473_v25 }
 0x284   : > { %1492 = vrot.lane.b32.xlu0 %v4197_v1, %s3692_s9  ;;  %v1990_v13 = vpop.permute.xlu1 %1989 }
 0x285   : > { %2113 = vst.msk [vmem:[#allocation3 + $0x7e] sm:$0x3] %vm5755_vm9, %v1990_v13  ;;  %vm5806_vm9 = vcmask 458114  }
 0x286   : > { %v1477_v24 = vpop.permute.xlu0 %1476  ;;  %975 = vrot.lane.b32.xlu1 %v4171_v52, %s3689_s25  ;;  %v2152_v57 = vld [vmem:[#allocation3 + $0x70] sm:$0xff] }
 0x287   : > { %1597 = vst.msk [vmem:[#allocation3 + $0x8e] sm:$0x3] %vm5804_vm8, %v1477_v24  ;;  %3344 = vmatprep.mubr.msk.f32.mxu0 %vm2190_vm7, %v2152_v57 }
 0x288   : > { %2007 = vrot.lane.b32.xlu0 %v4390_v53, %s3695_s13  ;;  %v960_v5 = vpop.permute.xlu1 %959 }
 0x289   : > { %1078 = vst.msk [vmem:[#allocation3 + $0x96] sm:$0xff] %vm5805_vm14, %v960_v5  ;;  %vm5807_vm14 = vcmask 451968  }
 0x28a   : > { %v958_v2 = vpop.permute.xlu0 %957  ;;  %979 = vrot.lane.b32.xlu1 %v4390_v53, %s3689_s25 }
 0x28b   : > { %1077 = vst.msk [vmem:[#allocation3 + $0x8e] sm:$0xfc] %vm5806_vm9, %v958_v2  ;;  %vm5808_vm9 = vmmov %vm5804_vm8  ;;  %vm5809_vm8 = vcmask 654912  }
 0x28c   : > { %977 = vrot.lane.b32.xlu0 %v4197_v1, %s3689_s25  ;;  %v1652_v52 = vpop.permute.xlu1 %1651  ;;  %v2153_v60 = vld [vmem:[#allocation3 + $0x78] sm:$0xff] }
 0x28d   : > { %1732 = vst.msk [vmem:[#allocation3 + $0x80] sm:$0xff] %vm1715_vm0, %v1652_v52  ;;  %3345 = vmatmul.mubr.msk.f32.gmra.mrb[14].mxu0 %vm2190_vm7, %v2153_v60 }
 0x28e   : > { %v962_v17 = vpop.permute.xlu0 %961  ;;  %1665 = vrot.lane.b32.xlu1 %v4215_v29, %s3693_s10 }
 0x28f   : > { %1079 = vst.msk [vmem:[#allocation3 + $0x9e] sm:$0x3] %vm5807_vm14, %v962_v17  ;;  %vm5810_vm14 = vcmask 458114  }
 0x290   : > { %1663 = vrot.lane.b32.xlu0 %v4189_v55, %s3693_s10  ;;  %v1136_v53 = vpop.permute.xlu1 %1135 }
 0x291   : > { %1214 = vst.msk [vmem:[#allocation3 + $0x90] sm:$0xff] %vm1195_vm10, %v1136_v53 }
 0x292   : > { %v1654_v41 = vpop.permute.xlu0 %1653  ;;  %1149 = vrot.lane.b32.xlu1 %v4215_v29, %s3690_s26 }
 0x293   : > { %1733 = vst.msk [vmem:[#allocation3 + $0x88] sm:$0xff] %vm1715_vm0, %v1654_v41 }
 0x294   : > { %1147 = vrot.lane.b32.xlu0 %v4189_v55, %s3690_s26  ;;  %v1797_v1 = vpop.permute.xlu1 %1796 }
 0x295   : > { %1919 = vst.msk [vmem:[#allocation3 + $0x7f] sm:$0xfe] %vm1892_vm4, %v1797_v1 }
 0x296   : > { %v1138_v27 = vpop.permute.xlu0 %1137  ;;  %1816 = vrot.lane.b32.xlu1 %v4215_v29, %s3694_s12 }
 0x297   : > { %1215 = vst.msk [vmem:[#allocation3 + $0x98] sm:$0xff] %vm1195_vm10, %v1138_v27 }
 0x298   : > { %1814 = vrot.lane.b32.xlu0 %v4189_v55, %s3694_s12  ;;  %v1284_v30 = vpop.permute.xlu1 %1283 }
 0x299   : > { %1403 = vst.msk [vmem:[#allocation3 + $0x8f] sm:$0xfe] %vm1373_vm11, %v1284_v30 }
 0x29a   : > { %v1799_v26 = vpop.permute.xlu0 %1798  ;;  %1303 = vrot.lane.b32.xlu1 %v4215_v29, %s3691_s7  ;;  %v3328_v23 = vpop.f32.mrb[2].mxu0 }
 0x29b   : > { %1920 = vst.msk [vmem:[#allocation3 + $0x87] sm:$0xff] %vm1894_vm5, %v1799_v26  ;;  %v2369_v39 = vadd.f32 %v3328_v23, %v5110_v22  ;;  %v2363_v16 = vpop.f32.mrb[3].mxu0 }
 0x29c   : > { %v2364_v9 = vadd.f32 %v5110_v22, %v2363_v16  ;;  %1301 = vrot.lane.b32.xlu0 %v4189_v55, %s3691_s7  ;;  %v1288_v59 = vpop.permute.xlu1 %1287 }
 0x29d   : > { %1405 = vst.msk [vmem:[#allocation3 + $0x9f] sm:$0x1] %vm1377_vm12, %v1288_v59  ;;  %v2515_v3 = vmax.f32 %v2369_v39, 0.0 }
 0x29e   : > { %v2514_v48 = vmax.f32 %v2364_v9, 0.0  ;;  %v1286_v42 = vpop.permute.xlu0 %1285  ;;  %1818 = vrot.lane.b32.xlu1 %v4398_v38, %s3694_s12 }
 0x29f   : > { %1404 = vst.msk [vmem:[#allocation3 + $0x97] sm:$0xff] %vm1375_vm13, %v1286_v42 }
 0x2a0   : > { %1305 = vrot.lane.b32.xlu0 %v4398_v38, %s3691_s7  ;;  %v1992_v37 = vpop.permute.xlu1 %1991  ;;  %3390 = vmatprep.mubr.msk.f32.mxu1 %vm2552_vm3, %v2514_v48 }
 0x2a1   : > { %2114 = vst.msk [vmem:[#allocation3 + $0x7e] sm:$0xfc] %vm5757_vm6, %v1992_v37  ;;  %3391 = vmatmul.mubr.msk.f32.gmra.mrb[2].mxu1 %vm2552_vm3, %v2515_v3 }
 0x2a2   : > { %v1801_v21 = vpop.permute.xlu0 %1800  ;;  %2011 = vrot.lane.b32.xlu1 %v4215_v29, %s3695_s13 }
 0x2a3   : > { %1921 = vst.msk [vmem:[#allocation3 + $0x8f] sm:$0x1] %vm1896_vm2, %v1801_v21 }
 0x2a4   : > { %2009 = vrot.lane.b32.xlu0 %v4189_v55, %s3695_s13  ;;  %v1479_v35 = vpop.permute.xlu1 %1478 }
 0x2a5   : > { %1598 = vst.msk [vmem:[#allocation3 + $0x8e] sm:$0xfc] %vm5756_vm15, %v1479_v35  ;;  %vm5811_vm15 = vcmask 845568  }
 0x2a6   : > { %v1994_v4 = vpop.permute.xlu0 %1993  ;;  %1498 = vrot.lane.b32.xlu1 %v4215_v29, %s3692_s9 }
 0x2a7   : > { %2115 = vst.msk [vmem:[#allocation3 + $0x86] sm:$0xff] %vm2089_vm1, %v1994_v4 }
 0x2a8   : > { %1496 = vrot.lane.b32.xlu0 %v4189_v55, %s3692_s9  ;;  %v1483_v46 = vpop.permute.xlu1 %1482 }
 0x2a9   : > { %1600 = vst.msk [vmem:[#allocation3 + $0x9e] sm:$0x3] %vm5808_vm9, %v1483_v46  ;;  %vm5812_vm9 = vcmask 451968  }
 0x2aa   : > { %v1481_v45 = vpop.permute.xlu0 %1480  ;;  %2013 = vrot.lane.b32.xlu1 %v4398_v38, %s3695_s13 }
 0x2ab   : > { %1599 = vst.msk [vmem:[#allocation3 + $0x96] sm:$0xff] %vm5809_vm8, %v1481_v45  ;;  %vm5813_vm8 = vcmask 458112  }
 0x2ac   : > { %1500 = vrot.lane.b32.xlu0 %v4398_v38, %s3692_s9  ;;  %v964_v14 = vpop.permute.xlu1 %963 }
 0x2ad   : > { %1080 = vst.msk [vmem:[#allocation3 + $0x9e] sm:$0xfc] %vm5810_vm14, %v964_v14  ;;  %vm5815_vm14 = vcmask 654914  }
 0x2ae   : > { %v1996_v63 = vpop.permute.xlu0 %1995  ;;  %983 = vrot.lane.b32.xlu1 %v4215_v29, %s3689_s25  ;;  %v2154_v12 = vld [vmem:[#allocation3 + $0x80] sm:$0xff] }
 0x2af   : > { %2116 = vst.msk [vmem:[#allocation3 + $0x8e] sm:$0x3] %vm5811_vm15, %v1996_v63  ;;  %3347 = vmatprep.mubr.msk.f32.mxu0 %vm2190_vm7, %v2154_v12  ;;  %vm5814_vm15 = vcmask 654912  }
 0x2b0   : > { %981 = vrot.lane.b32.xlu0 %v4189_v55, %s3689_s25  ;;  %v968_v31 = vpop.permute.xlu1 %967 }
 0x2b1   : > { %1082 = vst.msk [vmem:[#allocation3 + $0xae] sm:$0x3] %vm5812_vm9, %v968_v31  ;;  %vm5816_vm9 = vcmask 845568  }
 0x2b2   : > { %v966_v54 = vpop.permute.xlu0 %965  ;;  %1667 = vrot.lane.b32.xlu1 %v4207_v15, %s3693_s10 }
 0x2b3   : > { %1081 = vst.msk [vmem:[#allocation3 + $0xa6] sm:$0xff] %vm5813_vm8, %v966_v54  ;;  %vm5817_vm8 = vcmask 648768  }
 0x2b4   : > { %985 = vrot.lane.b32.xlu0 %v4398_v38, %s3689_s25  ;;  %v1658_v29 = vpop.permute.xlu1 %1657 }
 0x2b5   : > { %1735 = vst.msk [vmem:[#allocation3 + $0x98] sm:$0xff] %vm1715_vm0, %v1658_v29 }
 0x2b6   : > { %v1656_v28 = vpop.permute.xlu0 %1655  ;;  %1151 = vrot.lane.b32.xlu1 %v4207_v15, %s3690_s26  ;;  %v2155_v55 = vld [vmem:[#allocation3 + $0x88] sm:$0xff] }
 0x2b7   : > { %1734 = vst.msk [vmem:[#allocation3 + $0x90] sm:$0xff] %vm1715_vm0, %v1656_v28  ;;  %3348 = vmatmul.mubr.msk.f32.gmra.mrb[16].mxu0 %vm2190_vm7, %v2155_v55  ;;  %v477_v55 = vrot.slane %v4176_v61, 7 }
 0x2b8   : > { %1669 = vrot.lane.b32.xlu0 %v4228_v19, %s3693_s10  ;;  %v1142_v20 = vpop.permute.xlu1 %1141 }
 0x2b9   : > { %1217 = vst.msk [vmem:[#allocation3 + $0xa8] sm:$0xff] %vm1195_vm10, %v1142_v20 }
 0x2ba   : > { %v1140_v7 = vpop.permute.xlu0 %1139  ;;  %1820 = vrot.lane.b32.xlu1 %v4207_v15, %s3694_s12  ;;  %v3331_v38 = vpop.f32.mrb[4].mxu0 }
 0x2bb   : > { %1216 = vst.msk [vmem:[#allocation3 + $0xa0] sm:$0xff] %vm1195_vm10, %v1140_v7  ;;  %v2379_v58 = vadd.f32 %v3331_v38, %v5110_v22  ;;  %v2373_v0 = vpop.f32.mrb[5].mxu0 }
 0x2bc   : > { %v2374_v6 = vadd.f32 %v5110_v22, %v2373_v0  ;;  %1153 = vrot.lane.b32.xlu0 %v4228_v19, %s3690_s26  ;;  %v1805_v51 = vpop.permute.xlu1 %1804 }
 0x2bd   : > { %1923 = vst.msk [vmem:[#allocation3 + $0x97] sm:$0xff] %vm1894_vm5, %v1805_v51  ;;  %v2517_v24 = vmax.f32 %v2379_v58, 0.0 }
 0x2be   : > { %v2516_v25 = vmax.f32 %v2374_v6, 0.0  ;;  %v1803_v13 = vpop.permute.xlu0 %1802  ;;  %1307 = vrot.lane.b32.xlu1 %v4207_v15, %s3691_s7 }
 0x2bf   : > { %1922 = vst.msk [vmem:[#allocation3 + $0x8f] sm:$0xfe] %vm1892_vm4, %v1803_v13 }
 0x2c0   : > { %1822 = vrot.lane.b32.xlu0 %v4228_v19, %s3694_s12  ;;  %v1292_v57 = vpop.permute.xlu1 %1291  ;;  %3393 = vmatprep.mubr.msk.f32.mxu1 %vm2552_vm3, %v2516_v25 }
 0x2c1   : > { %1407 = vst.msk [vmem:[#allocation3 + $0xa7] sm:$0xff] %vm1375_vm13, %v1292_v57  ;;  %3394 = vmatmul.mubr.msk.f32.gmra.mrb[4].mxu1 %vm2552_vm3, %v2517_v24  ;;  %v478_v24 = vrot.slane %v4200_v36, 7 }
 0x2c2   : > { %v1290_v5 = vpop.permute.xlu0 %1289  ;;  %1311 = vrot.lane.b32.xlu1 %v4418_v62, %s3691_s7 }
 0x2c3   : > { %1406 = vst.msk [vmem:[#allocation3 + $0x9f] sm:$0xfe] %vm1373_vm11, %v1290_v5 }
 0x2c4   : > { %1309 = vrot.lane.b32.xlu0 %v4228_v19, %s3691_s7  ;;  %v1807_v2 = vpop.permute.xlu1 %1806 }
 0x2c5   : > { %1924 = vst.msk [vmem:[#allocation3 + $0x9f] sm:$0x1] %vm1896_vm2, %v1807_v2 }
 0x2c6   : > { %v1294_v52 = vpop.permute.xlu0 %1293  ;;  %2015 = vrot.lane.b32.xlu1 %v4207_v15, %s3695_s13 }
 0x2c7   : > { %1408 = vst.msk [vmem:[#allocation3 + $0xaf] sm:$0x1] %vm1377_vm12, %v1294_v52 }
 0x2c8   : > { %1824 = vrot.lane.b32.xlu0 %v4418_v62, %s3694_s12  ;;  %v2000_v60 = vpop.permute.xlu1 %1999 }
 0x2c9   : > { %2118 = vst.msk [vmem:[#allocation3 + $0x96] sm:$0xff] %vm2089_vm1, %v2000_v60 }
 0x2ca   : > { %v1998_v17 = vpop.permute.xlu0 %1997  ;;  %1502 = vrot.lane.b32.xlu1 %v4207_v15, %s3692_s9 }
 0x2cb   : > { %2117 = vst.msk [vmem:[#allocation3 + $0x8e] sm:$0xfc] %vm5757_vm6, %v1998_v17 }
 0x2cc   : > { %2017 = vrot.lane.b32.xlu0 %v4228_v19, %s3695_s13  ;;  %v1487_v53 = vpop.permute.xlu1 %1486 }
 0x2cd   : > { %1602 = vst.msk [vmem:[#allocation3 + $0xa6] sm:$0xff] %vm5814_vm15, %v1487_v53  ;;  %vm5818_vm15 = vcmask 458112  }
 0x2ce   : > { %v1485_v41 = vpop.permute.xlu0 %1484  ;;  %1506 = vrot.lane.b32.xlu1 %v4418_v62, %s3692_s9 }
 0x2cf   : > { %1601 = vst.msk [vmem:[#allocation3 + $0x9e] sm:$0xfc] %vm5815_vm14, %v1485_v41  ;;  %vm5819_vm14 = vcmask 458114  }
 0x2d0   : > { %1504 = vrot.lane.b32.xlu0 %v4228_v19, %s3692_s9  ;;  %v2002_v1 = vpop.permute.xlu1 %2001 }
 0x2d1   : > { %2119 = vst.msk [vmem:[#allocation3 + $0x9e] sm:$0x3] %vm5816_vm9, %v2002_v1  ;;  %vm5820_vm9 = vcmask 451968  }
 0x2d2   : > { %v1489_v27 = vpop.permute.xlu0 %1488  ;;  %987 = vrot.lane.b32.xlu1 %v4207_v15, %s3689_s25  ;;  %v2156_v30 = vld [vmem:[#allocation3 + $0x90] sm:$0xff] }
 0x2d3   : > { %1603 = vst.msk [vmem:[#allocation3 + $0xae] sm:$0x3] %vm5817_vm8, %v1489_v27  ;;  %3350 = vmatprep.mubr.msk.f32.mxu0 %vm2190_vm7, %v2156_v30  ;;  %vm5821_vm8 = vcmask 654914  }
 0x2d4   : > { %2019 = vrot.lane.b32.xlu0 %v4418_v62, %s3695_s13  ;;  %v972_v26 = vpop.permute.xlu1 %971 }
 0x2d5   : > { %1084 = vst.msk [vmem:[#allocation3 + $0xb6] sm:$0xff] %vm5818_vm15, %v972_v26  ;;  %vm5822_vm15 = vcmask 648768  }
 0x2d6   : > { %v970_v23 = vpop.permute.xlu0 %969  ;;  %991 = vrot.lane.b32.xlu1 %v4418_v62, %s3689_s25 }
 0x2d7   : > { %1083 = vst.msk [vmem:[#allocation3 + $0xae] sm:$0xfc] %vm5819_vm14, %v970_v23  ;;  %vm5823_vm14 = vcmask 654912  }
 0x2d8   : > { %989 = vrot.lane.b32.xlu0 %v4228_v19, %s3689_s25  ;;  %v1660_v15 = vpop.permute.xlu1 %1659  ;;  %v2157_v39 = vld [vmem:[#allocation3 + $0x98] sm:$0xff] }
 0x2d9   : > { %1736 = vst.msk [vmem:[#allocation3 + $0xa0] sm:$0xff] %vm1715_vm0, %v1660_v15  ;;  %3351 = vmatmul.mubr.msk.f32.gmra.mrb[18].mxu0 %vm2190_vm7, %v2157_v39 }
 0x2da   : > { %v974_v16 = vpop.permute.xlu0 %973  ;;  %1673 = vrot.lane.b32.xlu1 %v4238_v18, %s3693_s10  ;;  %v3334_v9 = vpop.f32.mrb[6].mxu0 }
 0x2db   : > { %1085 = vst.msk [vmem:[#allocation3 + $0xbe] sm:$0x3] %vm5820_vm9, %v974_v16  ;;  %v2389_v62 = vadd.f32 %v3334_v9, %v5110_v22  ;;  %v2383_v59 = vpop.f32.mrb[7].mxu0  ;;  %vm5824_vm9 = vcmask 458114  }
 0x2dc   : > { %v2384_v48 = vadd.f32 %v5110_v22, %v2383_v59  ;;  %1671 = vrot.lane.b32.xlu0 %v4221_v11, %s3693_s10  ;;  %v1144_v19 = vpop.permute.xlu1 %1143 }
 0x2dd   : > { %1218 = vst.msk [vmem:[#allocation3 + $0xb0] sm:$0xff] %vm1195_vm10, %v1144_v19  ;;  %v2519_v37 = vmax.f32 %v2389_v62, 0.0 }
 0x2de   : > { %v2518_v42 = vmax.f32 %v2384_v48, 0.0  ;;  %v1662_v3 = vpop.permute.xlu0 %1661  ;;  %1157 = vrot.lane.b32.xlu1 %v4238_v18, %s3690_s26 }
 0x2df   : > { %1737 = vst.msk [vmem:[#allocation3 + $0xa8] sm:$0xff] %vm1715_vm0, %v1662_v3 }
 0x2e0   : > { %1155 = vrot.lane.b32.xlu0 %v4221_v11, %s3690_s26  ;;  %v1809_v21 = vpop.permute.xlu1 %1808  ;;  %3396 = vmatprep.mubr.msk.f32.mxu1 %vm2552_vm3, %v2518_v42 }
 0x2e1   : > { %1925 = vst.msk [vmem:[#allocation3 + $0x9f] sm:$0xfe] %vm1892_vm4, %v1809_v21  ;;  %3397 = vmatmul.mubr.msk.f32.gmra.mrb[6].mxu1 %vm2552_vm3, %v2519_v37 }
 0x2e2   : > { %v1146_v35 = vpop.permute.xlu0 %1145  ;;  %1828 = vrot.lane.b32.xlu1 %v4238_v18, %s3694_s12 }
 0x2e3   : > { %1219 = vst.msk [vmem:[#allocation3 + $0xb8] sm:$0xff] %vm1195_vm10, %v1146_v35 }
 0x2e4   : > { %1826 = vrot.lane.b32.xlu0 %v4221_v11, %s3694_s12  ;;  %v1296_v4 = vpop.permute.xlu1 %1295 }
 0x2e5   : > { %1409 = vst.msk [vmem:[#allocation3 + $0xaf] sm:$0xfe] %vm1373_vm11, %v1296_v4 }
 0x2e6   : > { %v1811_v46 = vpop.permute.xlu0 %1810  ;;  %1315 = vrot.lane.b32.xlu1 %v4238_v18, %s3691_s7 }
 0x2e7   : > { %1926 = vst.msk [vmem:[#allocation3 + $0xa7] sm:$0xff] %vm1894_vm5, %v1811_v46 }
 0x2e8   : > { %1313 = vrot.lane.b32.xlu0 %v4221_v11, %s3691_s7  ;;  %v1300_v45 = vpop.permute.xlu1 %1299 }
 0x2e9   : > { %1411 = vst.msk [vmem:[#allocation3 + $0xbf] sm:$0x1] %vm1377_vm12, %v1300_v45 }
 0x2ea   : > { %v1298_v14 = vpop.permute.xlu0 %1297  ;;  %1830 = vrot.lane.b32.xlu1 %v4426_v10, %s3694_s12 }
 0x2eb   : > { %1410 = vst.msk [vmem:[#allocation3 + $0xb7] sm:$0xff] %vm1375_vm13, %v1298_v14 }
 0x2ec   : > { %1317 = vrot.lane.b32.xlu0 %v4426_v10, %s3691_s7  ;;  %v2004_v63 = vpop.permute.xlu1 %2003 }
 0x2ed   : > { %2120 = vst.msk [vmem:[#allocation3 + $0x9e] sm:$0xfc] %vm5757_vm6, %v2004_v63 }
 0x2ee   : > { %v1813_v12 = vpop.permute.xlu0 %1812  ;;  %2023 = vrot.lane.b32.xlu1 %v4238_v18, %s3695_s13 }
 0x2ef   : > { %1927 = vst.msk [vmem:[#allocation3 + $0xaf] sm:$0x1] %vm1896_vm2, %v1813_v12 }
 0x2f0   : > { %2021 = vrot.lane.b32.xlu0 %v4221_v11, %s3695_s13  ;;  %v1491_v31 = vpop.permute.xlu1 %1490 }
 0x2f1   : > { %1604 = vst.msk [vmem:[#allocation3 + $0xae] sm:$0xfc] %vm5821_vm8, %v1491_v31  ;;  %vm5825_vm8 = vcmask 845568  }
 0x2f2   : > { %v2006_v54 = vpop.permute.xlu0 %2005  ;;  %1510 = vrot.lane.b32.xlu1 %v4238_v18, %s3692_s9 }
 0x2f3   : > { %2121 = vst.msk [vmem:[#allocation3 + $0xa6] sm:$0xff] %vm2089_vm1, %v2006_v54 }
 0x2f4   : > { %1508 = vrot.lane.b32.xlu0 %v4221_v11, %s3692_s9  ;;  %v1495_v29 = vpop.permute.xlu1 %1494 }
 0x2f5   : > { %1606 = vst.msk [vmem:[#allocation3 + $0xbe] sm:$0x3] %vm5822_vm15, %v1495_v29  ;;  %vm5826_vm15 = vcmask 1040384  }
 0x2f6   : > { %v1493_v28 = vpop.permute.xlu0 %1492  ;;  %2025 = vrot.lane.b32.xlu1 %v4426_v10, %s3695_s13  ;;  %v529_v51 = vsel %vm5826_vm15, 0.0, %v477_v55 }
 0x2f7   : > { %1605 = vst.msk [vmem:[#allocation3 + $0xb6] sm:$0xff] %vm5823_vm14, %v1493_v28  ;;  %vm5827_vm14 = vcmask 451968  }
 0x2f8   : > { %1512 = vrot.lane.b32.xlu0 %v4426_v10, %s3692_s9  ;;  %v976_v20 = vpop.permute.xlu1 %975 }
 0x2f9   : > { %1086 = vst.msk [vmem:[#allocation3 + $0xbe] sm:$0xfc] %vm5824_vm9, %v976_v20  ;;  %vm5828_vm9 = vcmask 458112  }
 0x2fa   : > { %v2008_v7 = vpop.permute.xlu0 %2007  ;;  %v3337_v38 = vpop.f32.mrb[8].mxu0  ;;  %v2158_v58 = vld [vmem:[#allocation3 + $0xa0] sm:$0xff]  ;;  %995 = vrot.lane.b32.xlu1 %v4238_v18, %s3689_s25 }
 0x2fb   : > { %2122 = vst.msk [vmem:[#allocation3 + $0xae] sm:$0x3] %vm5825_vm8, %v2008_v7  ;;  %v2399_v0 = vadd.f32 %v3337_v38, %v5110_v22  ;;  %v2393_v6 = vpop.f32.mrb[9].mxu0  ;;  %3353 = vmatprep.mubr.msk.f32.mxu0 %vm2190_vm7, %v2158_v58  ;;  %vm5829_vm8 = vmmov %vm5826_vm15 }
 0x2fc   : > { %v2394_v25 = vadd.f32 %v5110_v22, %v2393_v6  ;;  %993 = vrot.lane.b32.xlu0 %v4221_v11, %s3689_s25  ;;  %v980_v13 = vpop.permute.xlu1 %979  ;;  %v479_v11 = vsel %vm5829_vm8, %v477_v55, %v478_v24  ;;  %vm5830_vm15 = vmmov %vm5829_vm8  ;;  %vm5833_vm8 = vcmask 845568  }
 0x2fd   : > { %1088 = vst.msk [vmem:[#allocation3 + $0xce] sm:$0x3] %vm5827_vm14, %v980_v13  ;;  %v2521_v5 = vmax.f32 %v2399_v0, 0.0  ;;  %v546_v1 = vsel %vm5830_vm15, %v478_v24, 0.0  ;;  %vm5831_vm14 = vcmask 654912   ;;  %vm5834_vm15 = vcmask 648768  }
 0x2fe   : > { %v2520_v18 = vmax.f32 %v2394_v25, 0.0  ;;  %v978_v57 = vpop.permute.xlu0 %977  ;;  %1675 = vrot.lane.b32.xlu1 %v529_v51, %s3693_s10 }
 0x2ff   : > { %1087 = vst.msk [vmem:[#allocation3 + $0xc6] sm:$0xff] %vm5828_vm9, %v978_v57  ;;  %vm5832_vm9 = vcmask 654914  }
 0x300   : > { %997 = vrot.lane.b32.xlu0 %v4426_v10, %s3689_s25  ;;  %v1666_v2 = vpop.permute.xlu1 %1665  ;;  %3399 = vmatprep.mubr.msk.f32.mxu1 %vm2552_vm3, %v2520_v18 }
 0x301   : > { %1739 = vst.msk [vmem:[#allocation3 + $0xb8] sm:$0xff] %vm1715_vm0, %v1666_v2  ;;  %3400 = vmatmul.mubr.msk.f32.gmra.mrb[8].mxu1 %vm2552_vm3, %v2521_v5 }
 0x302   : > { %v1664_v52 = vpop.permute.xlu0 %1663  ;;  %v2159_v60 = vld [vmem:[#allocation3 + $0xa8] sm:$0xff]  ;;  %1159 = vrot.lane.b32.xlu1 %v529_v51, %s3690_s26 }
 0x303   : > { %1738 = vst.msk [vmem:[#allocation3 + $0xb0] sm:$0xff] %vm1715_vm0, %v1664_v52  ;;  %3354 = vmatmul.mubr.msk.f32.gmra.mrb[20].mxu0 %vm2190_vm7, %v2159_v60 }
 0x304   : > { %1677 = vrot.lane.b32.xlu0 %v479_v11, %s3693_s10  ;;  %v1150_v10 = vpop.permute.xlu1 %1149 }
 0x305   : > { %1221 = vst.msk [vmem:[#allocation3 + $0xc8] sm:$0xff] %vm1195_vm10, %v1150_v10 }
 0x306   : > { %v1148_v17 = vpop.permute.xlu0 %1147  ;;  %1832 = vrot.lane.b32.xlu1 %v529_v51, %s3694_s12 }
 0x307   : > { %1220 = vst.msk [vmem:[#allocation3 + $0xc0] sm:$0xff] %vm1195_vm10, %v1148_v17 }
 0x308   : > { %1161 = vrot.lane.b32.xlu0 %v479_v11, %s3690_s26  ;;  %v1817_v53 = vpop.permute.xlu1 %1816 }
 0x309   : > { %1929 = vst.msk [vmem:[#allocation3 + $0xb7] sm:$0xff] %vm1894_vm5, %v1817_v53 }
 0x30a   : > { %v1815_v41 = vpop.permute.xlu0 %1814  ;;  %1319 = vrot.lane.b32.xlu1 %v529_v51, %s3691_s7 }
 0x30b   : > { %1928 = vst.msk [vmem:[#allocation3 + $0xaf] sm:$0xfe] %vm1892_vm4, %v1815_v41 }
 0x30c   : > { %1834 = vrot.lane.b32.xlu0 %v479_v11, %s3694_s12  ;;  %v1304_v27 = vpop.permute.xlu1 %1303 }
 0x30d   : > { %1413 = vst.msk [vmem:[#allocation3 + $0xc7] sm:$0xff] %vm1375_vm13, %v1304_v27 }
 0x30e   : > { %v1302_v30 = vpop.permute.xlu0 %1301  ;;  %1323 = vrot.lane.b32.xlu1 %v546_v1, %s3691_s7 }
 0x30f   : > { %1412 = vst.msk [vmem:[#allocation3 + $0xbf] sm:$0xfe] %vm1373_vm11, %v1302_v30 }
 0x310   : > { %1321 = vrot.lane.b32.xlu0 %v479_v11, %s3691_s7  ;;  %v1819_v26 = vpop.permute.xlu1 %1818 }
 0x311   : > { %1930 = vst.msk [vmem:[#allocation3 + $0xbf] sm:$0x1] %vm1896_vm2, %v1819_v26 }
 0x312   : > { %v1306_v23 = vpop.permute.xlu0 %1305  ;;  %2027 = vrot.lane.b32.xlu1 %v529_v51, %s3695_s13 }
 0x313   : > { %1414 = vst.msk [vmem:[#allocation3 + $0xcf] sm:$0x1] %vm1377_vm12, %v1306_v23 }
 0x314   : > { %1836 = vrot.lane.b32.xlu0 %v546_v1, %s3694_s12  ;;  %v2012_v15 = vpop.permute.xlu1 %2011 }
 0x315   : > { %2124 = vst.msk [vmem:[#allocation3 + $0xb6] sm:$0xff] %vm2089_vm1, %v2012_v15 }
 0x316   : > { %v2010_v39 = vpop.permute.xlu0 %2009  ;;  %1514 = vrot.lane.b32.xlu1 %v529_v51, %s3692_s9 }
 0x317   : > { %2123 = vst.msk [vmem:[#allocation3 + $0xae] sm:$0xfc] %vm5757_vm6, %v2010_v39 }
 0x318   : > { %2029 = vrot.lane.b32.xlu0 %v479_v11, %s3695_s13  ;;  %v1499_v16 = vpop.permute.xlu1 %1498 }
 0x319   : > { %1608 = vst.msk [vmem:[#allocation3 + $0xc6] sm:$0xff] %vm5831_vm14, %v1499_v16  ;;  %vm5835_vm14 = vcmask 458112  }
 0x31a   : > { %v1497_v9 = vpop.permute.xlu0 %1496  ;;  %v3340_v62 = vpop.f32.mrb[10].mxu0  ;;  %1518 = vrot.lane.b32.xlu1 %v546_v1, %s3692_s9 }
 0x31b   : > { %1607 = vst.msk [vmem:[#allocation3 + $0xbe] sm:$0xfc] %vm5832_vm9, %v1497_v9  ;;  %v2409_v59 = vadd.f32 %v3340_v62, %v5110_v22  ;;  %v2403_v48 = vpop.f32.mrb[11].mxu0  ;;  %vm5836_vm9 = vcmask 458114  }
 0x31c   : > { %v2404_v19 = vadd.f32 %v5110_v22, %v2403_v48  ;;  %1516 = vrot.lane.b32.xlu0 %v479_v11, %s3692_s9  ;;  %v2014_v42 = vpop.permute.xlu1 %2013 }
 0x31d   : > { %2125 = vst.msk [vmem:[#allocation3 + $0xbe] sm:$0x3] %vm5833_vm8, %v2014_v42  ;;  %v2523_v35 = vmax.f32 %v2409_v59, 0.0  ;;  %vm5837_vm8 = vcmask 451968  }
 0x31e   : > { %v2522_v3 = vmax.f32 %v2404_v19, 0.0  ;;  %v1501_v37 = vpop.permute.xlu0 %1500  ;;  %v2160_v21 = vld [vmem:[#allocation3 + $0xb0] sm:$0xff]  ;;  %3575 = vrot.lane.b32.xlu1 %v3910_v43, %s3693_s10 }
 0x31f   : > { %1609 = vst.msk [vmem:[#allocation3 + $0xce] sm:$0x3] %vm5834_vm15, %v1501_v37  ;;  %3356 = vmatprep.mubr.msk.f32.mxu0 %vm2190_vm7, %v2160_v21  ;;  %vm5838_vm15 = vcmask 654914  }
 0x320   : > { %2031 = vrot.lane.b32.xlu0 %v546_v1, %s3695_s13  ;;  %v984_v4 = vpop.permute.xlu1 %983  ;;  %3402 = vmatprep.mubr.msk.f32.mxu1 %vm2552_vm3, %v2522_v3 }
 0x321   : > { %1090 = vst.msk [vmem:[#allocation3 + $0xd6] sm:$0xff] %vm5835_vm14, %v984_v4  ;;  %3403 = vmatmul.mubr.msk.f32.gmra.mrb[10].mxu1 %vm2552_vm3, %v2523_v35  ;;  %vm5839_vm14 = vcmask 648768  }
 0x322   : > { %v982_v46 = vpop.permute.xlu0 %981  ;;  %1842 = vrot.lane.b32.xlu1 %v4246_v49, %s3694_s12 }
 0x323   : > { %1089 = vst.msk [vmem:[#allocation3 + $0xce] sm:$0xfc] %vm5836_vm9, %v982_v46  ;;  %vm5840_vm9 = vcmask 654912  }
 0x324   : > { %3580 = vrot.lane.b32.xlu0 %v3910_v43, %s3694_s12  ;;  %v1668_v45 = vpop.permute.xlu1 %1667  ;;  %v2161_v14 = vld [vmem:[#allocation3 + $0xb8] sm:$0xff] }
 0x325   : > { %1740 = vst.msk [vmem:[#allocation3 + $0xc0] sm:$0xff] %vm1715_vm0, %v1668_v45  ;;  %3357 = vmatmul.mubr.msk.f32.gmra.mrb[22].mxu0 %vm2190_vm7, %v2161_v14 }
 0x326   : > { %v986_v63 = vpop.permute.xlu0 %985  ;;  %2037 = vrot.lane.b32.xlu1 %v4246_v49, %s3695_s13 }
 0x327   : > { %1091 = vst.msk [vmem:[#allocation3 + $0xde] sm:$0x3] %vm5837_vm8, %v986_v63  ;;  %vm5841_vm8 = vcmask 458114  }
 0x328   : > { %3585 = vrot.lane.b32.xlu0 %v3910_v43, %s3695_s13  ;;  %v1152_v12 = vpop.permute.xlu1 %1151 }
 0x329   : > { %1222 = vst.msk [vmem:[#allocation3 + $0xd0] sm:$0xff] %vm1195_vm10, %v1152_v12 }
 0x32a   : > { %v1670_v31 = vpop.permute.xlu0 %1669 }
 0x32b   : > { %1741 = vst.msk [vmem:[#allocation3 + $0xc8] sm:$0xff] %vm1715_vm0, %v1670_v31 }
 0x32c   : > { %v1821_v54 = vpop.permute.xlu1 %1820 }
 0x32d   : > { %1931 = vst.msk [vmem:[#allocation3 + $0xbf] sm:$0xfe] %vm1892_vm4, %v1821_v54 }
 0x32e   : > { %v1154_v29 = vpop.permute.xlu0 %1153 }
 0x32f   : > { %1223 = vst.msk [vmem:[#allocation3 + $0xd8] sm:$0xff] %vm1195_vm10, %v1154_v29 }
 0x330   : > { %v1308_v28 = vpop.permute.xlu1 %1307 }
 0x331   : > { %1415 = vst.msk [vmem:[#allocation3 + $0xcf] sm:$0xfe] %vm1373_vm11, %v1308_v28 }
 0x332   : > { %v1823_v49 = vpop.permute.xlu0 %1822 }
 0x333   : > { %1932 = vst.msk [vmem:[#allocation3 + $0xc7] sm:$0xff] %vm1894_vm5, %v1823_v49 }
 0x334   : > { %v1312_v55 = vpop.permute.xlu1 %1311 }
 0x335   : > { %1417 = vst.msk [vmem:[#allocation3 + $0xdf] sm:$0x1] %vm1377_vm12, %v1312_v55 }
 0x336   : > { %v1310_v43 = vpop.permute.xlu0 %1309 }
 0x337   : > { %1416 = vst.msk [vmem:[#allocation3 + $0xd7] sm:$0xff] %vm1375_vm13, %v1310_v43 }
 0x338   : > { %v2016_v20 = vpop.permute.xlu1 %2015 }
 0x339   : > { %2126 = vst.msk [vmem:[#allocation3 + $0xbe] sm:$0xfc] %vm5757_vm6, %v2016_v20  ;;  %vm5844_vm6 = vcmask 458112  }
 0x33a   : > { %v1825_v7 = vpop.permute.xlu0 %1824 }
 0x33b   : > { %1933 = vst.msk [vmem:[#allocation3 + $0xcf] sm:$0x1] %vm1896_vm2, %v1825_v7 }
 0x33c   : > { %v1503_v38 = vpop.permute.xlu1 %1502 }
 0x33d   : > { %1610 = vst.msk [vmem:[#allocation3 + $0xce] sm:$0xfc] %vm5838_vm15, %v1503_v38  ;;  %vm5842_vm15 = vcmask 845568  }
 0x33e   : > { %v2018_v58 = vpop.permute.xlu0 %2017  ;;  %v3343_v0 = vpop.f32.mrb[12].mxu0 }
 0x33f   : > { %2127 = vst.msk [vmem:[#allocation3 + $0xc6] sm:$0xff] %vm2089_vm1, %v2018_v58  ;;  %v2419_v6 = vadd.f32 %v3343_v0, %v5110_v22  ;;  %v2413_v51 = vpop.f32.mrb[13].mxu0 }
 0x340   : > { %v2414_v25 = vadd.f32 %v5110_v22, %v2413_v51  ;;  %v1507_v13 = vpop.permute.xlu1 %1506 }
 0x341   : > { %1612 = vst.msk [vmem:[#allocation3 + $0xde] sm:$0x3] %vm5839_vm14, %v1507_v13  ;;  %v2525_v57 = vmax.f32 %v2419_v6, 0.0  ;;  %vm5843_vm14 = vcmask 451968  }
 0x342   : > { %v2524_v24 = vmax.f32 %v2414_v25, 0.0  ;;  %v1505_v18 = vpop.permute.xlu0 %1504 }
 0x343   : > { %1611 = vst.msk [vmem:[#allocation3 + $0xd6] sm:$0xff] %vm5840_vm9, %v1505_v18 }
 0x344   : > { %v988_v5 = vpop.permute.xlu1 %987  ;;  %3405 = vmatprep.mubr.msk.f32.mxu1 %vm2552_vm3, %v2524_v24 }
 0x345   : > { %1092 = vst.msk [vmem:[#allocation3 + $0xde] sm:$0xfc] %vm5841_vm8, %v988_v5  ;;  %3406 = vmatmul.mubr.msk.f32.gmra.mrb[12].mxu1 %vm2552_vm3, %v2525_v57  ;;  %vm5847_vm8 = vcmask 851714  }
 0x346   : > { %v2020_v2 = vpop.permute.xlu0 %2019  ;;  %v2162_v11 = vld [vmem:[#allocation3 + $0xc0] sm:$0xff] }
 0x347   : > { %2128 = vst.msk [vmem:[#allocation3 + $0xce] sm:$0x3] %vm5842_vm15, %v2020_v2  ;;  %3359 = vmatprep.mubr.msk.f32.mxu0 %vm2190_vm7, %v2162_v11  ;;  %vm5848_vm15 = vcmask 654912  }
 0x348   : > { %v992_v52 = vpop.permute.xlu1 %991 }
 0x349   : > { %1094 = vst.msk [vmem:[#allocation3 + $0xee] sm:$0x3] %vm5843_vm14, %v992_v52  ;;  %vm5849_vm14 = vcmask 654914  }
 0x34a   : > { %v990_v60 = vpop.permute.xlu0 %989 }
 0x34b   : > { %1093 = vst.msk [vmem:[#allocation3 + $0xe6] sm:$0xff] %vm5844_vm6, %v990_v60  ;;  %vm5845_vm6 = vcmask 261120  }
 0x34c   : > { %v1674_v10 = vpop.permute.xlu1 %1673  ;;  %vm5846_vm9 = vmmov %vm5845_vm6 }
 0x34d   : > { %1743 = vst.msk [vmem:[#allocation3 + $0xd8] sm:$0xff] %vm1715_vm0, %v1674_v10 }
 0x34e   : > { %v1672_v17 = vpop.permute.xlu0 %1671  ;;  %v2163_v53 = vld [vmem:[#allocation3 + $0xc8] sm:$0xff] }
 0x34f   : > { %1742 = vst.msk [vmem:[#allocation3 + $0xd0] sm:$0xff] %vm1715_vm0, %v1672_v17  ;;  %3360 = vmatmul.mubr.msk.f32.gmra.mrb[24].mxu0 %vm2190_vm7, %v2163_v53 }
 0x350   : > { %v1158_v41 = vpop.permute.xlu1 %1157 }
 0x351   : > { %1225 = vst.msk [vmem:[#allocation3 + $0xe8] sm:$0xff] %vm1195_vm10, %v1158_v41 }
 0x352   : > { %v1156_v1 = vpop.permute.xlu0 %1155 }
 0x353   : > { %1224 = vst.msk [vmem:[#allocation3 + $0xe0] sm:$0xff] %vm1195_vm10, %v1156_v1 }
 0x354   : > { %v1829_v27 = vpop.permute.xlu1 %1828  ;;  %v3389_v30 = vpop.f32.mrb[0].mxu1 }
 0x355   : > { %1935 = vst.msk [vmem:[#allocation3 + $0xd7] sm:$0xff] %vm1894_vm5, %v1829_v27  ;;  %v2875_v26 = vadd.f32 %v3389_v30, %v3889_v33  ;;  %v2715_v23 = vpop.f32.mrb[1].mxu1 }
 0x356   : > { %v2874_v15 = vadd.f32 %v2715_v23, %v3887_v32  ;;  %v1827_v39 = vpop.permute.xlu0 %1826 }
 0x357   : > { %2907 = vst.msk [vmem:[#allocation2 + $0x8] sm:$0xff] %vm5845_vm6, %v2875_v26  ;;  %vm5850_vm6 = vcmask 845568  }
 0x358   : > { %1934 = vst.msk [vmem:[#allocation3 + $0xcf] sm:$0xfe] %vm1892_vm4, %v1827_v39  ;;  %v1316_v16 = vpop.permute.xlu1 %1315 }
 0x359   : > { %2906 = vst.msk [vmem:[#allocation2] sm:$0xff] %vm5846_vm9, %v2874_v15  ;;  %vm5851_vm9 = vcmask 648768  }
 0x35a   : > { %1419 = vst.msk [vmem:[#allocation3 + $0xe7] sm:$0xff] %vm1375_vm13, %v1316_v16  ;;  %v1314_v9 = vpop.permute.xlu0 %1313 }
 0x35b   : > { %1418 = vst.msk [vmem:[#allocation3 + $0xdf] sm:$0xfe] %vm1373_vm11, %v1314_v9 }
 0x35c   : > { %v1831_v62 = vpop.permute.xlu1 %1830 }
 0x35d   : > { %1936 = vst.msk [vmem:[#allocation3 + $0xdf] sm:$0x1] %vm1896_vm2, %v1831_v62 }
 0x35e   : > { %v1318_v33 = vpop.permute.xlu0 %1317 }
 0x35f   : > { %1420 = vst.msk [vmem:[#allocation3 + $0xef] sm:$0x1] %vm1377_vm12, %v1318_v33 }
 0x360   : > { %v2024_v32 = vpop.permute.xlu1 %2023  ;;  %v3346_v59 = vpop.f32.mrb[14].mxu0 }
 0x361   : > { %2130 = vst.msk [vmem:[#allocation3 + $0xd6] sm:$0xff] %vm2089_vm1, %v2024_v32  ;;  %v2429_v48 = vadd.f32 %v3346_v59, %v5110_v22  ;;  %v2423_v19 = vpop.f32.mrb[15].mxu0 }
 0x362   : > { %v2424_v42 = vadd.f32 %v5110_v22, %v2423_v19  ;;  %v2022_v3 = vpop.permute.xlu0 %2021 }
 0x363   : > { %2129 = vst.msk [vmem:[#allocation3 + $0xce] sm:$0xfc] %vm5847_vm8, %v2022_v3  ;;  %v2527_v35 = vmax.f32 %v2429_v48, 0.0  ;;  %vm5852_vm8 = vcmask 458112  }
 0x364   : > { %v2526_v37 = vmax.f32 %v2424_v42, 0.0  ;;  %v1511_v21 = vpop.permute.xlu1 %1510  ;;  %v5493_v42 = vld [vmem:[%s3808_s29] ss:$0 sm:$0xff] }
 0x365   : > { %1614 = vst.msk [vmem:[#allocation3 + $0xe6] sm:$0xff] %vm5848_vm15, %v1511_v21  ;;  %vm5853_vm15 = vcmask 458114  }
 0x366   : > { %v1509_v4 = vpop.permute.xlu0 %1508  ;;  %3408 = vmatprep.mubr.msk.f32.mxu1 %vm2552_vm3, %v2526_v37 }
 0x367   : > { %1613 = vst.msk [vmem:[#allocation3 + $0xde] sm:$0xfc] %vm5849_vm14, %v1509_v4  ;;  %3409 = vmatmul.mubr.msk.f32.gmra.mrb[14].mxu1 %vm2552_vm3, %v2527_v35  ;;  %vm5854_vm14 = vcmask 451968  }
 0x368   : > { %v2026_v46 = vpop.permute.xlu1 %2025 }
 0x369   : > { %2131 = vst.msk [vmem:[#allocation3 + $0xde] sm:$0x3] %vm5850_vm6, %v2026_v46  ;;  %vm5855_vm6 = vcmask 261120  }
 0x36a   : > { %v1513_v45 = vpop.permute.xlu0 %1512  ;;  %v2164_v14 = vld [vmem:[#allocation3 + $0xd0] sm:$0xff] }
 0x36b   : > { %1615 = vst.msk [vmem:[#allocation3 + $0xee] sm:$0x3] %vm5851_vm9, %v1513_v45  ;;  %3362 = vmatprep.mubr.msk.f32.mxu0 %vm2190_vm7, %v2164_v14  ;;  %vm5856_vm9 = vmmov %vm5855_vm6 }
 0x36c   : > { %v996_v63 = vpop.permute.xlu1 %995 }
 0x36d   : > { %1096 = vst.msk [vmem:[#allocation3 + $0xf6] sm:$0xff] %vm5852_vm8, %v996_v63  ;;  %vm5857_vm8 = vcmask 851714  }
 0x36e   : > { %v994_v12 = vpop.permute.xlu0 %993 }
 0x36f   : > { %1095 = vst.msk [vmem:[#allocation3 + $0xee] sm:$0xfc] %vm5853_vm15, %v994_v12  ;;  %vm5862_vm15 = vmmov %vm5855_vm6 }
 0x370   : > { %v2165_v31 = vld [vmem:[#allocation3 + $0xd8] sm:$0xff]  ;;  %v1676_v54 = vpop.permute.xlu1 %1675 }
 0x371   : > { %3363 = vmatmul.mubr.msk.f32.gmra.mrb[26].mxu0 %vm2190_vm7, %v2165_v31  ;;  %1744 = vst.msk [vmem:[#allocation3 + $0xe0] sm:$0xff] %vm1715_vm0, %v1676_v54  ;;  %v5868_v31 = vld [vmem:[#allocation13_spill] sm:$0xff] }
 0x372   : > { %v998_v29 = vpop.permute.xlu0 %997 }
 0x373   : > { %1097 = vst.msk [vmem:[#allocation3 + $0xfe] sm:$0x3] %vm5854_vm14, %v998_v29  ;;  %vm5863_vm14 = vmmov %vm5855_vm6 }
 0x374   : > { %v3392_v28 = vpop.f32.mrb[2].mxu1  ;;  %v1160_v49 = vpop.permute.xlu1 %1159 }
 0x375   : > { %v2877_v55 = vadd.f32 %v3392_v28, %v3912_v44  ;;  %v2725_v43 = vpop.f32.mrb[3].mxu1  ;;  %1226 = vst.msk [vmem:[#allocation3 + $0xf0] sm:$0xff] %vm1195_vm10, %v1160_v49  ;;  %v5869_v28 = vld [vmem:[#allocation11_spill] sm:$0xff] }
 0x376   : > { %v2876_v20 = vadd.f32 %v2725_v43, %v3891_v34  ;;  %v1678_v7 = vpop.permute.xlu0 %1677 }
 0x377   : > { %2909 = vst.msk [vmem:[#allocation2 + $0x18] sm:$0xff] %vm5855_vm6, %v2877_v55 }
 0x378   : > { %1745 = vst.msk [vmem:[#allocation3 + $0xe8] sm:$0xff] %vm1715_vm0, %v1678_v7  ;;  %v1833_v38 = vpop.permute.xlu1 %1832 }
 0x379   : > { %2908 = vst.msk [vmem:[#allocation2 + $0x10] sm:$0xff] %vm5856_vm9, %v2876_v20 }
 0x37a   : > { %1937 = vst.msk [vmem:[#allocation3 + $0xdf] sm:$0xfe] %vm1892_vm4, %v1833_v38  ;;  %v1162_v58 = vpop.permute.xlu0 %1161 }
 0x37b   : > { %1227 = vst.msk [vmem:[#allocation3 + $0xf8] sm:$0xff] %vm1195_vm10, %v1162_v58  ;;  %vm5858_vm10 = vcmask 654914   ;;  %v5872_v58 = vld [vmem:[#allocation15_spill] sm:$0xff] }
 0x37c   : > { %v1320_v0 = vpop.permute.xlu1 %1319 }
 0x37d   : > { %1421 = vst.msk [vmem:[#allocation3 + $0xef] sm:$0xfe] %vm1373_vm11, %v1320_v0  ;;  %vm5859_vm11 = vcmask 648768  }
 0x37e   : > { %v1835_v44 = vpop.permute.xlu0 %1834 }
 0x37f   : > { %1938 = vst.msk [vmem:[#allocation3 + $0xe7] sm:$0xff] %vm1894_vm5, %v1835_v44 }
 0x380   : > { %v1324_v34 = vpop.permute.xlu1 %1323 }
 0x381   : > { %1423 = vst.msk [vmem:[#allocation3 + $0xff] sm:$0x1] %vm1377_vm12, %v1324_v34  ;;  %vm5860_vm12 = vcmask 654912   ;;  %v5873_v34 = vld [vmem:[#allocation12_spill] sm:$0xff] }
 0x382   : > { %v1322_v6 = vpop.permute.xlu0 %1321 }
 0x383   : > { %1422 = vst.msk [vmem:[#allocation3 + $0xf7] sm:$0xff] %vm1375_vm13, %v1322_v6  ;;  %vm5861_vm13 = vcmask 845568  }
 0x384   : > { %v2028_v51 = vpop.permute.xlu1 %2027 }
 0x385   : > { %2132 = vst.msk [vmem:[#allocation3 + $0xde] sm:$0xfc] %vm5857_vm8, %v2028_v51 }
 0x386   : > { %v1837_v25 = vpop.permute.xlu0 %1836 }
 0x387   : > { %1939 = vst.msk [vmem:[#allocation3 + $0xef] sm:$0x1] %vm1896_vm2, %v1837_v25 }
 0x388   : > { %v1515_v13 = vpop.permute.xlu1 %1514 }
 0x389   : > { %1616 = vst.msk [vmem:[#allocation3 + $0xee] sm:$0xfc] %vm5858_vm10, %v1515_v13 }
 0x38a   : > { %v2030_v24 = vpop.permute.xlu0 %2029  ;;  %v3349_v18 = vpop.f32.mrb[16].mxu0 }
 0x38b   : > { %2133 = vst.msk [vmem:[#allocation3 + $0xe6] sm:$0xff] %vm2089_vm1, %v2030_v24  ;;  %v2439_v57 = vadd.f32 %v3349_v18, %v5110_v22  ;;  %v2433_v5 = vpop.f32.mrb[17].mxu0 }
 0x38c   : > { %v2434_v2 = vadd.f32 %v5110_v22, %v2433_v5  ;;  %v1519_v11 = vpop.permute.xlu1 %1518 }
 0x38d   : > { %1618 = vst.msk [vmem:[#allocation3 + $0xfe] sm:$0x3] %vm5859_vm11, %v1519_v11  ;;  %v2529_v10 = vmax.f32 %v2439_v57, 0.0 }
 0x38e   : > { %v2528_v52 = vmax.f32 %v2434_v2, 0.0  ;;  %v1517_v60 = vpop.permute.xlu0 %1516  ;;  %v5876_v2 = vld [vmem:[#allocation17_spill] sm:$0xff] }
 0x38f   : > { %1617 = vst.msk [vmem:[#allocation3 + $0xf6] sm:$0xff] %vm5860_vm12, %v1517_v60  ;;  %v5877_v60 = vld [vmem:[#allocation14_spill] sm:$0xff] }
 0x390   : > { %3411 = vmatprep.mubr.msk.f32.mxu1 %vm2552_vm3, %v2528_v52  ;;  %v3576_v17 = vpop.permute.xlu1 %3575 }
 0x391   : > { %3412 = vmatmul.mubr.msk.f32.gmra.mrb[16].mxu1 %vm2552_vm3, %v2529_v10  ;;  %v3578_v53 = vunpack.i.h.bf16 %v3576_v17  ;;  %v3577_v41 = vunpack.i.l.bf16 %v3576_v17 }
 0x392   : > { %v2032_v1 = vpop.permute.xlu0 %2031  ;;  %v2166_v27 = vld [vmem:[#allocation3 + $0xe0] sm:$0xff] }
 0x393   : > { %2134 = vst.msk [vmem:[#allocation3 + $0xee] sm:$0x3] %vm5861_vm13, %v2032_v1  ;;  %3365 = vmatprep.mubr.msk.f32.mxu0 %vm2190_vm7, %v2166_v27 }
 0x394   : > { %1746 = vst.msk [vmem:[#allocation3 + $0xf0] sm:$0xff] %vm1715_vm0, %v3577_v41  ;;  %1747 = vst.msk [vmem:[#allocation3 + $0xf8] sm:$0xff] %vm1715_vm0, %v3578_v53  ;;  %v3395_v22 = vpop.f32.mrb[4].mxu1  ;;  %v1843_v30 = vpop.permute.xlu1 %1842 }
 0x395   : > { %v2879_v26 = vadd.f32 %v3395_v22, %v3928_v50  ;;  %v2735_v23 = vpop.f32.mrb[5].mxu1  ;;  %1942 = vst.msk [vmem:[#allocation3 + $0xff] sm:$0x1] %vm1896_vm2, %v1843_v30  ;;  %vm5864_vm0 = vmmov %vm5861_vm13 }
 0x396   : > { %v2878_v15 = vadd.f32 %v2735_v23, %v3898_v40  ;;  %v3581_v39 = vpop.permute.xlu0 %3580  ;;  %vm5865_vm2 = vmmov %vm5857_vm8 }
 0x397   : > { %2911 = vst.msk [vmem:[#allocation2 + $0x28] sm:$0xff] %vm5862_vm15, %v2879_v26  ;;  %v3583_v16 = vunpack.i.h.bf16 %v3581_v39  ;;  %v3582_v9 = vunpack.i.l.bf16 %v3581_v39  ;;  %v5880_v26 = vld [vmem:[#allocation19_spill] sm:$0xff]  ;;  %v5881_v39 = vld [vmem:[#allocation16_spill] sm:$0xff] }
 0x398   : > { %2910 = vst.msk [vmem:[#allocation2 + $0x20] sm:$0xff] %vm5863_vm14, %v2878_v15  ;;  %v2038_v62 = vpop.permute.xlu1 %2037 }
 0x399   : > { %1940 = vst.msk [vmem:[#allocation3 + $0xef] sm:$0xfe] %vm1892_vm4, %v3582_v9 }
 0x39a   : > { %1941 = vst.msk [vmem:[#allocation3 + $0xf7] sm:$0xff] %vm1894_vm5, %v3583_v16  ;;  %v3586_v33 = vpop.permute.xlu0 %3585  ;;  %v2167_v50 = vld [vmem:[#allocation3 + $0xe8] sm:$0xff] }
 0x39b   : > { %2137 = vst.msk [vmem:[#allocation3 + $0xfe] sm:$0x3] %vm5864_vm0, %v2038_v62  ;;  %v3588_v32 = vunpack.i.h.bf16 %v3586_v33  ;;  %v3587_v59 = vunpack.i.l.bf16 %v3586_v33  ;;  %3366 = vmatmul.mubr.msk.f32.gmra.mrb[28].mxu0 %vm2190_vm7, %v2167_v50 }
 0x39d   : > { %2135 = vst.msk [vmem:[#allocation3 + $0xee] sm:$0xfc] %vm5865_vm2, %v3587_v59 }
 0x39e   : > { %2136 = vst.msk [vmem:[#allocation3 + $0xf6] sm:$0xff] %vm2089_vm1, %v3588_v32  ;;  %vm5866_vm1 = vmmov %vm5855_vm6 }
 0x39f   : > { %vm5870_vm4 = vmmov %vm5866_vm1 }
 0x3a0   : > { %vm5871_vm5 = vmmov %vm5866_vm1 }
 0x3a1   : > { %vm5874_vm6 = vmmov %vm5866_vm1 }
 0x3a2   : > { %vm5875_vm9 = vmmov %vm5866_vm1 }
 0x3a3   : > { %vm5878_vm8 = vmmov %vm5866_vm1 }
 0x3a4   : > { %vm5879_vm10 = vmmov %vm5866_vm1 }
 0x3a5   : > { %v2168_v40 = vld [vmem:[#allocation3 + $0xf0] sm:$0xff]  ;;  %v2169_v48 = vld [vmem:[#allocation3 + $0xf8] sm:$0xff]  ;;  %vm5882_vm11 = vmmov %vm5866_vm1 }
 0x3a6   : > { %3368 = vmatprep.mubr.msk.f32.mxu0 %vm2190_vm7, %v2168_v40  ;;  %vm5883_vm12 = vmmov %vm5866_vm1 }
 0x3a7   : > { %3369 = vmatmul.mubr.msk.f32.gmra.mrb[30].mxu0 %vm2190_vm7, %v2169_v48  ;;  %vm5867_vm7 = vmmov %vm5866_vm1 }
 0x3a8   : > { %vm5885_vm13 = vmmov %vm5866_vm1 }
 0x3a9   : > { %vm5886_vm15 = vmmov %vm5866_vm1 }
 0x3aa   : > { %vm5889_vm14 = vmmov %vm5866_vm1 }
 0x3ab   : > { %vm5890_vm0 = vmmov %vm5866_vm1 }
 0x3ac   : > { %v3352_v19 = vpop.f32.mrb[18].mxu0  ;;  %vm5893_vm2 = vmmov %vm5890_vm0 }
 0x3ad   : > { %v2449_v3 = vadd.f32 %v5493_v42, %v3352_v19  ;;  %v2443_v37 = vpop.f32.mrb[19].mxu0 }
 0x3ae   : > { %v2444_v21 = vadd.f32 %v5493_v42, %v2443_v37 }
 0x3af   : > { %v2531_v4 = vmax.f32 %v2449_v3, 0.0  ;;  %v5884_v3 = vld [vmem:[#allocation18_spill] sm:$0xff] }
 0x3b0   : > { %v2530_v35 = vmax.f32 %v2444_v21, 0.0 }
 0x3b2   : > { %3414 = vmatprep.mubr.msk.f32.mxu1 %vm2552_vm3, %v2530_v35 }
 0x3b3   : > { %3415 = vmatmul.mubr.msk.f32.gmra.mrb[18].mxu1 %vm2552_vm3, %v2531_v4 }
 0x3b4   : > { %v3398_v46 = vpop.f32.mrb[6].mxu1 }
 0x3b5   : > { %v2881_v45 = vadd.f32 %v3398_v46, %v3946_v56  ;;  %v2745_v14 = vpop.f32.mrb[7].mxu1 }
 0x3b6   : > { %v2880_v63 = vadd.f32 %v2745_v14, %v3920_v47 }
 0x3b7   : > { %2913 = vst.msk [vmem:[#allocation2 + $0x38] sm:$0xff] %vm5866_vm1, %v2881_v45  ;;  %vm5894_vm1 = vmmov %vm5890_vm0 }
 0x3b8   : > { %2912 = vst.msk [vmem:[#allocation2 + $0x30] sm:$0xff] %vm5867_vm7, %v2880_v63  ;;  %vm5898_vm7 = vmmov %vm5890_vm0 }
 0x3d4   : > { %v3401_v12 = vpop.f32.mrb[8].mxu1 }
 0x3d5   : > { %v2883_v54 = vadd.f32 %v3401_v12, %v5868_v31  ;;  %v2755_v29 = vpop.f32.mrb[9].mxu1 }
 0x3d6   : > { %v2882_v49 = vadd.f32 %v2755_v29, %v5869_v28  ;;  %v3355_v55 = vpop.f32.mrb[20].mxu0 }
 0x3d7   : > { %2915 = vst.msk [vmem:[#allocation2 + $0x48] sm:$0xff] %vm5870_vm4, %v2883_v54  ;;  %v2459_v43 = vadd.f32 %v5493_v42, %v3355_v55  ;;  %v2453_v20 = vpop.f32.mrb[21].mxu0  ;;  %vm5901_vm4 = vmmov %vm5890_vm0 }
 0x3d8   : > { %2914 = vst.msk [vmem:[#allocation2 + $0x40] sm:$0xff] %vm5871_vm5, %v2882_v49  ;;  %v2454_v47 = vadd.f32 %v5493_v42, %v2453_v20  ;;  %v5887_v49 = vld [vmem:[#allocation22_spill] sm:$0xff]  ;;  %v5888_v20 = vld [vmem:[#allocation20_spill] sm:$0xff]  ;;  %vm5902_vm5 = vmmov %vm5890_vm0 }
 0x3d9   : > { %v2533_v7 = vmax.f32 %v2459_v43, 0.0 }
 0x3da   : > { %v2532_v56 = vmax.f32 %v2454_v47, 0.0 }
 0x3dc   : > { %3417 = vmatprep.mubr.msk.f32.mxu1 %vm2552_vm3, %v2532_v56 }
 0x3dd   : > { %3418 = vmatmul.mubr.msk.f32.gmra.mrb[20].mxu1 %vm2552_vm3, %v2533_v7  ;;  %v5891_v7 = vld [vmem:[#allocation24_spill] sm:$0xff] }
 0x3f4   : > { %v3404_v38 = vpop.f32.mrb[10].mxu1 }
 0x3f5   : > { %v2885_v0 = vadd.f32 %v3404_v38, %v5872_v58  ;;  %v2765_v44 = vpop.f32.mrb[11].mxu1  ;;  %v5892_v58 = vld [vmem:[#allocation21_spill] sm:$0xff] }
 0x3f6   : > { %v2884_v6 = vadd.f32 %v2765_v44, %v5873_v34  ;;  %v5895_v34 = vld [vmem:[#allocation26_spill] sm:$0xff] }
 0x3f7   : > { %2917 = vst.msk [vmem:[#allocation2 + $0x58] sm:$0xff] %vm5874_vm6, %v2885_v0  ;;  %vm5905_vm6 = vmmov %vm5890_vm0 }
 0x3f8   : > { %2916 = vst.msk [vmem:[#allocation2 + $0x50] sm:$0xff] %vm5875_vm9, %v2884_v6  ;;  %v3358_v51 = vpop.f32.mrb[22].mxu0  ;;  %vm5906_vm9 = vmmov %vm5890_vm0 }
 0x3f9   : > { %v2469_v25 = vadd.f32 %v5493_v42, %v3358_v51  ;;  %v2463_v13 = vpop.f32.mrb[23].mxu0 }
 0x3fa   : > { %v2464_v24 = vadd.f32 %v5493_v42, %v2463_v13 }
 0x3fb   : > { %v2535_v57 = vmax.f32 %v2469_v25, 0.0  ;;  %v5896_v25 = vld [vmem:[#allocation23_spill] sm:$0xff] }
 0x3fc   : > { %v2534_v18 = vmax.f32 %v2464_v24, 0.0 }
 0x3fe   : > { %3420 = vmatprep.mubr.msk.f32.mxu1 %vm2552_vm3, %v2534_v18  ;;  %v5899_v18 = vld [vmem:[#allocation28_spill] sm:$0xff] }
 0x3ff   : > { %3421 = vmatmul.mubr.msk.f32.gmra.mrb[22].mxu1 %vm2552_vm3, %v2535_v57 }
 0x418   : > { %v3407_v5 = vpop.f32.mrb[12].mxu1 }
 0x419   : > { %v2887_v11 = vadd.f32 %v3407_v5, %v5876_v2  ;;  %v2775_v52 = vpop.f32.mrb[13].mxu1  ;;  %v5900_v2 = vld [vmem:[#allocation25_spill] sm:$0xff] }
 0x41a   : > { %v2886_v10 = vadd.f32 %v2775_v52, %v5877_v60  ;;  %v5903_v60 = vld [vmem:[#allocation30_spill] sm:$0xff] }
 0x41b   : > { %2919 = vst.msk [vmem:[#allocation2 + $0x68] sm:$0xff] %vm5878_vm8, %v2887_v11  ;;  %vm5909_vm8 = vmmov %vm5890_vm0 }
 0x41c   : > { %2918 = vst.msk [vmem:[#allocation2 + $0x60] sm:$0xff] %vm5879_vm10, %v2886_v10  ;;  %vm5910_vm10 = vmmov %vm5890_vm0 }
 0x422   : > { %v3361_v17 = vpop.f32.mrb[24].mxu0 }
 0x423   : > { %v2479_v53 = vadd.f32 %v5493_v42, %v3361_v17  ;;  %v2473_v41 = vpop.f32.mrb[25].mxu0 }
 0x424   : > { %v2474_v1 = vadd.f32 %v5493_v42, %v2473_v41 }
 0x425   : > { %v2537_v22 = vmax.f32 %v2479_v53, 0.0  ;;  %v5904_v53 = vld [vmem:[#allocation27_spill] sm:$0xff] }
 0x426   : > { %v2536_v27 = vmax.f32 %v2474_v1, 0.0 }
 0x428   : > { %3423 = vmatprep.mubr.msk.f32.mxu1 %vm2552_vm3, %v2536_v27  ;;  %v5907_v27 = vld [vmem:[#allocation31_spill] sm:$0xff] }
 0x429   : > { %3424 = vmatmul.mubr.msk.f32.gmra.mrb[24].mxu1 %vm2552_vm3, %v2537_v22 }
 0x43a   : > { %v3410_v30 = vpop.f32.mrb[14].mxu1 }
 0x43b   : > { %v2889_v23 = vadd.f32 %v3410_v30, %v5880_v26  ;;  %v2785_v15 = vpop.f32.mrb[15].mxu1  ;;  %v5908_v26 = vld [vmem:[#allocation29_spill] sm:$0xff] }
 0x43c   : > { %v2888_v16 = vadd.f32 %v2785_v15, %v5881_v39 }
 0x43d   : > { %2921 = vst.msk [vmem:[#allocation2 + $0x78] sm:$0xff] %vm5882_vm11, %v2889_v23  ;;  %vm5911_vm11 = vmmov %vm5890_vm0 }
 0x43e   : > { %2920 = vst.msk [vmem:[#allocation2 + $0x70] sm:$0xff] %vm5883_vm12, %v2888_v16  ;;  %vm5912_vm12 = vmmov %vm5890_vm0 }
 0x444   : > { %v3364_v9 = vpop.f32.mrb[26].mxu0 }
 0x445   : > { %v2489_v62 = vadd.f32 %v5493_v42, %v3364_v9  ;;  %v2483_v33 = vpop.f32.mrb[27].mxu0 }
 0x446   : > { %v2484_v50 = vadd.f32 %v5493_v42, %v2483_v33  ;;  %v2944_v33 = vld [vmem:[#allocation2 + $0x10] sm:$0xff] (!%p3203_p1) }
 0x447   : > { %v2539_v59 = vmax.f32 %v2489_v62, 0.0  ;;  %v2942_v62 = vld [vmem:[#allocation2] sm:$0xff] (!%p3203_p1) }
 0x448   : > { %v2538_v32 = vmax.f32 %v2484_v50, 0.0  ;;  %v2946_v50 = vld [vmem:[#allocation2 + $0x20] sm:$0xff] (!%p3203_p1) }
 0x44a   : > { %3426 = vmatprep.mubr.msk.f32.mxu1 %vm2552_vm3, %v2538_v32  ;;  %v2947_v32 = vld [vmem:[#allocation2 + $0x28] sm:$0xff] (!%p3203_p1) }
 0x44b   : > { %3427 = vmatmul.mubr.msk.f32.gmra.mrb[26].mxu1 %vm2552_vm3, %v2539_v59  ;;  %v2948_v59 = vld [vmem:[#allocation2 + $0x30] sm:$0xff] (!%p3203_p1) }
 0x464   : > { %v3413_v40 = vpop.f32.mrb[16].mxu1 }
 0x465   : > { %v2891_v48 = vadd.f32 %v3413_v40, %v3986_v8  ;;  %v2795_v19 = vpop.f32.mrb[17].mxu1  ;;  %v2949_v40 = vld [vmem:[#allocation2 + $0x38] sm:$0xff] (!%p3203_p1) }
 0x466   : > { %v2890_v37 = vadd.f32 %v2795_v19, %v5884_v3  ;;  %v2951_v19 = vld [vmem:[#allocation2 + $0x48] sm:$0xff] (!%p3203_p1)  ;;  %v2952_v3 = vld [vmem:[#allocation2 + $0x50] sm:$0xff] (!%p3203_p1) }
 0x467   : > { %2923 = vst.msk [vmem:[#allocation2 + $0x88] sm:$0xff] %vm5885_vm13, %v2891_v48  ;;  %vm5913_vm13 = vcmask (!%p3203_p1), 261120   ;;  %v2950_v48 = vld [vmem:[#allocation2 + $0x40] sm:$0xff] (!%p3203_p1) }
 0x468   : > { %2922 = vst.msk [vmem:[#allocation2 + $0x80] sm:$0xff] %vm5886_vm15, %v2890_v37  ;;  %vm5914_vm15 = vmmov (!%p3203_p1), %vm5913_vm13  ;;  %v2953_v37 = vld [vmem:[#allocation2 + $0x58] sm:$0xff] (!%p3203_p1) }
 0x469   : > { %2974 = vst.msk [vmem:[%s3820_s11] sm:$0xff] (!%p3203_p1), %vm5913_vm13, %v2942_v62 }
 0x46e   : > { %v3367_v21 = vpop.f32.mrb[28].mxu0 }
 0x46f   : > { %v2499_v35 = vadd.f32 %v5493_v42, %v3367_v21  ;;  %v2493_v4 = vpop.f32.mrb[29].mxu0  ;;  %v2954_v21 = vld [vmem:[#allocation2 + $0x60] sm:$0xff] (!%p3203_p1) }
 0x470   : > { %v2494_v46 = vadd.f32 %v5493_v42, %v2493_v4  ;;  %v2956_v4 = vld [vmem:[#allocation2 + $0x70] sm:$0xff] (!%p3203_p1) }
 0x471   : > { %v2541_v14 = vmax.f32 %v2499_v35, 0.0  ;;  %v2955_v35 = vld [vmem:[#allocation2 + $0x68] sm:$0xff] (!%p3203_p1) }
 0x472   : > { %v2540_v45 = vmax.f32 %v2494_v46, 0.0  ;;  %v2957_v46 = vld [vmem:[#allocation2 + $0x78] sm:$0xff] (!%p3203_p1) }
 0x474   : > { %3429 = vmatprep.mubr.msk.f32.mxu1 %vm2552_vm3, %v2540_v45  ;;  %v2958_v45 = vld [vmem:[#allocation2 + $0x80] sm:$0xff] (!%p3203_p1) }
 0x475   : > { %3430 = vmatmul.mubr.msk.f32.gmra.mrb[28].mxu1 %vm2552_vm3, %v2541_v14  ;;  %v2959_v14 = vld [vmem:[#allocation2 + $0x88] sm:$0xff] (!%p3203_p1) }
 0x47a   : > { %v3370_v8 = vpop.f32.mrb[30].mxu0 }
 0x47b   : > { %v2509_v63 = vadd.f32 %v5493_v42, %v3370_v8  ;;  %v2503_v12 = vpop.f32.mrb[31].mxu0 }
 0x47c   : > { %v2504_v31 = vadd.f32 %v5493_v42, %v2503_v12 }
 0x47d   : > { %v2543_v29 = vmax.f32 %v2509_v63, 0.0 }
 0x47e   : > { %v2542_v54 = vmax.f32 %v2504_v31, 0.0 }
 0x480   : > { %3432 = vmatprep.mubr.msk.f32.mxu1 %vm2552_vm3, %v2542_v54 }
 0x481   : > { %3433 = vmatmul.mubr.msk.f32.gmra.mrb[30].mxu1 %vm2552_vm3, %v2543_v29  ;;  %vm5897_vm3 = vmmov %vm5890_vm0 }
 0x486   : > { %v3416_v28 = vpop.f32.mrb[18].mxu1 }
 0x487   : > { %v2893_v55 = vadd.f32 %v3416_v28, %v5887_v49  ;;  %v2805_v43 = vpop.f32.mrb[19].mxu1 }
 0x488   : > { %v2892_v47 = vadd.f32 %v2805_v43, %v5888_v20 }
 0x489   : > { %2925 = vst.msk [vmem:[#allocation2 + $0x98] sm:$0xff] %vm5889_vm14, %v2893_v55  ;;  %vm5915_vm14 = vmmov (!%p3203_p1), %vm5913_vm13 }
 0x48a   : > { %2924 = vst.msk [vmem:[#allocation2 + $0x90] sm:$0xff] %vm5890_vm0, %v2892_v47  ;;  %vm5916_vm0 = vmmov (!%p3203_p1), %vm5913_vm13 }
 0x48b   : > { %2976 = vst.msk [vmem:[%s3820_s11 + $0x10] sm:$0xff] (!%p3203_p1), %vm5915_vm14, %v2944_v33  ;;  %vm5929_vm13 = vmmov (!%p3203_p1), %vm5916_vm0 }
 0x48c   : > { %2990 = vst.msk [vmem:[%s3820_s11 + $0x80] sm:$0xff] (!%p3203_p1), %vm5929_vm13, %v2958_v45  ;;  %vm5931_vm14 = vmmov (!%p3203_p1), %vm5916_vm0 }
 0x490   : > { %v2961_v63 = vld [vmem:[#allocation2 + $0x98] sm:$0xff] (!%p3203_p1) }
 0x491   : > { %v2960_v8 = vld [vmem:[#allocation2 + $0x90] sm:$0xff] (!%p3203_p1)  ;;  %2993 = vst.msk [vmem:[%s3820_s11 + $0x98] sm:$0xff] (!%p3203_p1), %vm5916_vm0, %v2961_v63 }
 0x492   : > { %2992 = vst.msk [vmem:[%s3820_s11 + $0x90] sm:$0xff] (!%p3203_p1), %vm5931_vm14, %v2960_v8 }
 0x4b0   : > { %v3419_v56 = vpop.f32.mrb[20].mxu1 }
 0x4b1   : > { %v2895_v38 = vadd.f32 %v3419_v56, %v5891_v7  ;;  %v2815_v42 = vpop.f32.mrb[21].mxu1 }
 0x4b2   : > { %v2894_v0 = vadd.f32 %v2815_v42, %v5892_v58 }
 0x4b3   : > { %2927 = vst.msk [vmem:[#allocation2 + $0xa8] sm:$0xff] %vm5893_vm2, %v2895_v38  ;;  %vm5917_vm2 = vmmov (!%p3203_p1), %vm5916_vm0 }
 0x4b4   : > { %2926 = vst.msk [vmem:[#allocation2 + $0xa0] sm:$0xff] %vm5894_vm1, %v2894_v0  ;;  %vm5918_vm1 = vmmov (!%p3203_p1), %vm5916_vm0 }
 0x4b5   : > { %2978 = vst.msk [vmem:[%s3820_s11 + $0x20] sm:$0xff] (!%p3203_p1), %vm5917_vm2, %v2946_v50  ;;  %vm5932_vm2 = vmmov (!%p3203_p1), %vm5916_vm0 }
 0x4b6   : > { %2979 = vst.msk [vmem:[%s3820_s11 + $0x28] sm:$0xff] (!%p3203_p1), %vm5918_vm1, %v2947_v32  ;;  %vm5933_vm1 = vmmov (!%p3203_p1), %vm5916_vm0 }
 0x4ba   : > { %v2963_v31 = vld [vmem:[#allocation2 + $0xa8] sm:$0xff] (!%p3203_p1) }
 0x4bb   : > { %v2962_v12 = vld [vmem:[#allocation2 + $0xa0] sm:$0xff] (!%p3203_p1)  ;;  %2995 = vst.msk [vmem:[%s3820_s11 + $0xa8] sm:$0xff] (!%p3203_p1), %vm5933_vm1, %v2963_v31 }
 0x4bc   : > { %2994 = vst.msk [vmem:[%s3820_s11 + $0xa0] sm:$0xff] (!%p3203_p1), %vm5932_vm2, %v2962_v12 }
 0x4d2   : > { %v3422_v44 = vpop.f32.mrb[22].mxu1 }
 0x4d3   : > { %v2897_v6 = vadd.f32 %v3422_v44, %v5895_v34  ;;  %v2825_v51 = vpop.f32.mrb[23].mxu1 }
 0x4d4   : > { %v2896_v13 = vadd.f32 %v2825_v51, %v5896_v25 }
 0x4d5   : > { %2929 = vst.msk [vmem:[#allocation2 + $0xb8] sm:$0xff] %vm5897_vm3, %v2897_v6  ;;  %vm5919_vm3 = vmmov (!%p3203_p1), %vm5916_vm0 }
 0x4d6   : > { %2928 = vst.msk [vmem:[#allocation2 + $0xb0] sm:$0xff] %vm5898_vm7, %v2896_v13  ;;  %vm5920_vm7 = vmmov (!%p3203_p1), %vm5916_vm0 }
 0x4d7   : > { %2980 = vst.msk [vmem:[%s3820_s11 + $0x30] sm:$0xff] (!%p3203_p1), %vm5919_vm3, %v2948_v59  ;;  %vm5934_vm3 = vmmov (!%p3203_p1), %vm5916_vm0 }
 0x4d8   : > { %2981 = vst.msk [vmem:[%s3820_s11 + $0x38] sm:$0xff] (!%p3203_p1), %vm5920_vm7, %v2949_v40  ;;  %vm5935_vm7 = vmmov (!%p3203_p1), %vm5916_vm0 }
 0x4dc   : > { %v2965_v29 = vld [vmem:[#allocation2 + $0xb8] sm:$0xff] (!%p3203_p1) }
 0x4dd   : > { %v2964_v54 = vld [vmem:[#allocation2 + $0xb0] sm:$0xff] (!%p3203_p1)  ;;  %2997 = vst.msk [vmem:[%s3820_s11 + $0xb8] sm:$0xff] (!%p3203_p1), %vm5935_vm7, %v2965_v29 }
 0x4de   : > { %2996 = vst.msk [vmem:[%s3820_s11 + $0xb0] sm:$0xff] (!%p3203_p1), %vm5934_vm3, %v2964_v54 }
 0x4fc   : > { %v3425_v24 = vpop.f32.mrb[24].mxu1 }
 0x4fd   : > { %v2899_v57 = vadd.f32 %v3425_v24, %v5899_v18  ;;  %v2835_v5 = vpop.f32.mrb[25].mxu1 }
 0x4fe   : > { %v2898_v11 = vadd.f32 %v2835_v5, %v5900_v2 }
 0x4ff   : > { %2931 = vst.msk [vmem:[#allocation2 + $0xc8] sm:$0xff] %vm5901_vm4, %v2899_v57  ;;  %vm5921_vm4 = vmmov (!%p3203_p1), %vm5916_vm0 }
 0x500   : > { %2930 = vst.msk [vmem:[#allocation2 + $0xc0] sm:$0xff] %vm5902_vm5, %v2898_v11  ;;  %vm5922_vm5 = vmmov (!%p3203_p1), %vm5916_vm0 }
 0x501   : > { %2982 = vst.msk [vmem:[%s3820_s11 + $0x40] sm:$0xff] (!%p3203_p1), %vm5921_vm4, %v2950_v48  ;;  %vm5936_vm4 = vmmov (!%p3203_p1), %vm5916_vm0 }
 0x502   : > { %2983 = vst.msk [vmem:[%s3820_s11 + $0x48] sm:$0xff] (!%p3203_p1), %vm5922_vm5, %v2951_v19  ;;  %vm5937_vm5 = vmmov (!%p3203_p1), %vm5916_vm0 }
 0x506   : > { %v2967_v49 = vld [vmem:[#allocation2 + $0xc8] sm:$0xff] (!%p3203_p1) }
 0x507   : > { %v2966_v28 = vld [vmem:[#allocation2 + $0xc0] sm:$0xff] (!%p3203_p1)  ;;  %2999 = vst.msk [vmem:[%s3820_s11 + $0xc8] sm:$0xff] (!%p3203_p1), %vm5937_vm5, %v2967_v49 }
 0x508   : > { %2998 = vst.msk [vmem:[%s3820_s11 + $0xc0] sm:$0xff] (!%p3203_p1), %vm5936_vm4, %v2966_v28 }
 0x51e   : > { %v3428_v52 = vpop.f32.mrb[26].mxu1 }
 0x51f   : > { %v2901_v10 = vadd.f32 %v3428_v52, %v5903_v60  ;;  %v2845_v17 = vpop.f32.mrb[27].mxu1 }
 0x520   : > { %v2900_v41 = vadd.f32 %v2845_v17, %v5904_v53 }
 0x521   : > { %2933 = vst.msk [vmem:[#allocation2 + $0xd8] sm:$0xff] %vm5905_vm6, %v2901_v10  ;;  %vm5923_vm6 = vmmov (!%p3203_p1), %vm5916_vm0 }
 0x522   : > { %2932 = vst.msk [vmem:[#allocation2 + $0xd0] sm:$0xff] %vm5906_vm9, %v2900_v41  ;;  %vm5924_vm9 = vmmov (!%p3203_p1), %vm5916_vm0 }
 0x523   : > { %2984 = vst.msk [vmem:[%s3820_s11 + $0x50] sm:$0xff] (!%p3203_p1), %vm5923_vm6, %v2952_v3  ;;  %vm5938_vm6 = vmmov (!%p3203_p1), %vm5916_vm0 }
 0x524   : > { %2985 = vst.msk [vmem:[%s3820_s11 + $0x58] sm:$0xff] (!%p3203_p1), %vm5924_vm9, %v2953_v37  ;;  %vm5939_vm9 = vmmov (!%p3203_p1), %vm5916_vm0 }
 0x528   : > { %v2969_v43 = vld [vmem:[#allocation2 + $0xd8] sm:$0xff] (!%p3203_p1) }
 0x529   : > { %v2968_v55 = vld [vmem:[#allocation2 + $0xd0] sm:$0xff] (!%p3203_p1)  ;;  %3001 = vst.msk [vmem:[%s3820_s11 + $0xd8] sm:$0xff] (!%p3203_p1), %vm5939_vm9, %v2969_v43 }
 0x52a   : > { %3000 = vst.msk [vmem:[%s3820_s11 + $0xd0] sm:$0xff] (!%p3203_p1), %vm5938_vm6, %v2968_v55 }
 0x548   : > { %v3431_v1 = vpop.f32.mrb[28].mxu1 }
 0x549   : > { %v2903_v22 = vadd.f32 %v3431_v1, %v5907_v27  ;;  %v2855_v30 = vpop.f32.mrb[29].mxu1 }
 0x54a   : > { %v2902_v23 = vadd.f32 %v2855_v30, %v5908_v26 }
 0x54b   : > { %2935 = vst.msk [vmem:[#allocation2 + $0xe8] sm:$0xff] %vm5909_vm8, %v2903_v22  ;;  %vm5925_vm8 = vmmov (!%p3203_p1), %vm5916_vm0 }
 0x54c   : > { %2934 = vst.msk [vmem:[#allocation2 + $0xe0] sm:$0xff] %vm5910_vm10, %v2902_v23  ;;  %vm5926_vm10 = vmmov (!%p3203_p1), %vm5916_vm0 }
 0x54d   : > { %2986 = vst.msk [vmem:[%s3820_s11 + $0x60] sm:$0xff] (!%p3203_p1), %vm5925_vm8, %v2954_v21  ;;  %vm5940_vm8 = vmmov (!%p3203_p1), %vm5916_vm0 }
 0x54e   : > { %2987 = vst.msk [vmem:[%s3820_s11 + $0x68] sm:$0xff] (!%p3203_p1), %vm5926_vm10, %v2955_v35  ;;  %vm5941_vm10 = vmmov (!%p3203_p1), %vm5916_vm0 }
 0x552   : > { %2941 = sbr.rel (%p3203_p1) target bundleno = 1377 (0x561), region = 44  ;;  %v2971_v47 = vld [vmem:[#allocation2 + $0xe8] sm:$0xff] (!%p3203_p1) }
 0x553   : > { %v2970_v20 = vld [vmem:[#allocation2 + $0xe0] sm:$0xff] (!%p3203_p1)  ;;  %3003 = vst.msk [vmem:[%s3820_s11 + $0xe8] sm:$0xff] (!%p3203_p1), %vm5941_vm10, %v2971_v47 }
 0x554   : > { %v3434_v15 = vpop.f32.mrb[30].mxu1  ;;  %3002 = vst.msk [vmem:[%s3820_s11 + $0xe0] sm:$0xff] (!%p3203_p1), %vm5940_vm8, %v2970_v20 }
 0x555   : > { %v2905_v39 = vadd.f32 %v3434_v15, %v4200_v36  ;;  %v2865_v16 = vpop.f32.mrb[31].mxu1  ;;  %v2943_v36 = vld [vmem:[#allocation2 + $0x8] sm:$0xff] (!%p3203_p1) }
 0x556   : > { %v2904_v9 = vadd.f32 %v2865_v16, %v4176_v61  ;;  %2975 = vst.msk [vmem:[%s3820_s11 + $0x8] sm:$0xff] (!%p3203_p1), %vm5914_vm15, %v2943_v36  ;;  %v2945_v61 = vld [vmem:[#allocation2 + $0x18] sm:$0xff] (!%p3203_p1)  ;;  %vm5930_vm15 = vmmov (!%p3203_p1), %vm5916_vm0 }
 0x557   : > { %2937 = vst.msk [vmem:[#allocation2 + $0xf8] sm:$0xff] %vm5911_vm11, %v2905_v39  ;;  %vm5927_vm11 = vmmov (!%p3203_p1), %vm5916_vm0 }
 0x558   : > { %2936 = vst.msk [vmem:[#allocation2 + $0xf0] sm:$0xff] %vm5912_vm12, %v2904_v9  ;;  %vm5928_vm12 = vmmov (!%p3203_p1), %vm5916_vm0 }
 0x559   : > { %2977 = vst.msk [vmem:[%s3820_s11 + $0x18] sm:$0xff] %vm5916_vm0, %v2945_v61 }
 0x55a   : > { %2988 = vst.msk [vmem:[%s3820_s11 + $0x70] sm:$0xff] %vm5927_vm11, %v2956_v4  ;;  %vm5942_vm11 = vmmov %vm5916_vm0 }
 0x55b   : > { %2989 = vst.msk [vmem:[%s3820_s11 + $0x78] sm:$0xff] %vm5928_vm12, %v2957_v46  ;;  %vm5943_vm12 = vmmov %vm5916_vm0 }
 0x55c   : > { %2991 = vst.msk [vmem:[%s3820_s11 + $0x88] sm:$0xff] %vm5930_vm15, %v2959_v14 }
 0x55e   : > { %v2973_v7 = vld [vmem:[#allocation2 + $0xf8] sm:$0xff] }
 0x55f   : > { %v2972_v56 = vld [vmem:[#allocation2 + $0xf0] sm:$0xff]  ;;  %3005 = vst.msk [vmem:[%s3820_s11 + $0xf8] sm:$0xff] %vm5943_vm12, %v2973_v7 }
 0x560   : > { %3004 = vst.msk [vmem:[%s3820_s11 + $0xf0] sm:$0xff] %vm5942_vm11, %v2972_v56 }
 0x561 PF: > { %s3211_s18 = sshll.u32 %s3672_s19, 12  ;;  %s3020_s24 = sshll.u32 %s3820_s11, 4  ;;  %s5647_s24 = int_to_ptr.vmem [resolvable:$true] %s3020_s24 }
 0x562   : > { %s5644_s23 = scalar_lea.hbm %s5707_s4, %s3211_s18  ;;  %s5944_s29 = sand.u32 1, %s3660_s16  }
 0x563   : > { %s5651_s30 = scalar_lea.sflag [#allocation5], %s5944_s29  ;;  %s3590_s8 = scalar_lea.vmem %s5647_s24, 4096 }
 0x564   : > { %p3591_p2 = scmp.ne.s32.totalorder %s5647_s24, %s3590_s8  ;;  %s3696_s19 = smov [#allocation4]  }
 0x565   : > { %s3594_s20 = sshll.u32 %s3696_s19, 4  ;;  %s3595_s20 = int_to_ptr.vmem [resolvable:$false] %s3594_s20 }
 0x566   : > { %p3592_p4 = pnand %p3591_p2, %p3773_p3  ;;  %s3596_s21 = scalar_lea.vmem %s3595_s20, 8192 }
 0x567   : > { %p3597_p6 = scmp.lt.s32.totalorder %s5647_s24, %s3595_s20  ;;  %p3598_p7 = scmp.lt.s32.totalorder %s3596_s21, %s3590_s8 }
 0x568   : > { %p3593_p5 = pneg %p3592_p4 }
 0x569   : > { %p3599_p8 = por %p3598_p7, %p3597_p6 }
 0x56b   : > { %p3600_p10 = pnand %p3599_p8, %p3593_p5 }
 0x56d   : > { %3603 = shalt.err (!%p3600_p10)
}
 0x56e   : > { %s3604_s11 = scalar_lea.hbm %s5644_s23, 4096  ;;  %s3608_s7 = scalar_lea.hbm %s5707_s4, 8192 }
 0x56f   : > { %p3605_p11 = scmp.ne.s32.totalorder %s5644_s23, %s3604_s11  ;;  %p3609_p0 = scmp.lt.u32.totalorder %s5644_s23, %s5707_s4 }
 0x570   : > { %p3610_p1 = scmp.lt.u32.totalorder %s3608_s7, %s3604_s11  ;;  %p3612_p4 = scmp.lt.u32.totalorder %s3604_s11, %s5644_s23 }
 0x571   : > { %p3606_p12 = pnand %p3605_p11, %p3773_p3 }
 0x572   : > { %p3611_p2 = por %p3610_p1, %p3609_p0 }
 0x573   : > { %p3607_p13 = pneg %p3606_p12 }
 0x574   : > { %p3613_p5 = por %p3612_p4, %p3611_p2 }
 0x576   : > { %p3614_p6 = pnand %p3613_p5, %p3607_p13 }
 0x578   : > { %3617 = shalt.err (!%p3614_p6)
}
 0x579   : > { %s3697_s12 = smov 128   ;;  %s3698_s13 = smov 8  }
 0x57a   : > { %3476 = dma.vmem_to_hbm [thread:$0]  (%p3773_p3), %s5647_s24, 4096, %s5644_s23, %s5651_s30, %s3697_s12, %s3697_s12, %s3698_s13  }
 0x57b PF: > { %p3482_p7 = scmp.ge.s32.totalorder %s3684_s22, 2  ;;  %s3035_s18 = sand.u32 1, %s3656_s15  }
 0x57c   : > { %s3036_s6 = scalar_lea.sflag [#allocation5], %s3035_s18 }
 0x57d   : > { %p3479_p8 = pnand %p3482_p7, %p3783_p9 }
 0x57f   : > { %3651 = dma.done.wait (!%p3479_p8), %s3036_s6, 4096  }
 0x580   : > { %3653 = vsyncadd (!%p3479_p8), %s3036_s6, 4294963200  ;;  %s17_s22 = sadd.s32 1, %s3684_s22   ;;  %s5945_s18 = sld [smem:[#allocation7_spill]] }
 0x581   : > { %p14_p10 = scmp.ge.s32.totalorder %s17_s22, 6   ;;  %s5946_s19 = sld [smem:[#allocation8_spill]] }
 0x582   : > { %s5947_s20 = sld [smem:[#allocation9_spill]]  ;;  %s5948_s21 = sld [smem:[#allocation10_spill]] }
 0x583   : > { %s5949_s15 = smov %s3660_s16  ;;  %s5950_s16 = smov %s3664_s17 }
 0x584   : > { %s5951_s17 = smov %s3791_s5  ;;  %16 = sbr.rel (!%p14_p10) target bundleno = 5 (0x5), region = 88 }
 0x58b   :  { %3041 = vsyncpa [#allocation5], 1 }
 0x58c   :  { %3043 = vsyncpa [#allocation5 + $0x1], 1 }

</bundles_post_ra>
